<compile_context>
chip_gen: v6e
topology: v6e:2x2x1
jax: 0.10.0
libtpu: 0.0.40
codegen_flags: <defaults>
</compile_context>

<pallas_src>
import math

import jax
import jax.numpy as jnp
from jax.experimental import pallas as pl
from jax.experimental.pallas import tpu as pltpu

EPS_NORM = 1e-6
EPS_COS = 1e-6
VMEM_LIMIT_BYTES = 32 * 1024 * 1024   # fits v5e/v6e/v7x scoped VMEM
SEQ_TILE_TARGET = 256


def _pick_seq_tile(s, target=SEQ_TILE_TARGET):
    """Largest multiple-of-8 divisor of s that is <= target (or s itself)."""
    if s <= target:
        return s
    start = target - (target % 8)
    for cand in range(start, 7, -8):
        if s % cand == 0:
            return cand
    return s


# ---------------------------------------------------------------------------
# Kernel 1: AdaRMSNorm (scale precomputed) + QKV projection
#           + cosine-sim scaling + RoPE, tiled over sequence rows.
#           Emits bf16 processed-Q (TS, D) and processed-K‖V (TS, 2D).
# ---------------------------------------------------------------------------
def _make_norm_qkv_rope_kernel(nh, d_head, d4):
    D = nh * d_head

    def kernel(x_ref, ada_ref, theta_ref, sqrt_scale_ref, w_qkv_t_ref,
               q_ref, kv_ref):
        x = x_ref[0]                                       # (TS, D)  f32
        ada = ada_ref[0]                                   # (1, D)   f32
        mean_sq = jnp.mean(x * x, axis=-1, keepdims=True)  # (TS, 1)
        x_n = x * (ada * jax.lax.rsqrt(mean_sq + EPS_NORM))
        # bf16 MXU operands, f32 accumulation; weight already bf16 + transposed.
        qkv = jnp.dot(x_n.astype(jnp.bfloat16), w_qkv_t_ref[...],
                      preferred_element_type=jnp.float32)  # (TS, 3D) f32

        q_heads = []
        k_heads = []
        for h in range(nh):                   # static unroll over heads
            lo = h * d_head
            q = qkv[:, lo:lo + d_head]                     # (TS, e) f32
            k = qkv[:, D + lo:D + lo + d_head]             # (TS, e) f32

            # scale_for_cosine_sim (f32)
            ss = sqrt_scale_ref[h]            # scalar from SMEM (= sqrt(scale_h))
            q = q * (ss * jax.lax.rsqrt(
                jnp.sum(q * q, axis=-1, keepdims=True) + EPS_COS))
            k = k * (ss * jax.lax.rsqrt(
                jnp.sum(k * k, axis=-1, keepdims=True) + EPS_COS))

            # apply_rotary_emb_: rotate first 2*d4 channels, pass-through rest.
            th = theta_ref[0, :, h * d4:(h + 1) * d4]      # (TS, d4)
            c, s = jnp.cos(th), jnp.sin(th)                # EUP

            def rope(t):
                t1 = t[:, :d4]
                t2 = t[:, d4:2 * d4]
                t3 = t[:, 2 * d4:]
                return jnp.concatenate(
                    [t1 * c - t2 * s, t2 * c + t1 * s, t3], axis=-1)

            q_heads.append(rope(q))
            k_heads.append(rope(k))

        q_all = jnp.concatenate(q_heads, axis=-1)                       # (TS, D)
        kv_all = jnp.concatenate(k_heads + [qkv[:, 2 * D:3 * D]], -1)   # (TS, 2D)
        q_ref[0] = q_all.astype(jnp.bfloat16)
        kv_ref[0] = kv_all.astype(jnp.bfloat16)

    return kernel


# ---------------------------------------------------------------------------
# Kernel 2: attention (all heads) + out-proj + residual, q-row tiled.
# q/k are already cosine-sim scaled and RoPE'd; softmax scale = 1.0.
# ---------------------------------------------------------------------------
def _make_attn_out_kernel(nh, d_head):
    D = nh * d_head

    def kernel(skip_ref, q_ref, kv_ref, w_out_t_ref, o_ref):
        head_outs = []
        for h in range(nh):                   # static unroll over heads
            lo = h * d_head
            q = q_ref[0, :, lo:lo + d_head]                 # (TQ, e) bf16
            k = kv_ref[0, :, lo:lo + d_head]                # (S,  e) bf16
            v = kv_ref[0, :, D + lo:D + lo + d_head]        # (S,  e) bf16

            s = jax.lax.dot_general(
                q, k, dimension_numbers=(((1,), (1,)), ((), ())),
                preferred_element_type=jnp.float32)          # (TQ, S) f32
            m = jnp.max(s, axis=-1, keepdims=True)
            p = jnp.exp(s - m)
            p = p * pl.reciprocal(jnp.sum(p, axis=-1, keepdims=True), approx=True)
            head_outs.append(
                jnp.dot(p.astype(jnp.bfloat16), v,
                        preferred_element_type=jnp.float32))  # (TQ, e) f32

        # merge heads along lanes -> lane-dense (TQ, D); fused out-proj + skip.
        attn = jnp.concatenate(head_outs, axis=-1)            # (TQ, D)
        o_ref[0] = jnp.dot(attn.astype(jnp.bfloat16), w_out_t_ref[...],
                           preferred_element_type=jnp.float32) + skip_ref[0]

    return kernel


# ---------------------------------------------------------------------------
# Wrapper
# ---------------------------------------------------------------------------
def self_attention_block(x, pos, cond, params, d_head):
    N, H, W, D = x.shape
    S = H * W
    nh = D // d_head
    d4 = d_head // 4

    x_flat = x.reshape(N, S, D).astype(jnp.float32)

    # Hoisted AdaRMSNorm linear: (N, C) @ (C, D) once in XLA, not per grid step.
    ada = (cond.astype(jnp.float32) @ params["w_norm"].T.astype(jnp.float32)
           + 1.0).reshape(N, 1, D)

    # Weights: pre-transposed, pre-cast to bf16 (MXU operands).
    w_qkv_t = params["w_qkv"].T.astype(jnp.bfloat16)      # (D, 3D)
    w_out_t = params["w_out"].T.astype(jnp.bfloat16)      # (D, D)
    sqrt_scale = jnp.sqrt(params["scale"]).astype(jnp.float32)   # (nh,)

    # AxialRoPE angles, lane-packed: theta[..., h*d4:(h+1)*d4] is head h.
    pos_flat = pos.reshape(N, S, 2).astype(jnp.float32)
    freqs = params["freqs"].astype(jnp.float32)           # (nh, d_head // 8)
    theta_h = pos_flat[:, :, 0:1, None] * freqs[None, None]       # (N,S,nh,d8)
    theta_w = pos_flat[:, :, 1:2, None] * freqs[None, None]
    theta = jnp.concatenate([theta_h, theta_w], axis=-1).reshape(N, S, nh * d4)

    # --- kernel 1: AdaRMSNorm + QKV proj + cosine-sim + RoPE (row-tiled) ---
    TS = _pick_seq_tile(S)
    norm_kernel = _make_norm_qkv_rope_kernel(nh, d_head, d4)
    q_proc, kv_proc = pl.pallas_call(
        norm_kernel,
        out_shape=(jax.ShapeDtypeStruct((N, S, D), jnp.bfloat16),
                   jax.ShapeDtypeStruct((N, S, 2 * D), jnp.bfloat16)),
        grid=(N, S // TS),
        in_specs=[
            pl.BlockSpec((1, TS, D), lambda n, s: (n, s, 0)),         # x rows
            pl.BlockSpec((1, 1, D), lambda n, s: (n, 0, 0)),          # ada scale
            pl.BlockSpec((1, TS, nh * d4), lambda n, s: (n, s, 0)),   # theta rows
            pl.BlockSpec(memory_space=pltpu.MemorySpace.SMEM),        # sqrt(scale)
            pl.BlockSpec((D, 3 * D), lambda n, s: (0, 0)),            # resident W_qkv^T
        ],
        out_specs=[
            pl.BlockSpec((1, TS, D), lambda n, s: (n, s, 0)),         # processed Q
            pl.BlockSpec((1, TS, 2 * D), lambda n, s: (n, s, 0)),     # processed K ‖ V
        ],
        compiler_params=pltpu.CompilerParams(
            dimension_semantics=("parallel", "parallel"),
            vmem_limit_bytes=VMEM_LIMIT_BYTES),
    )(x_flat, ada, theta, sqrt_scale, w_qkv_t)

    # --- kernel 2: attention (all heads) + out-proj + residual, q-row tiled ---
    # TODO(synk): add flash-style KV-axis tiling (online softmax) for very long
    # sequences on v7x; current kernel keeps the full K/V per q-row tile.
    TQ = _pick_seq_tile(S)
    attn_kernel = _make_attn_out_kernel(nh, d_head)
    out = pl.pallas_call(
        attn_kernel,
        out_shape=jax.ShapeDtypeStruct((N, S, D), jnp.float32),
        grid=(N, S // TQ),
        in_specs=[
            pl.BlockSpec((1, TQ, D), lambda n, q: (n, q, 0)),         # skip rows (f32)
            pl.BlockSpec((1, TQ, D), lambda n, q: (n, q, 0)),         # Q rows (bf16)
            pl.BlockSpec((1, S, 2 * D), lambda n, q: (n, 0, 0)),      # full K‖V (bf16)
            pl.BlockSpec((D, D), lambda n, q: (0, 0)),                # resident W_out^T
        ],
        out_specs=pl.BlockSpec((1, TQ, D), lambda n, q: (n, q, 0)),
        input_output_aliases={0: 0},   # reuse the skip buffer for the output
        compiler_params=pltpu.CompilerParams(
            dimension_semantics=("parallel", "parallel"),
            vmem_limit_bytes=VMEM_LIMIT_BYTES),
    )(x_flat, q_proc, kv_proc, w_out_t)

    return out.reshape(N, H, W, D)


# ---------------------------------------------------------------------------
# Parameter init (deterministic; shapes from SelfAttentionBlock.__init__)
# ---------------------------------------------------------------------------
def init_params(key, d_model, d_head, cond_features):
    nh = d_model // d_head
    k1, k2, k3 = jax.random.split(key, 3)
    # NOTE: the PyTorch module zero-inits AdaRMSNorm.linear and out_proj; here we
    # use small deterministic random weights so the kernel path is exercised.
    w_norm = 0.1 * jax.random.normal(k1, (d_model, cond_features), jnp.float32)
    w_qkv = jax.random.normal(k2, (3 * d_model, d_model), jnp.float32) / math.sqrt(d_model)
    w_out = jax.random.normal(k3, (d_model, d_model), jnp.float32) / math.sqrt(d_model)
    scale = jnp.full((nh,), 10.0, jnp.float32)
    # AxialRoPE buffer
    dim = d_head // 2
    n_freqs = nh * dim // 4
    freqs = jnp.exp(jnp.linspace(math.log(math.pi), math.log(10.0 * math.pi),
                                 n_freqs + 1)[:-1])
    freqs = freqs.reshape(dim // 4, nh).T                    # (nh, d_head // 8)
    return dict(w_norm=w_norm, w_qkv=w_qkv, w_out=w_out, scale=scale, freqs=freqs)


# ---------------------------------------------------------------------------
# Pure-JAX f32 reference (mirrors the PyTorch non-flash branch)
# ---------------------------------------------------------------------------
def reference(x, pos, cond, params, d_head):
    N, H, W, D = x.shape
    S = H * W
    nh = D // d_head
    d4 = d_head // 4
    skip = x.reshape(N, S, D)
    ada = cond @ params["w_norm"].T + 1.0
    xf = x.reshape(N, S, D)
    ms = jnp.mean(xf ** 2, axis=-1, keepdims=True)
    xn = xf * (ada[:, None, :] * jax.lax.rsqrt(ms + EPS_NORM))
    qkv = xn @ params["w_qkv"].T
    qkv = qkv.reshape(N, S, 3, nh, d_head).transpose(2, 0, 3, 1, 4)
    q, k, v = qkv[0], qkv[1], qkv[2]
    sc = params["scale"][None, :, None, None]
    q = q * (jnp.sqrt(sc) * jax.lax.rsqrt(jnp.sum(q ** 2, -1, keepdims=True) + EPS_COS))
    k = k * (jnp.sqrt(sc) * jax.lax.rsqrt(jnp.sum(k ** 2, -1, keepdims=True) + EPS_COS))
    pos_flat = pos.reshape(N, S, 2)
    th = jnp.concatenate([pos_flat[:, :, None, 0:1] * params["freqs"],
                          pos_flat[:, :, None, 1:2] * params["freqs"]], -1)
    th = jnp.moveaxis(th, -2, -3)
    cos, sin = jnp.cos(th), jnp.sin(th)

    def rope(t):
        t1, t2, t3 = t[..., :d4], t[..., d4:2 * d4], t[..., 2 * d4:]
        return jnp.concatenate([t1 * cos - t2 * sin, t2 * cos + t1 * sin, t3], -1)

    q, k = rope(q), rope(k)
    s = jnp.einsum("nhqe,nhke->nhqk", q, k)
    p = jax.nn.softmax(s, axis=-1)
    o = jnp.einsum("nhqk,nhke->nhqe", p, v)
    o = jnp.moveaxis(o, 1, 2).reshape(N, S, D)
    out = o @ params["w_out"].T + skip
    return out.reshape(N, H, W, D)


if __name__ == "__main__":
    N, H, W = 2, 8, 8
    d_model, d_head, cond_features = 32, 16, 8

    key = jax.random.PRNGKey(0)
    kx, kc, kp = jax.random.split(key, 3)
    x = jax.random.normal(kx, (N, H, W, d_model), jnp.float32)
    cond = jax.random.normal(kc, (N, cond_features), jnp.float32)
    # axial positions in [-1, 1]
    ys = jnp.linspace(-1.0, 1.0, H)
    xs = jnp.linspace(-1.0, 1.0, W)
    gy, gx = jnp.meshgrid(ys, xs, indexing="ij")
    pos = jnp.broadcast_to(jnp.stack([gy, gx], -1), (N, H, W, 2)).astype(jnp.float32)

    params = init_params(kp, d_model, d_head, cond_features)

    out = self_attention_block(x, pos, cond, params, d_head)
    out = jax.block_until_ready(out)

    ref = reference(x, pos, cond, params, d_head)
    err = float(jnp.max(jnp.abs(out - ref)))
    denom = float(jnp.max(jnp.abs(ref))) + 1e-6
    assert out.shape == (N, H, W, d_model)
    # bf16 MXU operands / bf16 intermediate q,k,v (f32 accumulation) vs pure-f32
    # reference: relative check.
    assert err / denom < 5e-2, f"relative max error vs reference: {err / denom}"
    print("KERNEL_OK")
</pallas_src>

<mosaic_0001>
module attributes {stable_mosaic.version = 11 : i64} {
  func.func @kernel(%arg0: i32, %arg1: i32, %arg2: memref<1x64x32xf32, #tpu.memory_space<vmem>>, %arg3: memref<1x1x32xf32, #tpu.memory_space<vmem>>, %arg4: memref<1x64x8xf32, #tpu.memory_space<vmem>>, %arg5: memref<2xf32, #tpu.memory_space<smem>>, %arg6: memref<32x96xbf16, #tpu.memory_space<vmem>>, %arg7: memref<1x64x32xbf16, #tpu.memory_space<vmem>>, %arg8: memref<1x64x64xbf16, #tpu.memory_space<vmem>>) attributes {dimension_semantics = [#tpu.dimension_semantics<parallel>, #tpu.dimension_semantics<parallel>], iteration_bounds = array<i64: 2, 1>, scalar_prefetch = 0 : i64, scratch_operands = 0 : i64, tpu.core_type = #tpu.core_type<tc>, window_params = [{transform_indices = @transform_0, window_bounds = array<i64: 1, 64, 32>}, {transform_indices = @transform_1, window_bounds = array<i64: 1, 1, 32>}, {transform_indices = @transform_2, window_bounds = array<i64: 1, 64, 8>}, {transform_indices = @transform_3, window_bounds = array<i64: 2>}, {pipeline_mode = #tpu.pipeline_mode<synchronous>, transform_indices = @transform_4, window_bounds = array<i64: 32, 96>}, {transform_indices = @transform_5, window_bounds = array<i64: 1, 64, 32>}, {transform_indices = @transform_6, window_bounds = array<i64: 1, 64, 64>}]} {
    %c0 = arith.constant 0 : index
    %c0_0 = arith.constant 0 : index
    %c0_1 = arith.constant 0 : index
    %0 = vector.load %arg2[%c0, %c0_0, %c0_1] : memref<1x64x32xf32, #tpu.memory_space<vmem>>, vector<1x64x32xf32>
    %1 = vector.shape_cast %0 : vector<1x64x32xf32> to vector<64x32xf32>
    %c0_2 = arith.constant 0 : index
    %c0_3 = arith.constant 0 : index
    %c0_4 = arith.constant 0 : index
    %2 = vector.load %arg3[%c0_2, %c0_3, %c0_4] : memref<1x1x32xf32, #tpu.memory_space<vmem>>, vector<1x1x32xf32>
    %3 = vector.shape_cast %2 : vector<1x1x32xf32> to vector<1x32xf32>
    %4 = arith.mulf %1, %1 : vector<64x32xf32>
    %cst = arith.constant dense<0.000000e+00> : vector<64xf32>
    %5 = vector.multi_reduction <add>, %4, %cst [1] : vector<64x32xf32> to vector<64xf32>
    %6 = vector.shape_cast %5 : vector<64xf32> to vector<64x1xf32>
    %cst_5 = arith.constant 3.200000e+01 : f32
    %7 = vector.broadcast %cst_5 : f32 to vector<64x1xf32>
    %8 = arith.divf %6, %7 : vector<64x1xf32>
    %cst_6 = arith.constant 9.99999997E-7 : f32
    %9 = vector.broadcast %cst_6 : f32 to vector<64x1xf32>
    %10 = arith.addf %8, %9 : vector<64x1xf32>
    %11 = math.rsqrt %10 : vector<64x1xf32>
    %12 = vector.broadcast %3 : vector<1x32xf32> to vector<64x32xf32>
    %13 = vector.broadcast %11 : vector<64x1xf32> to vector<64x32xf32>
    %14 = arith.mulf %12, %13 : vector<64x32xf32>
    %15 = arith.mulf %1, %14 : vector<64x32xf32>
    %16 = arith.truncf %15 : vector<64x32xf32> to vector<64x32xbf16>
    %c0_7 = arith.constant 0 : index
    %c0_8 = arith.constant 0 : index
    %17 = vector.load %arg6[%c0_7, %c0_8] : memref<32x96xbf16, #tpu.memory_space<vmem>>, vector<32x96xbf16>
    %cst_9 = arith.constant dense<0.000000e+00> : vector<64x96xf32>
    %18 = tpu.matmul %16, %17, %cst_9 {dimension_numbers = #tpu.dot_dimension_numbers<[1], [0], [0], [1], [0, 0, 1, 1], [], []>} : vector<64x32xbf16>, vector<32x96xbf16>, vector<64x96xf32> -> vector<64x96xf32>
    %19 = vector.extract_strided_slice %18 {offsets = [0, 0], sizes = [64, 16], strides = [1, 1]} : vector<64x96xf32> to vector<64x16xf32>
    %20 = vector.extract_strided_slice %18 {offsets = [0, 32], sizes = [64, 16], strides = [1, 1]} : vector<64x96xf32> to vector<64x16xf32>
    %c0_10 = arith.constant 0 : index
    %21 = memref.load %arg5[%c0_10] : memref<2xf32, #tpu.memory_space<smem>>
    %22 = arith.mulf %19, %19 : vector<64x16xf32>
    %cst_11 = arith.constant dense<0.000000e+00> : vector<64xf32>
    %23 = vector.multi_reduction <add>, %22, %cst_11 [1] : vector<64x16xf32> to vector<64xf32>
    %24 = vector.shape_cast %23 : vector<64xf32> to vector<64x1xf32>
    %cst_12 = arith.constant 9.99999997E-7 : f32
    %25 = vector.broadcast %cst_12 : f32 to vector<64x1xf32>
    %26 = arith.addf %24, %25 : vector<64x1xf32>
    %27 = math.rsqrt %26 : vector<64x1xf32>
    %28 = vector.broadcast %21 : f32 to vector<64x1xf32>
    %29 = arith.mulf %28, %27 : vector<64x1xf32>
    %30 = vector.broadcast %29 : vector<64x1xf32> to vector<64x16xf32>
    %31 = arith.mulf %19, %30 : vector<64x16xf32>
    %32 = arith.mulf %20, %20 : vector<64x16xf32>
    %cst_13 = arith.constant dense<0.000000e+00> : vector<64xf32>
    %33 = vector.multi_reduction <add>, %32, %cst_13 [1] : vector<64x16xf32> to vector<64xf32>
    %34 = vector.shape_cast %33 : vector<64xf32> to vector<64x1xf32>
    %cst_14 = arith.constant 9.99999997E-7 : f32
    %35 = vector.broadcast %cst_14 : f32 to vector<64x1xf32>
    %36 = arith.addf %34, %35 : vector<64x1xf32>
    %37 = math.rsqrt %36 : vector<64x1xf32>
    %38 = vector.broadcast %21 : f32 to vector<64x1xf32>
    %39 = arith.mulf %38, %37 : vector<64x1xf32>
    %40 = vector.broadcast %39 : vector<64x1xf32> to vector<64x16xf32>
    %41 = arith.mulf %20, %40 : vector<64x16xf32>
    %c0_15 = arith.constant 0 : index
    %c0_16 = arith.constant 0 : index
    %c0_17 = arith.constant 0 : index
    %42 = vector.load %arg4[%c0_15, %c0_16, %c0_17] : memref<1x64x8xf32, #tpu.memory_space<vmem>>, vector<1x64x4xf32>
    %43 = vector.shape_cast %42 : vector<1x64x4xf32> to vector<64x4xf32>
    %44 = math.cos %43 : vector<64x4xf32>
    %45 = math.sin %43 : vector<64x4xf32>
    %46 = vector.extract_strided_slice %31 {offsets = [0, 0], sizes = [64, 4], strides = [1, 1]} : vector<64x16xf32> to vector<64x4xf32>
    %47 = vector.extract_strided_slice %31 {offsets = [0, 4], sizes = [64, 4], strides = [1, 1]} : vector<64x16xf32> to vector<64x4xf32>
    %48 = vector.extract_strided_slice %31 {offsets = [0, 8], sizes = [64, 8], strides = [1, 1]} : vector<64x16xf32> to vector<64x8xf32>
    %49 = arith.mulf %46, %44 : vector<64x4xf32>
    %50 = arith.mulf %47, %45 : vector<64x4xf32>
    %51 = arith.subf %49, %50 : vector<64x4xf32>
    %52 = arith.mulf %47, %44 : vector<64x4xf32>
    %53 = arith.mulf %46, %45 : vector<64x4xf32>
    %54 = arith.addf %52, %53 : vector<64x4xf32>
    %55 = tpu.concatenate %51, %54, %48 in 1 : vector<64x4xf32>, vector<64x4xf32>, vector<64x8xf32> -> vector<64x16xf32>
    %56 = vector.extract_strided_slice %41 {offsets = [0, 0], sizes = [64, 4], strides = [1, 1]} : vector<64x16xf32> to vector<64x4xf32>
    %57 = vector.extract_strided_slice %41 {offsets = [0, 4], sizes = [64, 4], strides = [1, 1]} : vector<64x16xf32> to vector<64x4xf32>
    %58 = vector.extract_strided_slice %41 {offsets = [0, 8], sizes = [64, 8], strides = [1, 1]} : vector<64x16xf32> to vector<64x8xf32>
    %59 = arith.mulf %56, %44 : vector<64x4xf32>
    %60 = arith.mulf %57, %45 : vector<64x4xf32>
    %61 = arith.subf %59, %60 : vector<64x4xf32>
    %62 = arith.mulf %57, %44 : vector<64x4xf32>
    %63 = arith.mulf %56, %45 : vector<64x4xf32>
    %64 = arith.addf %62, %63 : vector<64x4xf32>
    %65 = tpu.concatenate %61, %64, %58 in 1 : vector<64x4xf32>, vector<64x4xf32>, vector<64x8xf32> -> vector<64x16xf32>
    %66 = vector.extract_strided_slice %18 {offsets = [0, 16], sizes = [64, 16], strides = [1, 1]} : vector<64x96xf32> to vector<64x16xf32>
    %67 = vector.extract_strided_slice %18 {offsets = [0, 48], sizes = [64, 16], strides = [1, 1]} : vector<64x96xf32> to vector<64x16xf32>
    %c1 = arith.constant 1 : index
    %68 = memref.load %arg5[%c1] : memref<2xf32, #tpu.memory_space<smem>>
    %69 = arith.mulf %66, %66 : vector<64x16xf32>
    %cst_18 = arith.constant dense<0.000000e+00> : vector<64xf32>
    %70 = vector.multi_reduction <add>, %69, %cst_18 [1] : vector<64x16xf32> to vector<64xf32>
    %71 = vector.shape_cast %70 : vector<64xf32> to vector<64x1xf32>
    %cst_19 = arith.constant 9.99999997E-7 : f32
    %72 = vector.broadcast %cst_19 : f32 to vector<64x1xf32>
    %73 = arith.addf %71, %72 : vector<64x1xf32>
    %74 = math.rsqrt %73 : vector<64x1xf32>
    %75 = vector.broadcast %68 : f32 to vector<64x1xf32>
    %76 = arith.mulf %75, %74 : vector<64x1xf32>
    %77 = vector.broadcast %76 : vector<64x1xf32> to vector<64x16xf32>
    %78 = arith.mulf %66, %77 : vector<64x16xf32>
    %79 = arith.mulf %67, %67 : vector<64x16xf32>
    %cst_20 = arith.constant dense<0.000000e+00> : vector<64xf32>
    %80 = vector.multi_reduction <add>, %79, %cst_20 [1] : vector<64x16xf32> to vector<64xf32>
    %81 = vector.shape_cast %80 : vector<64xf32> to vector<64x1xf32>
    %cst_21 = arith.constant 9.99999997E-7 : f32
    %82 = vector.broadcast %cst_21 : f32 to vector<64x1xf32>
    %83 = arith.addf %81, %82 : vector<64x1xf32>
    %84 = math.rsqrt %83 : vector<64x1xf32>
    %85 = vector.broadcast %68 : f32 to vector<64x1xf32>
    %86 = arith.mulf %85, %84 : vector<64x1xf32>
    %87 = vector.broadcast %86 : vector<64x1xf32> to vector<64x16xf32>
    %88 = arith.mulf %67, %87 : vector<64x16xf32>
    %c0_22 = arith.constant 0 : index
    %c0_23 = arith.constant 0 : index
    %c4 = arith.constant 4 : index
    %89 = vector.load %arg4[%c0_22, %c0_23, %c4] : memref<1x64x8xf32, #tpu.memory_space<vmem>>, vector<1x64x4xf32>
    %90 = vector.shape_cast %89 : vector<1x64x4xf32> to vector<64x4xf32>
    %91 = math.cos %90 : vector<64x4xf32>
    %92 = math.sin %90 : vector<64x4xf32>
    %93 = vector.extract_strided_slice %78 {offsets = [0, 0], sizes = [64, 4], strides = [1, 1]} : vector<64x16xf32> to vector<64x4xf32>
    %94 = vector.extract_strided_slice %78 {offsets = [0, 4], sizes = [64, 4], strides = [1, 1]} : vector<64x16xf32> to vector<64x4xf32>
    %95 = vector.extract_strided_slice %78 {offsets = [0, 8], sizes = [64, 8], strides = [1, 1]} : vector<64x16xf32> to vector<64x8xf32>
    %96 = arith.mulf %93, %91 : vector<64x4xf32>
    %97 = arith.mulf %94, %92 : vector<64x4xf32>
    %98 = arith.subf %96, %97 : vector<64x4xf32>
    %99 = arith.mulf %94, %91 : vector<64x4xf32>
    %100 = arith.mulf %93, %92 : vector<64x4xf32>
    %101 = arith.addf %99, %100 : vector<64x4xf32>
    %102 = tpu.concatenate %98, %101, %95 in 1 : vector<64x4xf32>, vector<64x4xf32>, vector<64x8xf32> -> vector<64x16xf32>
    %103 = vector.extract_strided_slice %88 {offsets = [0, 0], sizes = [64, 4], strides = [1, 1]} : vector<64x16xf32> to vector<64x4xf32>
    %104 = vector.extract_strided_slice %88 {offsets = [0, 4], sizes = [64, 4], strides = [1, 1]} : vector<64x16xf32> to vector<64x4xf32>
    %105 = vector.extract_strided_slice %88 {offsets = [0, 8], sizes = [64, 8], strides = [1, 1]} : vector<64x16xf32> to vector<64x8xf32>
    %106 = arith.mulf %103, %91 : vector<64x4xf32>
    %107 = arith.mulf %104, %92 : vector<64x4xf32>
    %108 = arith.subf %106, %107 : vector<64x4xf32>
    %109 = arith.mulf %104, %91 : vector<64x4xf32>
    %110 = arith.mulf %103, %92 : vector<64x4xf32>
    %111 = arith.addf %109, %110 : vector<64x4xf32>
    %112 = tpu.concatenate %108, %111, %105 in 1 : vector<64x4xf32>, vector<64x4xf32>, vector<64x8xf32> -> vector<64x16xf32>
    %113 = tpu.concatenate %55, %102 in 1 : vector<64x16xf32>, vector<64x16xf32> -> vector<64x32xf32>
    %114 = vector.extract_strided_slice %18 {offsets = [0, 64], sizes = [64, 32], strides = [1, 1]} : vector<64x96xf32> to vector<64x32xf32>
    %115 = tpu.concatenate %65, %112, %114 in 1 : vector<64x16xf32>, vector<64x16xf32>, vector<64x32xf32> -> vector<64x64xf32>
    %116 = arith.truncf %113 : vector<64x32xf32> to vector<64x32xbf16>
    %c0_24 = arith.constant 0 : index
    %c0_25 = arith.constant 0 : index
    %c0_26 = arith.constant 0 : index
    %117 = vector.load %arg7[%c0_24, %c0_25, %c0_26] : memref<1x64x32xbf16, #tpu.memory_space<vmem>>, vector<1x64x32xbf16>
    %118 = vector.shape_cast %117 : vector<1x64x32xbf16> to vector<64x32xbf16>
    %119 = vector.shape_cast %116 : vector<64x32xbf16> to vector<1x64x32xbf16>
    tpu.vector_store %arg7[%c0_24, %c0_25, %c0_26], %119 {strides = array<i32>} : memref<1x64x32xbf16, #tpu.memory_space<vmem>>, vector<1x64x32xbf16>,
    %120 = arith.truncf %115 : vector<64x64xf32> to vector<64x64xbf16>
    %c0_27 = arith.constant 0 : index
    %c0_28 = arith.constant 0 : index
    %c0_29 = arith.constant 0 : index
    %121 = vector.load %arg8[%c0_27, %c0_28, %c0_29] : memref<1x64x64xbf16, #tpu.memory_space<vmem>>, vector<1x64x64xbf16>
    %122 = vector.shape_cast %121 : vector<1x64x64xbf16> to vector<64x64xbf16>
    %123 = vector.shape_cast %120 : vector<64x64xbf16> to vector<1x64x64xbf16>
    tpu.vector_store %arg8[%c0_27, %c0_28, %c0_29], %123 {strides = array<i32>} : memref<1x64x64xbf16, #tpu.memory_space<vmem>>, vector<1x64x64xbf16>,
    return
  }
  func.func @transform_0(%arg0: i32, %arg1: i32) -> (i32, i32, i32) {
    %c0_i32 = arith.constant 0 : i32
    %c0_i32_0 = arith.constant 0 : i32
    return %arg0, %arg1, %c0_i32 : i32, i32, i32
  }
  func.func @transform_1(%arg0: i32, %arg1: i32) -> (i32, i32, i32) {
    %c0_i32 = arith.constant 0 : i32
    %c0_i32_0 = arith.constant 0 : i32
    %c0_i32_1 = arith.constant 0 : i32
    return %arg0, %c0_i32, %c0_i32_0 : i32, i32, i32
  }
  func.func @transform_2(%arg0: i32, %arg1: i32) -> (i32, i32, i32) {
    %c0_i32 = arith.constant 0 : i32
    %c0_i32_0 = arith.constant 0 : i32
    return %arg0, %arg1, %c0_i32 : i32, i32, i32
  }
  func.func @transform_3(%arg0: i32, %arg1: i32) -> i32 {
    %c0_i32 = arith.constant 0 : i32
    %c0_i32_0 = arith.constant 0 : i32
    return %c0_i32 : i32
  }
  func.func @transform_4(%arg0: i32, %arg1: i32) -> (i32, i32) {
    %c0_i32 = arith.constant 0 : i32
    %c0_i32_0 = arith.constant 0 : i32
    %c0_i32_1 = arith.constant 0 : i32
    return %c0_i32, %c0_i32_0 : i32, i32
  }
  func.func @transform_5(%arg0: i32, %arg1: i32) -> (i32, i32, i32) {
    %c0_i32 = arith.constant 0 : i32
    %c0_i32_0 = arith.constant 0 : i32
    return %arg0, %arg1, %c0_i32 : i32, i32, i32
  }
  func.func @transform_6(%arg0: i32, %arg1: i32) -> (i32, i32, i32) {
    %c0_i32 = arith.constant 0 : i32
    %c0_i32_0 = arith.constant 0 : i32
    return %arg0, %arg1, %c0_i32 : i32, i32, i32
  }
}

</mosaic_0001>

<bundles_post_ra>
// kernel: tpu_custom_call.1
= control target key start
LH: loop header
LB: loop body
LE: loop exit
PB: predicated region body
PF: predicated region fallthrough
CT: control target
= control target key end

     0   :  { %12 = vsyncpa [#allocation4], 0  ;;  %s7282_s0 = inlined_call_operand.vmem [shape: f32[2,64,32], index: 0, kind: input, shape index: {}]   ;;  %s7283_s1 = inlined_call_operand.vmem [shape: f32[2,1,32], index: 1, kind: input, shape index: {}]   ;;  %s7284_s2 = inlined_call_operand.vmem [shape: f32[2,64,8], index: 2, kind: input, shape index: {}]   ;;  %s7285_s3 = inlined_call_operand.vmem [shape: f32[2], index: 3, kind: input, shape index: {}]   ;;  %s7286_s4 = inlined_call_operand.vmem [shape: bf16[32,96], index: 4, kind: input, shape index: {}]   ;;  %s7287_s5 = inlined_call_operand.vmem [shape: bf16[2,64,32], index: 5, kind: output, shape index: {0}]   ;;  %s7288_s6 = inlined_call_operand.hbm [shape: bf16[2,64,64], index: 6, kind: output, shape index: {1}]  }
   0x1   :  { %13 = vsyncpa [#allocation3], 0 }
   0x2   :  { %15 = vsyncpa [#allocation3 + $0x1], 0  ;;  %s4856_s21 = smov 0   ;;  %s4858_s22 = smov 0  }
   0x3   :  { %s4860_s23 = smov 0   ;;  %s4862_s24 = smov 0  }
   0x4   :  { %s4864_s25 = smov 0   ;;  %s4866_s26 = smov 0  }
   0x5 LB: > { %s4077_s27 = sadd.s32 4294967295, %s4799_s26   ;;  %s4078_s28 = sadd.s32 4294967294, %s4799_s26   ;;  %s4799_s26 = sphi %s4866_s26, %s21_s26   ;;  %s4795_s25 = sphi %s4864_s25, %s7574_s25   ;;  %s4791_s24 = sphi %s4862_s24, %s7573_s24   ;;  %s4787_s23 = sphi %s4860_s23, %s7572_s23   ;;  %s4783_s22 = sphi %s4858_s22, %s7571_s22   ;;  %s4779_s21 = sphi %s4856_s21, %s7570_s21  }
   0x6   : > { %s33_s29 = sadd.s32 1, %s4795_s25  ;;  %s194_s30 = sadd.s32 1, %s4787_s23 }
   0x7   : > { %p35_p0 = scmp.ge.s32.totalorder %s33_s29, 2  ;;  %p204_p1 = scmp.ne.s32.totalorder %s4787_s23, %s4783_s22 }
   0x8   : > { %p205_p2 = scmp.eq.s32.totalorder %s4077_s27, 1  ;;  %p210_p3 = scmp.ne.s32.totalorder %s4783_s22, %s4779_s21 }
   0x9   : > { %s7576_s29 = smov (%p35_p0, %s33_s29), 0  ;;  %p211_p5 = scmp.eq.s32.totalorder %s4078_s28, 1 }
   0xa   : > { %p4896_p4 = por %p205_p2, %p204_p1  ;;  %s189_s8 = ssub.s32 %s4795_s25, %s7576_s29 }
   0xb   : > { %p4079_p6 = scmp.ge.s32.totalorder %s4799_s26, 1  ;;  %p192_p7 = scmp.eq.s32.totalorder %s189_s8, 0 }
   0xc   : > { %p4903_p8 = por %p211_p5, %p210_p3  ;;  %p218_p9 = scmp.lt.s32.totalorder %s4799_s26, 3 }
   0xd   : > { %s4909_s10 = scalar_select %p192_p7, %s4787_s23, %s194_s30  }
   0xe   : > { %p4911_p10 = pnand %p4079_p6, %p218_p9  ;;  %p4915_p11 = scmp.eq.s32.totalorder %s4077_s27, 0 }
   0xf   : > { %s231_s15 = sshll.u32 %s7285_s3, 4  ;;  %s232_s15 = int_to_ptr.vmem [resolvable:$true] %s231_s15 }
  0x10   : > { %p4264_p12 = pneg %p4911_p10  ;;  %s4704_s16 = scalar_lea.vmem %s232_s15, 16 }
  0x11   : > { %p4705_p0 = scmp.ne.s32.totalorder %s232_s15, %s4704_s16  ;;  %p4712_p5 = scmp.lt.s32.totalorder %s232_s15, %s232_s15 }
  0x12   : > { %p4265_p13 = pnand %p4915_p11, %p4264_p12  ;;  %p4713_p6 = scmp.lt.s32.totalorder %s4704_s16, %s4704_s16 }
  0x14   : > { %p4706_p1 = pneg %p4265_p13  ;;  %p4714_p7 = por %p4713_p6, %p4712_p5 }
  0x16   : > { %p4707_p2 = pnand %p4706_p1, %p4705_p0 }
  0x18   : > { %p4708_p3 = pneg %p4707_p2 }
  0x1a   : > { %p4715_p9 = pnand %p4714_p7, %p4708_p3 }
  0x1c   : > { %4718 = shalt.err (!%p4715_p9)
}
  0x1d   : > { %s4801_s17 = smov [#allocation2]   ;;  %279 = sbr.rel (%p4911_p10) target bundleno = 1357 (0x54d), region = 40 }
  0x1e   : > { %4267 = dma.vmem_to_smem (!%p4265_p13), %s232_s15, 16, %s4801_s17, [#allocation4]  }
  0x22   : > { %4770 = dma.done.wait (%p4915_p11), [#allocation4], 16  }
  0x23   : > { %4772 = vsyncadd (%p4915_p11), [#allocation4], 4294967280 }
  0x24   : > { %285 = sfence }
  0x25   : > { %p336_p12 = scmp.lt.s32.totalorder %s4791_s24, 1  ;;  %vm387_vm0 = vcmask 261120   ;;  %v4802_v53 = vmov 683565275   ;;  %v4803_v55 = vmov 2475754826  }
  0x26   : > { %v4804_v57 = vmov 2131351028   ;;  %v4805_v59 = vmov 2102212464   ;;  %v4806_v61 = vmov 920167782  }
  0x27   : > { %s4934_s18 = scalar_select %p336_p12, %s4791_s24, 1 }
  0x28   : > { %s4808_s16 = smov 4   ;;  %s4809_s27 = smov 32  }
  0x29   : > { %s4184_s19 = sshll.u32 %s4934_s18, 6  ;;  %s347_s20 = scalar_lea.vmem %s7283_s1, %s4934_s18 }
  0x2a   : > { %s4940_s28 = scalar_lea.vmem %s7282_s0, %s4184_s19  ;;  %s4945_s11 = scalar_lea.vmem %s7284_s2, %s4184_s19 }
  0x2b   : > { %v372_v0 = vld [vmem:[%s4940_s28 + $0x10] sm:$0xff]  ;;  %v370_v1 = vld [vmem:[%s4940_s28] sm:$0xff]  ;;  %v373_v2 = vld [vmem:[%s4940_s28 + $0x18] sm:$0xff]  ;;  %s4811_s30 = smov 12   ;;  %s4812_s8 = smov 16  }
  0x2c   : > { %v381_v3 = vmul.f32 %v372_v0, %v372_v0  ;;  %v379_v4 = vmul.f32 %v370_v1, %v370_v1  ;;  %v382_v5 = vmul.f32 %v373_v2, %v373_v2  ;;  %v371_v6 = vld [vmem:[%s4940_s28 + $0x8] sm:$0xff]  ;;  %v374_v8 = vld [vmem:[%s4940_s28 + $0x20] sm:$0xff]  ;;  %v4959_v13 = vld [vmem:[%s4945_s11 + $0x10] sm:$0xff]  ;;  %s4814_s12 = smov 44   ;;  %s4815_s13 = smov 96  }
  0x2d   : > { %v375_v7 = vld [vmem:[%s4940_s28 + $0x28] sm:$0xff]  ;;  %v380_v9 = vmul.f32 %v371_v6, %v371_v6  ;;  %v383_v15 = vmul.f32 %v374_v8, %v374_v8  ;;  %v377_v16 = vld [vmem:[%s4940_s28 + $0x38] sm:$0xff]  ;;  %v376_v22 = vld [vmem:[%s4940_s28 + $0x30] sm:$0xff]  ;;  %v925_v23 = vand.u32 2147483647, %v4959_v13  ;;  %v928_v24 = vand.u32 2139095040, %v4959_v13 }
  0x2e   : > { %v4954_v10 = vld [vmem:[%s4945_s11 + $0x8] sm:$0xff]  ;;  %v394_v11 = vsel %vm387_vm0, %v381_v3, 0.0  ;;  %v388_v12 = vsel %vm387_vm0, %v379_v4, 0.0  ;;  %v384_v14 = vmul.f32 %v375_v7, %v375_v7  ;;  %v397_v17 = vsel %vm387_vm0, %v382_v5, 0.0  ;;  %v4967_v21 = vld [vmem:[%s4945_s11 + $0x18] sm:$0xff]  ;;  %s4816_s14 = smov 80  }
  0x2f   : > { %395 = vadd.xlane.f32.xlu1 %v394_v11  ;;  %389 = vadd.xlane.f32.xlu0 %v388_v12  ;;  %v391_v18 = vsel %vm387_vm0, %v380_v9, 0.0  ;;  %v822_v19 = vand.u32 2147483647, %v4954_v10  ;;  %v825_v20 = vand.u32 2139095040, %v4954_v10  ;;  %v386_v25 = vmul.f32 %v377_v16, %v377_v16  ;;  %s4817_s15 = smov 112   ;;  %s556_s17 = sld [smem:[#allocation2]] }
  0x30   : > { %v929_v28 = vshrl.u32 %v928_v24, 23  ;;  %v932_v29 = vand.u32 8388607, %v925_v23  ;;  %v1031_v30 = vand.u32 2139095040, %v4967_v21  ;;  %v403_v31 = vsel %vm387_vm0, %v384_v14, 0.0  ;;  %s4818_s19 = smov 124  }
  0x31   : > { %v826_v26 = vshrl.u32 %v825_v20, 23  ;;  %v829_v27 = vand.u32 8388607, %v822_v19  ;;  %v400_v32 = vsel %vm387_vm0, %v383_v15, 0.0  ;;  %v385_v33 = vmul.f32 %v376_v22, %v376_v22 }
  0x32   : > { %v4106_v35 = vadd.s32 4294967169, %v929_v28  ;;  %v1032_v36 = vshrl.u32 %v1031_v30, 23  ;;  %v933_v39 = vor.u32 8388608, %v932_v29  ;;  %v409_v42 = vsel %vm387_vm0, %v386_v25, 0.0 }
  0x33   : > { %398 = vadd.xlane.f32.xlu1 %v397_v17  ;;  %392 = vadd.xlane.f32.xlu0 %v391_v18  ;;  %v4102_v34 = vadd.s32 4294967169, %v826_v26  ;;  %v830_v38 = vor.u32 8388608, %v829_v27  ;;  %v406_v43 = vsel %vm387_vm0, %v385_v33, 0.0  ;;  %v1028_v47 = vand.u32 2147483647, %v4967_v21 }
  0x34   : > { %v935_v40 = vadd.s32 1, %v4106_v35  ;;  %v4110_v41 = vadd.s32 4294967169, %v1032_v36  ;;  %v4984_v50 = vshll.u32 %v933_v39, 8  ;;  %v4807_v6 = vmov 1326507024  }
  0x35   : > { %v832_v37 = vadd.s32 1, %v4102_v34  ;;  %v4982_v49 = vshll.u32 %v830_v38, 8  ;;  %vm824_vm14 = vcmp.lt.s32.totalorder %v4954_v10, 0 }
  0x36   : > { %vm936_vm2 = vcmp.gt.s32.totalorder %v935_v40, 0  ;;  %v4986_v51 = vadd.s32 1, %v4110_v41 }
  0x37   : > { %404 = vadd.xlane.f32.xlu1 %v403_v31  ;;  %401 = vadd.xlane.f32.xlu0 %v400_v32  ;;  %vm833_vm1 = vcmp.gt.s32.totalorder %v832_v37, 0  ;;  %v937_v46 = vsel %vm936_vm2, %v935_v40, 0 }
  0x38   : > { %v834_v44 = vsel %vm833_vm1, %v832_v37, 0  ;;  %v4993_v63 = vshrl.u32 %v937_v46, 5  ;;  %v939_v0 = vand.u32 31, %v937_v46  ;;  %vm1039_vm7 = vcmp.gt.s32.totalorder %v4986_v51, 0 }
  0x39   : > { %v836_v45 = vand.u32 31, %v834_v44  ;;  %v835_v48 = vshrl.u32 %v834_v44, 5  ;;  %vm5102_vm1 = vcmp.le.f32.partialorder %v822_v19, 0.7853982 }
  0x3a   : > { %v940_v15 = vsub.s32 32, %v939_v0  ;;  %v942_v26 = vshll.u32 %v4802_v53, %v939_v0  ;;  %v945_v34 = vshll.u32 %v4803_v55, %v939_v0  ;;  %v948_v41 = vshll.u32 %v4804_v57, %v939_v0 }
  0x3b   : > { %410 = vadd.xlane.f32.xlu1 %v409_v42  ;;  %407 = vadd.xlane.f32.xlu0 %v406_v43  ;;  %v837_v52 = vsub.s32 32, %v836_v45  ;;  %v839_v54 = vshll.u32 %v4802_v53, %v836_v45  ;;  %v842_v56 = vshll.u32 %v4803_v55, %v836_v45  ;;  %v845_v58 = vshll.u32 %v4804_v57, %v836_v45 }
  0x3c   : > { %v848_v60 = vshll.u32 %v4805_v59, %v836_v45  ;;  %v851_v62 = vshll.u32 %v4806_v61, %v836_v45  ;;  %vm854_vm3 = vcmp.lt.s32.totalorder %v835_v48, 1  ;;  %vm855_vm4 = vcmp.lt.s32.totalorder %v835_v48, 2 }
  0x3d   : > { %v838_v1 = vshrl.u32 %v4802_v53, %v837_v52  ;;  %v840_v2 = vshrl.u32 %v4803_v55, %v837_v52  ;;  %v843_v3 = vshrl.u32 %v4804_v57, %v837_v52  ;;  %v846_v4 = vshrl.u32 %v4805_v59, %v837_v52 }
  0x3e   : > { %v849_v5 = vshrl.u32 %v4806_v61, %v837_v52  ;;  %v852_v7 = vshrl.u32 %v4807_v6, %v837_v52  ;;  %vm857_vm5 = vcmp.lt.s32.totalorder %v835_v48, 4  ;;  %vm856_vm6 = vcmp.lt.s32.totalorder %v835_v48, 3 }
  0x3f   : > { %v841_v8 = vor.u32 %v840_v2, %v839_v54  ;;  %v844_v9 = vor.u32 %v843_v3, %v842_v56  ;;  %v847_v11 = vor.u32 %v846_v4, %v845_v58  ;;  %v941_v29 = vshrl.u32 %v4802_v53, %v940_v15 }
  0x40   : > { %v850_v12 = vor.u32 %v849_v5, %v848_v60  ;;  %v853_v14 = vor.u32 %v852_v7, %v851_v62  ;;  %v943_v30 = vshrl.u32 %v4803_v55, %v940_v15  ;;  %v946_v40 = vshrl.u32 %v4804_v57, %v940_v15 }
  0x41   : > { %v858_v16 = vsel %vm854_vm3, %v838_v1, %v841_v8  ;;  %v859_v17 = vsel %vm857_vm5, %v847_v11, 2102212464  ;;  %v862_v18 = vsel %vm854_vm3, %v841_v8, %v844_v9  ;;  %v866_v20 = vsel %vm854_vm3, %v844_v9, %v847_v11 }
  0x42   : > { %v860_v22 = vsel %vm856_vm6, %v844_v9, %v859_v17  ;;  %v863_v24 = vsel %vm857_vm5, %v850_v12, 920167782  ;;  %v867_v25 = vsel %vm857_vm5, %v853_v14, 1326507024  ;;  %v944_v39 = vor.u32 %v943_v30, %v942_v26 }
  0x43   : > { %v864_v27 = vsel %vm856_vm6, %v847_v11, %v863_v24  ;;  %v868_v28 = vsel %vm856_vm6, %v850_v12, %v867_v25  ;;  %v861_v31 = vsel %vm855_vm4, %v858_v16, %v860_v22  ;;  %v949_v42 = vshrl.u32 %v4805_v59, %v940_v15 }
  0x44   : > { %v865_v32 = vsel %vm855_vm4, %v862_v18, %v864_v27  ;;  %v869_v33 = vsel %vm855_vm4, %v866_v20, %v868_v28  ;;  %v951_v43 = vshll.u32 %v4805_v59, %v939_v0  ;;  %v952_v44 = vshrl.u32 %v4806_v61, %v940_v15  ;;  %v5063_v27 = vld [vmem:[%s4945_s11 + $0x28] sm:$0xff] }
  0x45   : > { %v5010_v35 = vmul.u32.u64.low %v4982_v49, %v869_v33  ;;  %v5011_v36 = vmul.u32.u64.high %v4982_v49, %v869_v33, %v5010_v35  ;;  %v5014_v37 = vmul.u32.u64.low %v4982_v49, %v865_v32  ;;  %v5015_v38 = vmul.u32.u64.high %v4982_v49, %v865_v32, %v5014_v37 }
  0x46   : > { %v954_v45 = vshll.u32 %v4806_v61, %v939_v0  ;;  %v955_v46 = vshrl.u32 %v4807_v6, %v940_v15  ;;  %v877_v48 = vmul.u32 %v4982_v49, %v861_v31  ;;  %v947_v52 = vor.u32 %v946_v40, %v945_v34 }
  0x47   : > { %v950_v54 = vor.u32 %v949_v42, %v948_v41  ;;  %vm957_vm8 = vcmp.lt.s32.totalorder %v4993_v63, 1  ;;  %vm879_vm9 = vc.u32 %v5011_v36, %v5014_v37  ;;  %v880_v56 = vadd.s32 1, %v5015_v38 }
  0x48   : > { %v953_v58 = vor.u32 %v952_v44, %v951_v43  ;;  %vm958_vm10 = vcmp.lt.s32.totalorder %v4993_v63, 2  ;;  %v956_v60 = vor.u32 %v955_v46, %v954_v45  ;;  %vm959_vm11 = vcmp.lt.s32.totalorder %v4993_v63, 3 }
  0x49   : > { %vm960_vm12 = vcmp.lt.s32.totalorder %v4993_v63, 4  ;;  %v961_v49 = vsel %vm957_vm8, %v941_v29, %v944_v39  ;;  %v881_v62 = vsel %vm879_vm9, %v880_v56, %v5015_v38  ;;  %v965_v1 = vsel %vm957_vm8, %v944_v39, %v947_v52 }
  0x4a   : > { %v962_v0 = vsel %vm960_vm12, %v950_v54, 2102212464  ;;  %v966_v2 = vsel %vm960_vm12, %v953_v58, 920167782  ;;  %v882_v3 = vadd.s32 %v881_v62, %v877_v48  ;;  %v969_v7 = vsel %vm957_vm8, %v947_v52, %v950_v54 }
  0x4b   : > { %v963_v4 = vsel %vm959_vm11, %v947_v52, %v962_v0  ;;  %v967_v5 = vsel %vm959_vm11, %v950_v54, %v966_v2  ;;  %v970_v9 = vsel %vm960_vm12, %v956_v60, 1326507024  ;;  %v1040_v18 = vsel %vm1039_vm7, %v4986_v51, 0 }
  0x4c   : > { %v968_v8 = vsel %vm958_vm10, %v965_v1, %v967_v5  ;;  %v883_v11 = vadd.s32 536870912, %v882_v3  ;;  %v971_v12 = vsel %vm959_vm11, %v953_v58, %v970_v9  ;;  %v964_v16 = vsel %vm958_vm10, %v961_v49, %v963_v4  ;;  %v4582_v49 = vld [vmem:[%s7286_s4 + $0x8] sm:$0xff]  }
  0x4d   : > { %v5043_v14 = vmul.u32.u64.low %v4984_v50, %v968_v8  ;;  %v5044_v15 = vmul.u32.u64.high %v4984_v50, %v968_v8, %v5043_v14  ;;  %v972_v17 = vsel %vm958_vm10, %v969_v7, %v971_v12  ;;  %v1035_v25 = vand.u32 8388607, %v1028_v47  ;;  %4210 = vmatprep.subr.bf16.mxu0 %v4582_v49  ;;  %4222 = vmatprep.subr.bf16.mxu1 %v4582_v49 }
  0x4e   : > { %v5054_v20 = vshrl.u32 %v883_v11, 30  ;;  %v5057_v22 = vmul.u32.u64.low %v4984_v50, %v972_v17  ;;  %v5058_v24 = vmul.u32.u64.high %v4984_v50, %v972_v17, %v5057_v22  ;;  %v1042_v26 = vand.u32 31, %v1040_v18  ;;  %4211 = vmatpush3.bf16.msra.mxu0 %v4582_v49  ;;  %4224 = vmatpush3.bf16.msra.mxu1 %v4582_v49 }
  0x4f   : > { %v980_v63 = vmul.u32 %v4984_v50, %v964_v16  ;;  %v983_v29 = vadd.s32 1, %v5044_v15  ;;  %v1036_v31 = vor.u32 8388608, %v1035_v25  ;;  %v1237_v32 = vand.u32 2139095040, %v5063_v27  ;;  %v4583_v16 = vld [vmem:[%s7286_s4] sm:$0xff]  }
  0x50   : > { %v885_v28 = vshll.u32 %v5054_v20, 30  ;;  %v1043_v30 = vsub.s32 32, %v1042_v26  ;;  %vm982_vm13 = vc.u32 %v5058_v24, %v5043_v14  ;;  %v5074_v34 = vshrl.u32 %v1040_v18, 5  ;;  %4212 = vmatprep.subr.bf16.mxu0 %v4583_v16  ;;  %4223 = vmatprep.subr.bf16.mxu1 %v4583_v16 }
  0x51   : > { %v984_v33 = vsel %vm982_vm13, %v983_v29, %v5044_v15  ;;  %v1045_v35 = vshll.u32 %v4802_v53, %v1042_v26  ;;  %v1048_v38 = vshll.u32 %v4803_v55, %v1042_v26  ;;  %v1051_v42 = vshll.u32 %v4804_v57, %v1042_v26 }
  0x52   : > { %v5068_v51 = vsub.s32 %v882_v3, %v885_v28  ;;  %v985_v39 = vadd.s32 %v984_v33, %v980_v63  ;;  %v1046_v40 = vshrl.u32 %v4803_v55, %v1043_v30  ;;  %v1049_v41 = vshrl.u32 %v4804_v57, %v1043_v30  ;;  %4213 = vmatpush3.bf16.msra.mxu0 %v4583_v16 }
  0x53   : > { %v1052_v43 = vshrl.u32 %v4805_v59, %v1043_v30  ;;  %v1054_v44 = vshll.u32 %v4805_v59, %v1042_v26  ;;  %v1055_v45 = vshrl.u32 %v4806_v61, %v1043_v30  ;;  %v1234_v52 = vand.u32 2147483647, %v5063_v27  ;;  %4225 = vmatpush3.bf16.msra.mxu1 %v4583_v16 }
  0x54   : > { %v888_v50 = vsub.s32 0, %v5068_v51  ;;  %v986_v48 = vadd.s32 536870912, %v985_v39  ;;  %v1057_v56 = vshll.u32 %v4806_v61, %v1042_v26  ;;  %v1058_v58 = vshrl.u32 %v4807_v6, %v1043_v30 }
  0x55   : > { %v1056_v54 = vor.u32 %v1055_v45, %v1054_v44  ;;  %v5090_v60 = vshll.u32 %v1036_v31, 8  ;;  %v1047_v0 = vor.u32 %v1046_v40, %v1045_v35  ;;  %v1050_v1 = vor.u32 %v1049_v41, %v1048_v38 }
  0x56   : > { %v4103_v46 = vmin.u32 %v888_v50, %v5068_v51  ;;  %v1238_v2 = vshrl.u32 %v1237_v32, 23  ;;  %v878_v3 = vadd.s32 %v5014_v37, %v5011_v36  ;;  %v5097_v4 = vshrl.u32 %v986_v48, 30 }
  0x57   : > { %v1053_v5 = vor.u32 %v1052_v43, %v1051_v42  ;;  %vm1060_vm15 = vcmp.lt.s32.totalorder %v5074_v34, 1  ;;  %v908_v9 = vsub.s32 4, %v5054_v20  ;;  %vm1062_vm2 = vcmp.lt.s32.totalorder %v5074_v34, 3 }
  0x58   : > { %v890_v62 = vclz %v4103_v46  ;;  %vm1063_vm3 = vcmp.lt.s32.totalorder %v5074_v34, 4  ;;  %v988_v36 = vshll.u32 %v5097_v4, 30  ;;  %v1044_v37 = vshrl.u32 %v4802_v53, %v1043_v30 }
  0x59   : > { %v1059_v11 = vor.u32 %v1058_v58, %v1057_v56  ;;  %v1069_v19 = vsel %vm1063_vm3, %v1056_v54, 920167782  ;;  %vm1061_vm5 = vcmp.lt.s32.totalorder %v5074_v34, 2  ;;  %v1068_v12 = vsel %vm1060_vm15, %v1047_v0, %v1050_v1 }
  0x5a   : > { %v4104_v8 = vadd.s32 4294967294, %v890_v62  ;;  %v4118_v15 = vadd.s32 4294967169, %v1238_v2  ;;  %v5119_v18 = vsub.s32 %v985_v39, %v988_v36  ;;  %v1065_v22 = vsel %vm1063_vm3, %v1053_v5, 2102212464 }
  0x5b   : > { %v1070_v25 = vsel %vm1062_vm2, %v1053_v5, %v1069_v19  ;;  %v1072_v29 = vsel %vm1060_vm15, %v1050_v1, %v1053_v5  ;;  %v909_v30 = vsel %vm824_vm14, %v908_v9, %v5054_v20  ;;  %v1064_v32 = vsel %vm1060_vm15, %v1044_v37, %v1047_v0 }
  0x5c   : > { %vm4105_vm4 = vcmp.lt.s32.totalorder %v4104_v8, 0  ;;  %v991_v31 = vsub.s32 0, %v5119_v18  ;;  %v1073_v33 = vsel %vm1063_vm3, %v1059_v11, 1326507024  ;;  %v1066_v38 = vsel %vm1062_vm2, %v1050_v1, %v1065_v22 }
  0x5d   : > { %v893_v17 = vsel %vm4105_vm4, 0, %v4104_v8  ;;  %v1074_v50 = vsel %vm1062_vm2, %v1056_v54, %v1073_v33  ;;  %v1071_v39 = vsel %vm1061_vm5, %v1068_v12, %v1070_v25  ;;  %v1244_v41 = vadd.s32 1, %v4118_v15 }
  0x5e   : > { %v894_v26 = vsub.s32 32, %v893_v17  ;;  %v895_v28 = vshll.u32 %v5068_v51, %v893_v17  ;;  %v898_v63 = vsub.s32 4294967266, %v893_v17  ;;  %v4107_v20 = vmin.u32 %v991_v31, %v5119_v18 }
  0x5f   : > { %v1075_v40 = vsel %vm1061_vm5, %v1072_v29, %v1074_v50  ;;  %v5151_v46 = vsel %vm5102_vm1, 0, %v909_v30  ;;  %v1067_v54 = vsel %vm1061_vm5, %v1064_v32, %v1066_v38  ;;  %v5157_v56 = vand.u32 8388607, %v1234_v52 }
  0x60   : > { %v896_v51 = vshrl.u32 %v878_v3, %v894_v26  ;;  %v899_v35 = vadd.s32 127, %v898_v63  ;;  %v5146_v44 = vmul.u32.u64.low %v5090_v60, %v1075_v40  ;;  %v5147_v45 = vmul.u32.u64.high %v5090_v60, %v1075_v40, %v5146_v44 }
  0x61   : > { %v993_v48 = vclz %v4107_v20  ;;  %v5160_v62 = vmul.u32.u64.low %v5090_v60, %v1071_v39  ;;  %v5161_v0 = vmul.u32.u64.high %v5090_v60, %v1071_v39, %v5160_v62  ;;  %vm927_vm6 = vcmp.lt.s32.totalorder %v4959_v13, 0 }
  0x62   : > { %v897_v42 = vor.u32 %v896_v51, %v895_v28  ;;  %v900_v43 = vshll.u32 %v899_v35, 23  ;;  %v981_v1 = vadd.s32 %v5043_v14, %v5058_v24  ;;  %vm1245_vm7 = vcmp.gt.s32.totalorder %v1244_v41, 0 }
  0x63   : > { %v4108_v2 = vadd.s32 4294967294, %v993_v48  ;;  %v1740_v3 = vadd.s32 3, %v5151_v46  ;;  %v1011_v5 = vsub.s32 4, %v5097_v4  ;;  %v1246_v8 = vsel %vm1245_vm7, %v1244_v41, 0 }
  0x64   : > { %v901_v58 = vor.u32 4788187, %v900_v43  ;;  %v904_v49 = vcvt.s32.f32 %v897_v42  ;;  %vm5171_vm8 = vcmp.le.f32.partialorder %v925_v23, 0.7853982  ;;  %v1083_v36 = vmul.u32 %v5090_v60, %v1067_v54 }
  0x65   : > { %vm4109_vm9 = vcmp.lt.s32.totalorder %v4108_v2, 0  ;;  %vm1085_vm10 = vc.u32 %v5147_v45, %v5160_v62  ;;  %v1248_v14 = vand.u32 31, %v1246_v8  ;;  %v1086_v11 = vadd.s32 1, %v5161_v0 }
  0x66   : > { %v902_v34 = vand.u32 2147483647, %v901_v58  ;;  %v996_v37 = vsel %vm4109_vm9, 0, %v4108_v2  ;;  %v1242_v19 = vor.u32 8388608, %v5157_v56  ;;  %v5181_v22 = vand.u32 3, %v1740_v3 }
  0x67   : > { %v997_v12 = vsub.s32 32, %v996_v37  ;;  %v998_v15 = vshll.u32 %v5119_v18, %v996_v37  ;;  %v1001_v23 = vsub.s32 4294967266, %v996_v37  ;;  %v1249_v16 = vsub.s32 32, %v1248_v14 }
  0x68   : > { %v905_v24 = vmul.f32 %v904_v49, %v902_v34  ;;  %v1012_v60 = vsel %vm927_vm6, %v1011_v5, %v5097_v4  ;;  %v1087_v25 = vsel %vm1085_vm10, %v1086_v11, %v5161_v0  ;;  %v5187_v29 = vshrl.u32 %v1246_v8, 5  ;;  %v5210_v49 = vld [vmem:[%s4945_s11 + $0x38] sm:$0xff] }
  0x69   : > { %v999_v26 = vshrl.u32 %v981_v1, %v997_v12  ;;  %v1002_v28 = vadd.s32 127, %v1001_v23  ;;  %v1088_v63 = vadd.s32 %v1087_v25, %v1083_v36  ;;  %v1251_v18 = vshll.u32 %v4802_v53, %v1248_v14 }
  0x6a   : > { %v906_v17 = vxor.u32 2147483648, %v905_v24  ;;  %v1252_v31 = vshrl.u32 %v4803_v55, %v1249_v16  ;;  %v1254_v32 = vshll.u32 %v4803_v55, %v1248_v14  ;;  %v1255_v38 = vshrl.u32 %v4804_v57, %v1249_v16 }
  0x6b   : > { %v1000_v33 = vor.u32 %v999_v26, %v998_v15  ;;  %v1003_v51 = vshll.u32 %v1002_v28, 23  ;;  %v1089_v35 = vadd.s32 536870912, %v1088_v63  ;;  %v1257_v50 = vshll.u32 %v4804_v57, %v1248_v14 }
  0x6c   : > { %v907_v30 = vsel %vm824_vm14, %v906_v17, %v905_v24  ;;  %v1258_v20 = vshrl.u32 %v4805_v59, %v1249_v16  ;;  %v5202_v42 = vsel %vm5171_vm8, 0, %v1012_v60  ;;  %v1260_v7 = vshll.u32 %v4805_v59, %v1248_v14 }
  0x6d   : > { %v910_v4 = vsel %vm5102_vm1, %v4954_v10, %v907_v30  ;;  %v1004_v39 = vor.u32 4788187, %v1003_v51  ;;  %v1007_v40 = vcvt.s32.f32 %v1000_v33  ;;  %v1090_v41 = vshrl.u32 %v1089_v35, 30 }
  0x6e   : > { %4584 = vcosq.f32 %v910_v4  ;;  %v1261_v43 = vshrl.u32 %v4806_v61, %v1249_v16  ;;  %v1263_v44 = vshll.u32 %v4806_v61, %v1248_v14  ;;  %v1250_v56 = vshrl.u32 %v4802_v53, %v1249_v16 }
  0x6f   : > { %4586 = vsinq.f32 %v910_v4  ;;  %v1005_v48 = vand.u32 2147483647, %v1004_v39  ;;  %v1091_v54 = vshll.u32 %v1090_v41, 30  ;;  %v1264_v58 = vshrl.u32 %v4807_v6, %v1249_v16 }
  0x70   : > { %v1253_v0 = vor.u32 %v1252_v31, %v1251_v18  ;;  %v1256_v1 = vor.u32 %v1255_v38, %v1254_v32  ;;  %v1259_v2 = vor.u32 %v1258_v20, %v1257_v50  ;;  %v1262_v34 = vor.u32 %v1261_v43, %v1260_v7 }
  0x71   : > { %v1008_v3 = vmul.f32 %v1007_v40, %v1005_v48  ;;  %v5212_v5 = vsub.s32 %v1088_v63, %v1091_v54  ;;  %v1265_v8 = vor.u32 %v1264_v58, %v1263_v44  ;;  %vm1266_vm11 = vcmp.lt.s32.totalorder %v5187_v29, 1 }
  0x72   : > { %vm1743_vm12 = vcmp.eq.s32.totalorder %v5181_v22, 0  ;;  %vm1030_vm13 = vcmp.lt.s32.totalorder %v4967_v21, 0  ;;  %vm1267_vm14 = vcmp.lt.s32.totalorder %v5187_v29, 2  ;;  %vm1269_vm15 = vcmp.lt.s32.totalorder %v5187_v29, 4 }
  0x73   : > { %v5219_v36 = vshll.u32 %v1242_v19, 8  ;;  %v1443_v14 = vand.u32 2139095040, %v5210_v49  ;;  %vm1742_vm1 = vcmp.lt.s32.totalorder %v5181_v22, 2  ;;  %v1009_v24 = vxor.u32 2147483648, %v1008_v3 }
  0x74   : > { %v1094_v37 = vsub.s32 0, %v5212_v5  ;;  %vm1268_vm2 = vcmp.lt.s32.totalorder %v5187_v29, 3  ;;  %v1271_v11 = vsel %vm1269_vm15, %v1259_v2, 2102212464  ;;  %vm914_vm3 = vweird.f32 %v4954_v10 }
  0x75   : > { %v1270_v12 = vsel %vm1266_vm11, %v1250_v56, %v1253_v0  ;;  %v1274_v15 = vsel %vm1266_vm11, %v1253_v0, %v1256_v1  ;;  %v1275_v19 = vsel %vm1269_vm15, %v1262_v34, 920167782  ;;  %v1279_v23 = vsel %vm1269_vm15, %v1265_v8, 1326507024 }
  0x76   : > { %v1010_v16 = vsel %vm927_vm6, %v1009_v24, %v1008_v3  ;;  %v4111_v17 = vmin.u32 %v1094_v37, %v5212_v5  ;;  %v1272_v60 = vsel %vm1268_vm2, %v1256_v1, %v1271_v11  ;;  %v1278_v25 = vsel %vm1266_vm11, %v1256_v1, %v1259_v2 }
  0x77   : > { %vm1746_vm4 = vcmp.eq.s32.totalorder %v5181_v22, 2  ;;  %v1013_v26 = vsel %vm5171_vm8, %v4959_v13, %v1010_v16  ;;  %v1276_v28 = vsel %vm1268_vm2, %v1259_v2, %v1275_v19  ;;  %v1280_v63 = vsel %vm1268_vm2, %v1262_v34, %v1279_v23 }
  0x78   : > { %4588 = vcosq.f32 %v1013_v26  ;;  %v1844_v30 = vadd.s32 3, %v5202_v42  ;;  %vm5242_vm5 = vcmp.le.f32.partialorder %v1028_v47, 0.7853982  ;;  %v1096_v31 = vclz %v4111_v17 }
  0x79   : > { %v1114_v32 = vsub.s32 4, %v1090_v41  ;;  %4590 = vsinq.f32 %v1013_v26  ;;  %v1273_v4 = vsel %vm1267_vm14, %v1270_v12, %v1272_v60  ;;  %v1277_v9 = vsel %vm1267_vm14, %v1274_v15, %v1276_v28 }
  0x7a   : > { %v1281_v33 = vsel %vm1267_vm14, %v1278_v25, %v1280_v63  ;;  %v4112_v35 = vadd.s32 4294967294, %v1096_v31  ;;  %v1444_v50 = vshrl.u32 %v1443_v14, 23  ;;  %v1084_v40 = vadd.s32 %v5160_v62, %v5147_v45 }
  0x7b   : > { %v4585_v51 = vpop.eup %4584  ;;  %v5253_v38 = vmul.u32.u64.low %v5219_v36, %v1281_v33  ;;  %v5254_v47 = vmul.u32.u64.high %v5219_v36, %v1281_v33, %v5253_v38  ;;  %v5259_v7 = vmul.u32.u64.low %v5219_v36, %v1277_v9  ;;  %v5260_v43 = vmul.u32.u64.high %v5219_v36, %v1277_v9, %v5259_v7 }
  0x7c   : > { %v4587_v20 = vpop.eup %4586  ;;  %v921_v39 = vxor.u32 2147483648, %v4585_v51  ;;  %vm4113_vm6 = vcmp.lt.s32.totalorder %v4112_v35, 0  ;;  %v1115_v29 = vsel %vm1030_vm13, %v1114_v32, %v1090_v41  ;;  %v4126_v48 = vadd.s32 4294967169, %v1444_v50 }
  0x7d   : > { %v918_v44 = vxor.u32 2147483648, %v4587_v20  ;;  %v1099_v56 = vsel %vm4113_vm6, 0, %v4112_v35  ;;  %v1289_v58 = vmul.u32 %v5219_v36, %v1273_v4  ;;  %v5269_v0 = vand.u32 3, %v5151_v46 }
  0x7e   : > { %v1748_v54 = vsel %vm1746_vm4, %v921_v39, %v4587_v20  ;;  %v1100_v62 = vsub.s32 32, %v1099_v56  ;;  %v1101_v1 = vshll.u32 %v5212_v5, %v1099_v56  ;;  %v1104_v2 = vsub.s32 4294967266, %v1099_v56 }
  0x7f   : > { %v1745_v45 = vsel %vm1743_vm12, %v4585_v51, %v918_v44  ;;  %v1845_v34 = vand.u32 3, %v1844_v30  ;;  %vm1291_vm7 = vc.u32 %v5254_v47, %v5259_v7  ;;  %v1292_v3 = vadd.s32 1, %v5260_v43 }
  0x80   : > { %v1749_v41 = vsel %vm1742_vm1, %v1745_v45, %v1748_v54  ;;  %v1102_v8 = vshrl.u32 %v1084_v40, %v1100_v62  ;;  %v1105_v36 = vadd.s32 127, %v1104_v2  ;;  %v1450_v14 = vadd.s32 1, %v4126_v48 }
  0x81   : > { %v5281_v46 = vsel %vm914_vm3, nan, %v1749_v41  ;;  %v5287_v22 = vsel %vm5242_vm5, 0, %v1115_v29  ;;  %v1293_v5 = vsel %vm1291_vm7, %v1292_v3, %v5260_v43  ;;  %v1440_v24 = vand.u32 2147483647, %v5210_v49 }
  0x82   : > { %2393 = vrot.lane.b32.xlu1 %v5281_v46, %s4808_s16  ;;  %vm917_vm8 = vcmp.eq.s32.totalorder %v5269_v0, 0  ;;  %v1103_v37 = vor.u32 %v1102_v8, %v1101_v1  ;;  %v1106_v11 = vshll.u32 %v1105_v36, 23  ;;  %v1294_v12 = vadd.s32 %v1293_v5, %v1289_v58 }
  0x83   : > { %vm1451_vm9 = vcmp.gt.s32.totalorder %v1450_v14, 0  ;;  %vm1017_vm10 = vweird.f32 %v4959_v13  ;;  %v5293_v19 = vsel %vm917_vm8, %v4585_v51, %v918_v44  ;;  %vm920_vm11 = vcmp.eq.s32.totalorder %v5269_v0, 2 }
  0x84   : > { %v1452_v15 = vsel %vm1451_vm9, %v1450_v14, 0  ;;  %vm1846_vm12 = vcmp.lt.s32.totalorder %v1845_v34, 2  ;;  %v1107_v23 = vor.u32 4788187, %v1106_v11  ;;  %v1110_v16 = vcvt.s32.f32 %v1103_v37 }
  0x85   : > { %v1295_v17 = vadd.s32 536870912, %v1294_v12  ;;  %v5296_v60 = vpop.eup %4588  ;;  %vm1850_vm14 = vcmp.eq.s32.totalorder %v1845_v34, 2  ;;  %v1948_v25 = vadd.s32 3, %v5287_v22  ;;  %v1454_v26 = vand.u32 31, %v1452_v15 }
  0x86   : > { %v5299_v28 = vsel %vm920_vm11, %v921_v39, %v4587_v20  ;;  %v5301_v63 = vpop.eup %4590  ;;  %v7289_v30 = vxor.u32 2147483648, %v5296_v60  ;;  %vm1847_vm15 = vcmp.eq.s32.totalorder %v1845_v34, 0  ;;  %v1108_v31 = vand.u32 2147483647, %v1107_v23 }
  0x87   : > { %v5304_v32 = vshrl.u32 %v1295_v17, 30  ;;  %v7290_v4 = vxor.u32 2147483648, %v5301_v63  ;;  %v1447_v9 = vand.u32 8388607, %v1440_v24  ;;  %v1453_v33 = vshrl.u32 %v1452_v15, 5 }
  0x88   : > { %v1455_v51 = vsub.s32 32, %v1454_v26  ;;  %v1852_v35 = vsel %vm1850_vm14, %v7289_v30, %v5301_v63  ;;  %v1111_v38 = vmul.f32 %v1110_v16, %v1108_v31  ;;  %v1457_v20 = vshll.u32 %v4802_v53, %v1454_v26 }
  0x89   : > { %v1297_v50 = vshll.u32 %v5304_v32, 30  ;;  %v1849_v39 = vsel %vm1847_vm15, %v5296_v60, %v7290_v4  ;;  %v5317_v40 = vand.u32 3, %v1948_v25  ;;  %v1460_v44 = vshll.u32 %v4803_v55, %v1454_v26 }
  0x8a   : > { %v1458_v43 = vshrl.u32 %v4803_v55, %v1455_v51  ;;  %v1853_v29 = vsel %vm1846_vm12, %v1849_v39, %v1852_v35  ;;  %v1112_v48 = vxor.u32 2147483648, %v1111_v38  ;;  %v1461_v56 = vshrl.u32 %v4804_v57, %v1455_v51 }
  0x8b   : > { %v5322_v54 = vsub.s32 %v1294_v12, %v1297_v50  ;;  %v5327_v58 = vsel %vm1017_vm10, nan, %v1853_v29  ;;  %v1448_v45 = vor.u32 8388608, %v1447_v9  ;;  %v1456_v62 = vshrl.u32 %v4802_v53, %v1455_v51 }
  0x8c   : > { %vm1472_vm1 = vcmp.lt.s32.totalorder %v1453_v33, 1  ;;  %2395 = vrot.lane.b32.xlu1 %v5327_v58, %s4808_s16  ;;  %v1113_v1 = vsel %vm1030_vm13, %v1112_v48, %v1111_v38  ;;  %v1459_v41 = vor.u32 %v1458_v43, %v1457_v20  ;;  %v1463_v34 = vshll.u32 %v4804_v57, %v1454_v26 }
  0x8d   : > { %v1300_v2 = vsub.s32 0, %v5322_v54  ;;  %v1116_v3 = vsel %vm5242_vm5, %v4967_v21, %v1113_v1  ;;  %v1464_v8 = vshrl.u32 %v4805_v59, %v1455_v51  ;;  %v1466_v36 = vshll.u32 %v4805_v59, %v1454_v26 }
  0x8e   : > { %v1467_v14 = vshrl.u32 %v4806_v61, %v1455_v51  ;;  %4592 = vcosq.f32 %v1116_v3  ;;  %v1462_v37 = vor.u32 %v1461_v56, %v1460_v44  ;;  %v1469_v11 = vshll.u32 %v4806_v61, %v1454_v26 }
  0x8f   : > { %v4119_v5 = vmin.u32 %v1300_v2, %v5322_v54  ;;  %4594 = vsinq.f32 %v1116_v3  ;;  %v1465_v12 = vor.u32 %v1464_v8, %v1463_v34  ;;  %v1470_v23 = vshrl.u32 %v4807_v6, %v1455_v51 }
  0x90   : > { %v1468_v15 = vor.u32 %v1467_v14, %v1466_v36  ;;  %vm1236_vm13 = vcmp.lt.s32.totalorder %v5063_v27, 0  ;;  %v1290_v18 = vadd.s32 %v5259_v7, %v5254_v47  ;;  %v1488_v17 = vshll.u32 %v1448_v45, 8  ;;  %v5363_v45 = vld [vmem:[%s4945_s11] sm:$0xff] }
  0x91   : > { %v1302_v16 = vclz %v4119_v5  ;;  %vm916_vm2 = vcmp.lt.s32.totalorder %v5269_v0, 2  ;;  %v1471_v25 = vor.u32 %v1470_v23, %v1469_v11  ;;  %vm1473_vm4 = vcmp.lt.s32.totalorder %v1453_v33, 2 }
  0x92   : > { %vm1474_vm5 = vcmp.lt.s32.totalorder %v1453_v33, 3  ;;  %vm1475_vm6 = vcmp.lt.s32.totalorder %v1453_v33, 4  ;;  %v1476_v26 = vsel %vm1472_vm1, %v1456_v62, %v1459_v41  ;;  %v1480_v51 = vsel %vm1472_vm1, %v1459_v41, %v1462_v37 }
  0x93   : > { %v4120_v31 = vadd.s32 4294967294, %v1302_v16  ;;  %v1477_v9 = vsel %vm1475_vm6, %v1465_v12, 2102212464  ;;  %v1481_v38 = vsel %vm1475_vm6, %v1468_v15, 920167782  ;;  %v1484_v50 = vsel %vm1472_vm1, %v1462_v37, %v1465_v12 }
  0x94   : > { %v1478_v35 = vsel %vm1474_vm5, %v1462_v37, %v1477_v9  ;;  %v1485_v47 = vsel %vm1475_vm6, %v1471_v25, 1326507024  ;;  %vm5354_vm7 = vcmp.le.f32.partialorder %v1234_v52, 0.7853982  ;;  %v1320_v20 = vsub.s32 4, %v5304_v32 }
  0x95   : > { %vm4121_vm8 = vcmp.lt.s32.totalorder %v4120_v31, 0  ;;  %v1482_v39 = vsel %vm1474_vm5, %v1465_v12, %v1481_v38  ;;  %v1486_v43 = vsel %vm1474_vm5, %v1468_v15, %v1485_v47  ;;  %v1479_v29 = vsel %vm1473_vm4, %v1476_v26, %v1478_v35 }
  0x96   : > { %v1305_v44 = vsel %vm4121_vm8, 0, %v4120_v31  ;;  %v1483_v48 = vsel %vm1473_vm4, %v1480_v51, %v1482_v39  ;;  %v1487_v56 = vsel %vm1473_vm4, %v1484_v50, %v1486_v43  ;;  %v923_v2 = vsel %vm916_vm2, %v5293_v19, %v5299_v28 }
  0x97   : > { %v1306_v62 = vsub.s32 32, %v1305_v44  ;;  %v1307_v52 = vshll.u32 %v5322_v54, %v1305_v44  ;;  %v1310_v1 = vsub.s32 4294967266, %v1305_v44  ;;  %v5379_v14 = vsel %vm914_vm3, nan, %v923_v2 }
  0x98   : > { %v5370_v41 = vmul.u32.u64.low %v1488_v17, %v1487_v56  ;;  %v5371_v34 = vmul.u32.u64.high %v1488_v17, %v1487_v56, %v5370_v41  ;;  %v5373_v3 = vmul.u32.u64.low %v1488_v17, %v1483_v48  ;;  %v5374_v8 = vmul.u32.u64.high %v1488_v17, %v1483_v48, %v5373_v3  ;;  %7329 = vst [vmem:[#allocation8_spill] sm:$0xff] %v5379_v14 }
  0x99   : > { %v1308_v33 = vshrl.u32 %v1290_v18, %v1306_v62  ;;  %v1311_v36 = vadd.s32 127, %v1310_v1  ;;  %v722_v54 = vand.u32 2139095040, %v5363_v45  ;;  %vm1120_vm9 = vweird.f32 %v4967_v21  ;;  %v5557_v21 = vld [vmem:[%s347_s20] ss:$0 sm:$0xff]  ;;  %s4162_s20 = sld [smem:[#allocation2 + $0x1]] }
  0x9a   : > { %vm1950_vm11 = vcmp.lt.s32.totalorder %v5317_v40, 2  ;;  %vm1951_vm12 = vcmp.eq.s32.totalorder %v5317_v40, 0  ;;  %v1321_v0 = vsel %vm1236_vm13, %v1320_v20, %v5304_v32  ;;  %v1495_v5 = vmul.u32 %v1488_v17, %v1479_v29 }
  0x9b   : > { %v1309_v19 = vor.u32 %v1308_v33, %v1307_v52  ;;  %v1312_v28 = vshll.u32 %v1311_v36, 23  ;;  %v723_v37 = vshrl.u32 %v722_v54, 23  ;;  %v4593_v11 = vpop.eup %4592  ;;  %vm1954_vm3 = vcmp.eq.s32.totalorder %v5317_v40, 2 }
  0x9c   : > { %vm1497_vm14 = vc.u32 %v5371_v34, %v5373_v3  ;;  %v1498_v10 = vadd.s32 1, %v5374_v8  ;;  %v1121_v12 = vand.u32 3, %v5287_v22  ;;  %v4595_v15 = vpop.eup %4594  ;;  %v1127_v23 = vxor.u32 2147483648, %v4593_v11 }
  0x9d   : > { %v1313_v18 = vor.u32 4788187, %v1312_v28  ;;  %v1316_v16 = vcvt.s32.f32 %v1309_v19  ;;  %v4098_v25 = vadd.s32 4294967169, %v723_v37  ;;  %v1124_v32 = vxor.u32 2147483648, %v4595_v15 }
  0x9e   : > { %v5395_v17 = vsel %vm5354_vm7, 0, %v1321_v0  ;;  %v1499_v31 = vsel %vm1497_vm14, %v1498_v10, %v5374_v8  ;;  %v719_v26 = vand.u32 2147483647, %v5363_v45  ;;  %v1956_v9 = vsel %vm1954_vm3, %v1127_v23, %v4595_v15 }
  0x9f   : > { %v1314_v51 = vand.u32 2147483647, %v1313_v18  ;;  %v1500_v35 = vadd.s32 %v1499_v31, %v1495_v5  ;;  %v729_v38 = vadd.s32 1, %v4098_v25  ;;  %v1953_v22 = vsel %vm1951_vm12, %v4593_v11, %v1124_v32 }
  0xa0   : > { %vm1122_vm15 = vcmp.lt.s32.totalorder %v1121_v12, 2  ;;  %vm1123_vm1 = vcmp.eq.s32.totalorder %v1121_v12, 0  ;;  %vm1126_vm2 = vcmp.eq.s32.totalorder %v1121_v12, 2  ;;  %v1957_v50 = vsel %vm1950_vm11, %v1953_v22, %v1956_v9 }
  0xa1   : > { %v1317_v47 = vmul.f32 %v1316_v16, %v1314_v51  ;;  %v1501_v20 = vadd.s32 536870912, %v1500_v35  ;;  %vm730_vm4 = vcmp.gt.s32.totalorder %v729_v38, 0  ;;  %v5405_v39 = vsel %vm1120_vm9, nan, %v1957_v50 }
  0xa2   : > { %v731_v43 = vsel %vm730_vm4, %v729_v38, 0  ;;  %v1125_v44 = vsel %vm1123_vm1, %v4593_v11, %v1124_v32  ;;  %v1128_v29 = vsel %vm1126_vm2, %v1127_v23, %v4595_v15  ;;  %2397 = vrot.lane.b32.xlu1 %v5405_v39, %s4808_s16  ;;  %v2156_v56 = vadd.s32 3, %v5395_v17  ;;  %v5438_v32 = vld [vmem:[%s4945_s11 + $0x20] sm:$0xff] }
  0xa3   : > { %v1318_v48 = vxor.u32 2147483648, %v1317_v47  ;;  %v1502_v62 = vshrl.u32 %v1501_v20, 30  ;;  %v733_v52 = vand.u32 31, %v731_v43  ;;  %v5411_v40 = vsel %vm1122_vm15, %v1125_v44, %v1128_v29 }
  0xa4   : > { %v726_v41 = vand.u32 8388607, %v719_v26  ;;  %v5422_v0 = vand.u32 3, %v2156_v56  ;;  %vm1442_vm5 = vcmp.lt.s32.totalorder %v5210_v49, 0  ;;  %v5428_v5 = vshrl.u32 %v731_v43, 5 }
  0xa5   : > { %v1319_v1 = vsel %vm1236_vm13, %v1318_v48, %v1317_v47  ;;  %v1503_v2 = vshll.u32 %v1502_v62, 30  ;;  %v734_v8 = vsub.s32 32, %v733_v52  ;;  %v736_v36 = vshll.u32 %v4802_v53, %v733_v52 }
  0xa6   : > { %v1322_v33 = vsel %vm5354_vm7, %v5063_v27, %v1319_v1  ;;  %v739_v54 = vshll.u32 %v4803_v55, %v733_v52  ;;  %v742_v28 = vshll.u32 %v4804_v57, %v733_v52  ;;  %v727_v10 = vor.u32 8388608, %v726_v41 }
  0xa7   : > { %4596 = vcosq.f32 %v1322_v33  ;;  %v5425_v19 = vsub.s32 %v1500_v35, %v1503_v2  ;;  %v737_v7 = vshrl.u32 %v4803_v55, %v734_v8  ;;  %v740_v37 = vshrl.u32 %v4804_v57, %v734_v8 }
  0xa8   : > { %4598 = vsinq.f32 %v1322_v33  ;;  %v743_v12 = vshrl.u32 %v4805_v59, %v734_v8  ;;  %v745_v15 = vshll.u32 %v4805_v59, %v733_v52  ;;  %v746_v16 = vshrl.u32 %v4806_v61, %v734_v8 }
  0xa9   : > { %v1506_v11 = vsub.s32 0, %v5425_v19  ;;  %v738_v23 = vor.u32 %v737_v7, %v736_v36  ;;  %v741_v18 = vor.u32 %v740_v37, %v739_v54  ;;  %v748_v25 = vshll.u32 %v4806_v61, %v733_v52 }
  0xaa   : > { %vm5442_vm13 = vcmp.le.f32.partialorder %v1440_v24, 0.7853982  ;;  %v1496_v9 = vadd.s32 %v5373_v3, %v5371_v34  ;;  %v744_v35 = vor.u32 %v743_v12, %v742_v28  ;;  %v749_v38 = vshrl.u32 %v4807_v6, %v734_v8 }
  0xab   : > { %v4127_v51 = vmin.u32 %v1506_v11, %v5425_v19  ;;  %vm2162_vm6 = vcmp.eq.s32.totalorder %v5422_v0, 2  ;;  %v1526_v22 = vsub.s32 4, %v1502_v62  ;;  %v735_v50 = vshrl.u32 %v4802_v53, %v734_v8 }
  0xac   : > { %v747_v47 = vor.u32 %v746_v16, %v745_v15  ;;  %vm751_vm7 = vcmp.lt.s32.totalorder %v5428_v5, 1  ;;  %vm2159_vm8 = vcmp.eq.s32.totalorder %v5422_v0, 0  ;;  %vm753_vm11 = vcmp.lt.s32.totalorder %v5428_v5, 3 }
  0xad   : > { %v1508_v24 = vclz %v4127_v51  ;;  %v5455_v20 = vshll.u32 %v727_v10, 8  ;;  %v1134_v34 = vand.u32 2139095040, %v5438_v32  ;;  %vm2158_vm12 = vcmp.lt.s32.totalorder %v5422_v0, 2 }
  0xae   : > { %v750_v3 = vor.u32 %v749_v38, %v748_v25  ;;  %vm752_vm3 = vcmp.lt.s32.totalorder %v5428_v5, 2  ;;  %vm754_vm14 = vcmp.lt.s32.totalorder %v5428_v5, 4  ;;  %v759_v43 = vsel %vm751_vm7, %v738_v23, %v741_v18 }
  0xaf   : > { %vm1326_vm15 = vweird.f32 %v5063_v27  ;;  %v4128_v44 = vadd.s32 4294967294, %v1508_v24  ;;  %v756_v29 = vsel %vm754_vm14, %v744_v35, 2102212464  ;;  %v760_v48 = vsel %vm754_vm14, %v747_v47, 920167782 }
  0xb0   : > { %v763_v56 = vsel %vm751_vm7, %v741_v18, %v744_v35  ;;  %v1527_v52 = vsel %vm1442_vm5, %v1526_v22, %v1502_v62  ;;  %v755_v1 = vsel %vm751_vm7, %v735_v50, %v738_v23  ;;  %v761_v2 = vsel %vm753_vm11, %v744_v35, %v760_v48 }
  0xb1   : > { %v764_v41 = vsel %vm754_vm14, %v750_v3, 1326507024  ;;  %vm4129_vm1 = vcmp.lt.s32.totalorder %v4128_v44, 0  ;;  %v757_v8 = vsel %vm753_vm11, %v741_v18, %v756_v29  ;;  %v762_v33 = vsel %vm752_vm3, %v759_v43, %v761_v2 }
  0xb2   : > { %v765_v36 = vsel %vm753_vm11, %v747_v47, %v764_v41  ;;  %v1511_v54 = vsel %vm4129_vm1, 0, %v4128_v44  ;;  %v5481_v28 = vmul.u32.u64.low %v5455_v20, %v762_v33  ;;  %v5482_v7 = vmul.u32.u64.high %v5455_v20, %v762_v33, %v5481_v28 }
  0xb3   : > { %v766_v62 = vsel %vm752_vm3, %v763_v56, %v765_v36  ;;  %v1512_v37 = vsub.s32 32, %v1511_v54  ;;  %v1513_v11 = vshll.u32 %v5425_v19, %v1511_v54  ;;  %v1516_v10 = vsub.s32 4294967266, %v1511_v54 }
  0xb4   : > { %v1131_v12 = vand.u32 2147483647, %v5438_v32  ;;  %v5487_v15 = vpop.eup %4596  ;;  %v5491_v23 = vsel %vm5442_vm13, 0, %v1527_v52  ;;  %v5494_v18 = vmul.u32.u64.low %v5455_v20, %v766_v62  ;;  %v5495_v16 = vmul.u32.u64.high %v5455_v20, %v766_v62, %v5494_v18 }
  0xb5   : > { %v1135_v25 = vshrl.u32 %v1134_v34, 23  ;;  %v5497_v51 = vpop.eup %4598  ;;  %v1333_v19 = vxor.u32 2147483648, %v5487_v15  ;;  %v1514_v22 = vshrl.u32 %v1496_v9, %v1512_v37  ;;  %v1517_v50 = vadd.s32 127, %v1516_v10 }
  0xb6   : > { %v758_v47 = vsel %vm752_vm3, %v755_v1, %v757_v8  ;;  %v1330_v43 = vxor.u32 2147483648, %v5497_v51  ;;  %v777_v44 = vadd.s32 1, %v5482_v7  ;;  %vm776_vm2 = vc.u32 %v5495_v16, %v5481_v28 }
  0xb7   : > { %v2164_v34 = vsel %vm2162_vm6, %v1333_v19, %v5497_v51  ;;  %v1515_v29 = vor.u32 %v1514_v22, %v1513_v11  ;;  %v1518_v48 = vshll.u32 %v1517_v50, 23  ;;  %v4114_v56 = vadd.s32 4294967169, %v1135_v25 }
  0xb8   : > { %v396_v35 = vpop.xlane.xlu1 %395  ;;  %v390_v38 = vpop.xlane.xlu0 %389  ;;  %v2161_v5 = vsel %vm2159_vm8, %v5487_v15, %v1330_v43  ;;  %v774_v1 = vmul.u32 %v5455_v20, %v758_v47  ;;  %v778_v0 = vsel %vm776_vm2, %v777_v44, %v5482_v7  ;;  %v2364_v47 = vadd.s32 3, %v5491_v23 }
  0xb9   : > { %v415_v24 = vmul.f32 0.03125, %v396_v35  ;;  %v413_v3 = vmul.f32 0.03125, %v390_v38  ;;  %v2165_v8 = vsel %vm2158_vm12, %v2161_v5, %v2164_v34  ;;  %v1519_v33 = vor.u32 4788187, %v1518_v48 }
  0xba   : > { %v1522_v36 = vcvt.s32.f32 %v1515_v29  ;;  %v5521_v37 = vsel %vm1326_vm15, nan, %v2165_v8  ;;  %v1141_v11 = vadd.s32 1, %v4114_v56  ;;  %v779_v25 = vadd.s32 %v778_v0, %v774_v1 }
  0xbb   : > { %v423_v9 = vadd.f32 1e-06, %v415_v24  ;;  %v421_v52 = vadd.f32 1e-06, %v413_v3  ;;  %2401 = vrot.lane.b32.xlu1 %v5521_v37, %s4808_s16  ;;  %v1520_v20 = vand.u32 2147483647, %v1519_v33  ;;  %v5551_v31 = vadd.s32 %v5481_v28, %v5495_v16 }
  0xbc   : > { %v399_v2 = vpop.xlane.xlu1 %398  ;;  %v393_v41 = vpop.xlane.xlu0 %392  ;;  %v1138_v35 = vand.u32 8388607, %v1131_v12  ;;  %vm1142_vm4 = vcmp.gt.s32.totalorder %v1141_v11, 0  ;;  %v780_v3 = vadd.s32 536870912, %v779_v25  ;;  %v5531_v5 = vand.u32 3, %v2364_v47 }
  0xbd   : > { %4600 = vrsqrt.f32 %v423_v9  ;;  %v416_v54 = vmul.f32 0.03125, %v399_v2  ;;  %v414_v62 = vmul.f32 0.03125, %v393_v41  ;;  %v1523_v50 = vmul.f32 %v1522_v36, %v1520_v20 }
  0xbe   : > { %4602 = vrsqrt.f32 %v421_v52  ;;  %v1143_v7 = vsel %vm1142_vm4, %v1141_v11, 0  ;;  %v781_v29 = vshrl.u32 %v780_v3, 30  ;;  %v1139_v48 = vor.u32 8388608, %v1138_v35 }
  0xbf   : > { %v424_v10 = vadd.f32 1e-06, %v416_v54  ;;  %v422_v18 = vadd.f32 1e-06, %v414_v62  ;;  %v1524_v34 = vxor.u32 2147483648, %v1523_v50  ;;  %vm721_vm6 = vcmp.lt.s32.totalorder %v5363_v45, 0 }
  0xc0   : > { %v405_v38 = vpop.xlane.xlu1 %404  ;;  %v402_v22 = vpop.xlane.xlu0 %401  ;;  %v1145_v1 = vand.u32 31, %v1143_v7  ;;  %v782_v36 = vshll.u32 %v781_v29, 30  ;;  %v5544_v54 = vsel %vm1120_vm9, nan, %v5411_v40  ;;  %v5547_v20 = vand.u32 3, %v5395_v17 }
  0xc1   : > { %4604 = vrsqrt.f32 %v424_v10  ;;  %v418_v24 = vmul.f32 0.03125, %v405_v38  ;;  %v417_v44 = vmul.f32 0.03125, %v402_v22  ;;  %v1525_v52 = vsel %vm1442_vm5, %v1524_v34, %v1523_v50  ;;  %7332 = vst [vmem:[#allocation9_spill] sm:$0xff] %v5544_v54 }
  0xc2   : > { %4606 = vrsqrt.f32 %v422_v18  ;;  %v1528_v33 = vsel %vm5442_vm13, %v5210_v49, %v1525_v52  ;;  %v1146_v62 = vsub.s32 32, %v1145_v1  ;;  %v5553_v11 = vshll.u32 %v1139_v48, 8 }
  0xc3   : > { %v426_v2 = vadd.f32 1e-06, %v418_v24  ;;  %v425_v0 = vadd.f32 1e-06, %v417_v44  ;;  %4608 = vcosq.f32 %v1528_v33  ;;  %v5555_v18 = vsub.s32 %v779_v25, %v782_v36 }
  0xc4   : > { %v411_v56 = vpop.xlane.xlu1 %410  ;;  %v408_v9 = vpop.xlane.xlu0 %407  ;;  %4610 = vsinq.f32 %v1528_v33  ;;  %v805_v35 = vsub.s32 4, %v781_v29  ;;  %v5559_v38 = vshrl.u32 %v1143_v7, 5  ;;  %v1148_v17 = vshll.u32 %v4802_v53, %v1145_v1 }
  0xc5   : > { %v420_v41 = vmul.f32 0.03125, %v411_v56  ;;  %v419_v8 = vmul.f32 0.03125, %v408_v9  ;;  %4612 = vrsqrt.f32 %v426_v2  ;;  %v785_v50 = vsub.s32 0, %v5555_v18 }
  0xc6   : > { %v1149_v28 = vshrl.u32 %v4803_v55, %v1146_v62  ;;  %v1151_v16 = vshll.u32 %v4803_v55, %v1145_v1  ;;  %v1152_v47 = vshrl.u32 %v4804_v57, %v1146_v62  ;;  %4614 = vrsqrt.f32 %v425_v0 }
  0xc7   : > { %v428_v10 = vadd.f32 1e-06, %v420_v41  ;;  %v427_v40 = vadd.f32 1e-06, %v419_v8  ;;  %v1154_v3 = vshll.u32 %v4804_v57, %v1145_v1  ;;  %v1155_v34 = vshrl.u32 %v4805_v59, %v1146_v62  ;;  %v4696_v8 = vld [vmem:[%s4940_s28 + $0x10] sm:$0xff] }
  0xc8   : > { %vm2370_vm9 = vcmp.eq.s32.totalorder %v5531_v5, 2  ;;  %v4099_v7 = vmin.u32 %v785_v50, %v5555_v18  ;;  %v5573_v44 = vsel %vm721_vm6, %v805_v35, %v781_v29  ;;  %vm2367_vm5 = vcmp.eq.s32.totalorder %v5531_v5, 0 }
  0xc9   : > { %4616 = vrsqrt.f32 %v428_v10  ;;  %v1147_v56 = vshrl.u32 %v4802_v53, %v1146_v62  ;;  %v1157_v9 = vshll.u32 %v4805_v59, %v1145_v1  ;;  %v1158_v52 = vshrl.u32 %v4806_v61, %v1146_v62  ;;  %v4697_v10 = vld [vmem:[%s4940_s28] sm:$0xff] }
  0xca   : > { %v4601_v22 = vpop.eup %4600  ;;  %4618 = vrsqrt.f32 %v427_v40  ;;  %vm2366_vm13 = vcmp.lt.s32.totalorder %v5531_v5, 2  ;;  %v787_v41 = vclz %v4099_v7  ;;  %v1150_v33 = vor.u32 %v1149_v28, %v1148_v17  ;;  %v4699_v28 = vld [vmem:[%s4940_s28 + $0x8] sm:$0xff] }
  0xcb   : > { %v4603_v25 = vpop.eup %4602  ;;  %v445_v24 = vmul.f32 %v4601_v22, %v5557_v21  ;;  %v1153_v36 = vor.u32 %v1152_v47, %v1151_v16  ;;  %vm1532_vm7 = vweird.f32 %v5210_v49  ;;  %v1156_v22 = vor.u32 %v1155_v34, %v1154_v3 }
  0xcc   : > { %v443_v48 = vmul.f32 %v4603_v25, %v5557_v21  ;;  %v1160_v50 = vshll.u32 %v4806_v61, %v1145_v1  ;;  %v4100_v25 = vadd.s32 4294967294, %v787_v41  ;;  %v1159_v7 = vor.u32 %v1158_v52, %v1157_v9 }
  0xcd   : > { %v453_v29 = vmul.f32 %v4696_v8, %v445_v24  ;;  %v1161_v4 = vshrl.u32 %v4807_v6, %v1146_v62  ;;  %v4698_v24 = vld [vmem:[%s4940_s28 + $0x18] sm:$0xff]  ;;  %vm1163_vm8 = vcmp.lt.s32.totalorder %v5559_v38, 1  ;;  %vm1164_vm11 = vcmp.lt.s32.totalorder %v5559_v38, 2 }
  0xce   : > { %v4605_v2 = vpop.eup %4604  ;;  %v451_v35 = vmul.f32 %v4697_v10, %v443_v48  ;;  %vm1165_vm12 = vcmp.lt.s32.totalorder %v5559_v38, 3  ;;  %vm4101_vm3 = vcmp.lt.s32.totalorder %v4100_v25, 0  ;;  %vm1166_vm14 = vcmp.lt.s32.totalorder %v5559_v38, 4 }
  0xcf   : > { %v4607_v0 = vpop.eup %4606  ;;  %v446_v40 = vmul.f32 %v4605_v2, %v5557_v21  ;;  %v1162_v47 = vor.u32 %v1161_v4, %v1160_v50  ;;  %vm1329_vm1 = vcmp.eq.s32.totalorder %v5547_v20, 0  ;;  %vm5597_vm2 = vcmp.le.f32.partialorder %v719_v26, 0.7853982 }
  0xd0   : > { %v444_v30 = vmul.f32 %v4607_v0, %v5557_v21  ;;  %v790_v62 = vsel %vm4101_vm3, 0, %v4100_v25  ;;  %v1167_v34 = vsel %vm1163_vm8, %v1147_v56, %v1150_v33  ;;  %v1168_v48 = vsel %vm1166_vm14, %v1156_v22, 2102212464 }
  0xd1   : > { %v454_v17 = vmul.f32 %v4698_v24, %v446_v40  ;;  %v791_v4 = vsub.s32 32, %v790_v62  ;;  %v792_v9 = vshll.u32 %v5555_v18, %v790_v62  ;;  %v795_v52 = vsub.s32 4294967266, %v790_v62 }
  0xd2   : > { %v452_v16 = vmul.f32 %v4699_v28, %v444_v30  ;;  %v5605_v30 = vpop.eup %4608  ;;  %v1169_v8 = vsel %vm1165_vm12, %v1153_v36, %v1168_v48  ;;  %v1171_v56 = vsel %vm1163_vm8, %v1150_v33, %v1153_v36  ;;  %v1176_v25 = vsel %vm1166_vm14, %v1162_v47, 1326507024 }
  0xd3   : > { %v460_v3 = vpack.c.bf16 %v454_v17, %v453_v29  ;;  %v5608_v41 = vpop.eup %4610  ;;  %v1539_v26 = vxor.u32 2147483648, %v5605_v30  ;;  %v1172_v29 = vsel %vm1166_vm14, %v1159_v7, 920167782  ;;  %v793_v18 = vshrl.u32 %v5551_v31, %v791_v4 }
  0xd4   : > { %v459_v2 = vpack.c.bf16 %v452_v16, %v451_v35  ;;  %v4613_v0 = vpop.eup %4612  ;;  %v1536_v10 = vxor.u32 2147483648, %v5608_v41  ;;  %v796_v40 = vadd.s32 127, %v795_v52  ;;  %v1175_v35 = vsel %vm1163_vm8, %v1153_v36, %v1156_v22 }
  0xd5   : > { %v2372_v33 = vsel %vm2370_vm9, %v1539_v26, %v5608_v41  ;;  %v1170_v50 = vsel %vm1164_vm11, %v1167_v34, %v1169_v8  ;;  %v1173_v31 = vsel %vm1165_vm12, %v1156_v22, %v1172_v29  ;;  %v4615_v24 = vpop.eup %4614  ;;  %v794_v17 = vor.u32 %v793_v18, %v792_v9 }
  0xd6   : > { %4214 = vmatprep.mubr.msk.bf16.mxu0 %vm387_vm0, %v459_v2  ;;  %v2369_v36 = vsel %vm2367_vm5, %v5605_v30, %v1536_v10  ;;  %v797_v28 = vshll.u32 %v796_v40, 23  ;;  %v1174_v16 = vsel %vm1164_vm11, %v1171_v56, %v1173_v31  ;;  %v4617_v62 = vpop.eup %4616  ;;  %v1177_v22 = vsel %vm1165_vm12, %v1159_v7, %v1176_v25  ;;  %v5663_v56 = vld [vmem:[%s4945_s11 + $0x30] sm:$0xff]  ;;  %v4700_v31 = vld [vmem:[%s4940_s28 + $0x20] sm:$0xff]  ;;  %s4813_s11 = smov 48  }
  0xd7   : > { %4215 = vmatmul.mubr.msk.bf16.vlgmr.msra.gmra.mxu0 %vm387_vm0, %v460_v3  ;;  %v2373_v3 = vsel %vm2366_vm13, %v2369_v36, %v2372_v33  ;;  %v5644_v47 = vmul.u32.u64.low %v5553_v11, %v1174_v16  ;;  %v5645_v34 = vmul.u32.u64.high %v5553_v11, %v1174_v16, %v5644_v47  ;;  %v4619_v48 = vpop.eup %4618  ;;  %v801_v52 = vcvt.s32.f32 %v794_v17  ;;  %v4701_v36 = vld [vmem:[%s4940_s28 + $0x28] sm:$0xff] }
  0xd8   : > { %v5650_v4 = vsel %vm1532_vm7, nan, %v2373_v3  ;;  %v798_v9 = vor.u32 4788187, %v797_v28  ;;  %v1178_v5 = vsel %vm1164_vm11, %v1175_v35, %v1177_v22  ;;  %vm1332_vm4 = vcmp.eq.s32.totalorder %v5547_v20, 2 }
  0xd9   : > { %2405 = vrot.lane.b32.xlu1 %v5650_v4, %s4808_s16  ;;  %v5657_v7 = vmul.u32.u64.low %v5553_v11, %v1178_v5  ;;  %v5658_v2 = vmul.u32.u64.high %v5553_v11, %v1178_v5, %v5657_v7  ;;  %v447_v8 = vmul.f32 %v4615_v24, %v5557_v21  ;;  %v5668_v38 = vsel %vm5597_vm2, 0, %v5573_v44 }
  0xda   : > { %v799_v29 = vand.u32 2147483647, %v798_v9  ;;  %vm1328_vm9 = vcmp.lt.s32.totalorder %v5547_v20, 2  ;;  %v448_v18 = vmul.f32 %v4613_v0, %v5557_v21  ;;  %v1186_v40 = vmul.u32 %v5553_v11, %v1170_v50 }
  0xdb   : > { %v1189_v35 = vadd.s32 1, %v5645_v34  ;;  %v1331_v33 = vsel %vm1329_vm1, %v5487_v15, %v1330_v43  ;;  %v455_v25 = vmul.f32 %v4700_v31, %v447_v8  ;;  %v1334_v44 = vsel %vm1332_vm4, %v1333_v19, %v5497_v51 }
  0xdc   : > { %v802_v24 = vmul.f32 %v801_v52, %v799_v29  ;;  %v456_v17 = vmul.f32 %v4701_v36, %v448_v18  ;;  %v1340_v0 = vand.u32 2139095040, %v5663_v56  ;;  %v1636_v11 = vadd.s32 3, %v5668_v38 }
  0xdd   : > { %2473 = vrot.lane.b32.xlu1 %v5379_v14, %s4808_s16  ;;  %vm1188_vm5 = vc.u32 %v5658_v2, %v5644_v47  ;;  %v1337_v43 = vand.u32 2147483647, %v5663_v56  ;;  %v1533_v50 = vand.u32 3, %v5491_v23  ;;  %v1335_v3 = vsel %vm1328_vm9, %v1331_v33, %v1334_v44 }
  0xde   : > { %v803_v28 = vxor.u32 2147483648, %v802_v24  ;;  %v1190_v15 = vsel %vm1188_vm5, %v1189_v35, %v5645_v34  ;;  %v461_v51 = vpack.c.bf16 %v456_v17, %v455_v25  ;;  %v1341_v19 = vshrl.u32 %v1340_v0, 23 }
  0xdf   : > { %v1191_v16 = vadd.s32 %v1190_v15, %v1186_v40  ;;  %vm1534_vm13 = vcmp.lt.s32.totalorder %v1533_v50, 2  ;;  %vm1535_vm8 = vcmp.eq.s32.totalorder %v1533_v50, 0  ;;  %vm1538_vm11 = vcmp.eq.s32.totalorder %v1533_v50, 2 }
  0xe0   : > { %v804_v22 = vsel %vm721_vm6, %v803_v28, %v802_v24  ;;  %4218 = vmatprep.mubr.msk.bf16.mxu1 %vm387_vm0, %v461_v51  ;;  %v4122_v9 = vadd.s32 4294967169, %v1341_v19  ;;  %v1537_v52 = vsel %vm1535_vm8, %v5605_v30, %v1536_v10  ;;  %v5702_v34 = vand.u32 3, %v1636_v11 }
  0xe1   : > { %v807_v23 = vsel %vm5597_vm2, %v5363_v45, %v804_v22  ;;  %2477 = vrot.lane.b32.xlu1 %v5544_v54, %s4808_s16  ;;  %v1192_v20 = vadd.s32 536870912, %v1191_v16  ;;  %v1540_v5 = vsel %vm1538_vm11, %v1539_v26, %v5608_v41  ;;  %v5711_v10 = vsel %vm1326_vm15, nan, %v1335_v3  ;;  %v4702_v41 = vld [vmem:[%s4940_s28 + $0x30] sm:$0xff] }
  0xe2   : > { %4620 = vcosq.f32 %v807_v23  ;;  %7335 = vst [vmem:[#allocation10_spill] sm:$0xff] %v5711_v10  ;;  %v1347_v7 = vadd.s32 1, %v4122_v9  ;;  %v449_v1 = vmul.f32 %v4619_v48, %v5557_v21  ;;  %v1541_v29 = vsel %vm1534_vm13, %v1537_v52, %v1540_v5  ;;  %v4703_v48 = vld [vmem:[%s4940_s28 + $0x38] sm:$0xff]  ;;  %s4810_s28 = smov 36  }
  0xe3   : > { %4622 = vsinq.f32 %v807_v23  ;;  %v5714_v8 = vshrl.u32 %v1192_v20, 30  ;;  %v450_v18 = vmul.f32 %v4617_v62, %v5557_v21  ;;  %v1344_v30 = vand.u32 8388607, %v1337_v43 }
  0xe4   : > { %vm1348_vm6 = vcmp.gt.s32.totalorder %v1347_v7, 0  ;;  %v457_v26 = vmul.f32 %v4702_v41, %v449_v1  ;;  %v5727_v31 = vsel %vm1532_vm7, nan, %v1541_v29  ;;  %vm1642_vm15 = vcmp.eq.s32.totalorder %v5702_v34, 2 }
  0xe5   : > { %v1194_v27 = vshll.u32 %v5714_v8, 30  ;;  %2481 = vrot.lane.b32.xlu1 %v5711_v10, %s4808_s16  ;;  %v1349_v40 = vsel %vm1348_vm6, %v1347_v7, 0  ;;  %v458_v35 = vmul.f32 %v4703_v48, %v450_v18  ;;  %7336 = vst [vmem:[#allocation11_spill] sm:$0xff] %v5727_v31  ;;  %vm1639_vm12 = vcmp.eq.s32.totalorder %v5702_v34, 0 }
  0xe6   : > { %v1351_v33 = vand.u32 31, %v1349_v40  ;;  %v1345_v25 = vor.u32 8388608, %v1344_v30  ;;  %vm1638_vm3 = vcmp.lt.s32.totalorder %v5702_v34, 2  ;;  %v5737_v49 = vshrl.u32 %v1349_v40, 5 }
  0xe7   : > { %v5730_v21 = vsub.s32 %v1191_v16, %v1194_v27  ;;  %v462_v62 = vpack.c.bf16 %v458_v35, %v457_v26  ;;  %v5744_v11 = vand.u32 3, %v5668_v38  ;;  %vm811_vm7 = vweird.f32 %v5363_v45 }
  0xe8   : > { %v1352_v24 = vsub.s32 32, %v1351_v33  ;;  %v1354_v44 = vshll.u32 %v4802_v53, %v1351_v33  ;;  %v1357_v36 = vshll.u32 %v4803_v55, %v1351_v33  ;;  %v1360_v0 = vshll.u32 %v4804_v57, %v1351_v33 }
  0xe9   : > { %v1197_v17 = vsub.s32 0, %v5730_v21  ;;  %2485 = vrot.lane.b32.xlu1 %v5727_v31, %s4808_s16  ;;  %4219 = vmatmul.mubr.msk.bf16.vlgmr.msra.gmra.mxu1 %vm387_vm0, %v462_v62  ;;  %v1363_v51 = vshll.u32 %v4805_v59, %v1351_v33  ;;  %v1366_v22 = vshll.u32 %v4806_v61, %v1351_v33  ;;  %v1187_v38 = vadd.s32 %v5644_v47, %v5658_v2 }
  0xea   : > { %v1355_v50 = vshrl.u32 %v4803_v55, %v1352_v24  ;;  %v1358_v28 = vshrl.u32 %v4804_v57, %v1352_v24  ;;  %v1361_v15 = vshrl.u32 %v4805_v59, %v1352_v24  ;;  %v1353_v16 = vshrl.u32 %v4802_v53, %v1352_v24 }
  0xeb   : > { %v4115_v19 = vmin.u32 %v1197_v17, %v5730_v21  ;;  %v1364_v3 = vshrl.u32 %v4806_v61, %v1352_v24  ;;  %v1367_v55 = vshrl.u32 %v4807_v6, %v1352_v24  ;;  %v5758_v20 = vshll.u32 %v1345_v25, 8 }
  0xec   : > { %v1356_v9 = vor.u32 %v1355_v50, %v1354_v44  ;;  %v1359_v52 = vor.u32 %v1358_v28, %v1357_v36  ;;  %v1362_v23 = vor.u32 %v1361_v15, %v1360_v0  ;;  %vm814_vm14 = vcmp.eq.s32.totalorder %v5744_v11, 0 }
  0xed   : > { %v1199_v57 = vclz %v4115_v19  ;;  %2571 = vrot.lane.b32.xlu1 %v5379_v14, %s4809_s27  ;;  %v1365_v53 = vor.u32 %v1364_v3, %v1363_v51  ;;  %v1368_v59 = vor.u32 %v1367_v55, %v1366_v22  ;;  %vm1369_vm1 = vcmp.lt.s32.totalorder %v5737_v49, 1 }
  0xee   : > { %vm1370_vm2 = vcmp.lt.s32.totalorder %v5737_v49, 2  ;;  %vm813_vm4 = vcmp.lt.s32.totalorder %v5744_v11, 2  ;;  %vm1371_vm9 = vcmp.lt.s32.totalorder %v5737_v49, 3  ;;  %vm1372_vm5 = vcmp.lt.s32.totalorder %v5737_v49, 4 }
  0xef   : > { %v4621_v61 = vpop.eup %4620  ;;  %v4116_v6 = vadd.s32 4294967294, %v1199_v57  ;;  %v1373_v47 = vsel %vm1369_vm1, %v1353_v16, %v1356_v9  ;;  %v1374_v7 = vsel %vm1372_vm5, %v1362_v23, 2102212464  ;;  %v1377_v1 = vsel %vm1369_vm1, %v1356_v9, %v1359_v52 }
  0xf0   : > { %v4623_v2 = vpop.eup %4622  ;;  %v818_v5 = vxor.u32 2147483648, %v4621_v61  ;;  %v1378_v29 = vsel %vm1372_vm5, %v1365_v53, 920167782  ;;  %v1375_v30 = vsel %vm1371_vm9, %v1359_v52, %v1374_v7  ;;  %vm817_vm8 = vcmp.eq.s32.totalorder %v5744_v11, 2 }
  0xf1   : > { %v815_v18 = vxor.u32 2147483648, %v4623_v2  ;;  %vm4117_vm13 = vcmp.lt.s32.totalorder %v4116_v6, 0  ;;  %v1379_v41 = vsel %vm1371_vm9, %v1362_v23, %v1378_v29  ;;  %2575 = vrot.lane.b32.xlu1 %v5544_v54, %s4809_s27  ;;  %v1376_v24 = vsel %vm1370_vm2, %v1373_v47, %v1375_v30 }
  0xf2   : > { %v1644_v26 = vsel %vm1642_vm15, %v818_v5, %v4623_v2  ;;  %v1202_v27 = vsel %vm4117_vm13, 0, %v4116_v6  ;;  %v1380_v40 = vsel %vm1370_vm2, %v1377_v1, %v1379_v41  ;;  %v1381_v44 = vsel %vm1369_vm1, %v1359_v52, %v1362_v23 }
  0xf3   : > { %v1641_v48 = vsel %vm1639_vm12, %v4621_v61, %v815_v18  ;;  %v1203_v35 = vsub.s32 32, %v1202_v27  ;;  %v1204_v33 = vshll.u32 %v5730_v21, %v1202_v27  ;;  %v1207_v62 = vsub.s32 4294967266, %v1202_v27 }
  0xf4   : > { %v1645_v25 = vsel %vm1638_vm3, %v1641_v48, %v1644_v26  ;;  %v1382_v36 = vsel %vm1372_vm5, %v1368_v59, 1326507024  ;;  %v5811_v28 = vmul.u32.u64.low %v5758_v20, %v1380_v40  ;;  %v5812_v15 = vmul.u32.u64.high %v5758_v20, %v1380_v40, %v5811_v28 }
  0xf5   : > { %v5800_v17 = vsel %vm811_vm7, nan, %v1645_v25  ;;  %v1205_v0 = vshrl.u32 %v1187_v38, %v1203_v35  ;;  %v1208_v50 = vadd.s32 127, %v1207_v62  ;;  %v1383_v21 = vsel %vm1371_vm9, %v1365_v53, %v1382_v36  ;;  %2579 = vrot.lane.b32.xlu1 %v5711_v10, %s4809_s27 }
  0xf6   : > { %2391 = vrot.lane.b32.xlu0 %v5800_v17, %s4808_s16  ;;  %v1384_v34 = vsel %vm1370_vm2, %v1381_v44, %v1383_v21  ;;  %v816_v51 = vsel %vm814_vm14, %v4621_v61, %v815_v18  ;;  %v819_v38 = vsel %vm817_vm8, %v818_v5, %v4623_v2  ;;  %v1392_v49 = vmul.u32 %v5758_v20, %v1376_v24 }
  0xf7   : > { %v1206_v19 = vor.u32 %v1205_v0, %v1204_v33  ;;  %v1209_v16 = vshll.u32 %v1208_v50, 23  ;;  %v5817_v3 = vmul.u32.u64.low %v5758_v20, %v1384_v34  ;;  %v5818_v22 = vmul.u32.u64.high %v5758_v20, %v1384_v34, %v5817_v3 }
  0xf8   : > { %v820_v55 = vsel %vm813_vm4, %v816_v51, %v819_v38  ;;  %v1395_v57 = vadd.s32 1, %v5812_v15  ;;  %vm1133_vm6 = vcmp.lt.s32.totalorder %v5438_v32, 0  ;;  %v1217_v11 = vsub.s32 4, %v5714_v8 }
  0xf9   : > { %v1210_v9 = vor.u32 4788187, %v1209_v16  ;;  %v1213_v52 = vcvt.s32.f32 %v1206_v19  ;;  %2583 = vrot.lane.b32.xlu1 %v5727_v31, %s4809_s27  ;;  %v5830_v23 = vsel %vm811_vm7, nan, %v820_v55  ;;  %vm1394_vm11 = vc.u32 %v5818_v22, %v5811_v28 }
  0xfa   : > { %7337 = vst [vmem:[#allocation12_spill] sm:$0xff] %v5830_v23  ;;  %v1396_v59 = vsel %vm1394_vm11, %v1395_v57, %v5812_v15  ;;  %vm1132_vm15 = vcmp.le.f32.partialorder %v1131_v12, 0.7853982  ;;  %v1218_v5 = vsel %vm1133_vm6, %v1217_v11, %v5714_v8  ;;  %v1393_v40 = vadd.s32 %v5811_v28, %v5818_v22 }
  0xfb   : > { %v1211_v53 = vand.u32 2147483647, %v1210_v9  ;;  %v1397_v6 = vadd.s32 %v1396_v59, %v1392_v49  ;;  %v5844_v29 = vsel %vm1132_vm15, 0, %v1218_v5  ;;  %vm1223_vm1 = vweird.f32 %v5438_v32 }
  0xfc   : > { %v2052_v30 = vadd.s32 3, %v5844_v29  ;;  %vm1339_vm2 = vcmp.lt.s32.totalorder %v5663_v56, 0  ;;  %vm1338_vm4 = vcmp.le.f32.partialorder %v1337_v43, 0.7853982  ;;  %v1018_v59 = vand.u32 3, %v5202_v42 }
  0xfd   : > { %v1214_v61 = vmul.f32 %v1213_v52, %v1211_v53  ;;  %2603 = vrot.lane.b32.xlu1 %v5281_v46, %s4810_s28  ;;  %v1398_v20 = vadd.s32 536870912, %v1397_v6 }
  0xfe   : > { %v2053_v8 = vand.u32 3, %v2052_v30  ;;  %vm1020_vm9 = vcmp.eq.s32.totalorder %v1018_v59, 0  ;;  %vm1023_vm5 = vcmp.eq.s32.totalorder %v1018_v59, 2  ;;  %vm1019_vm13 = vcmp.lt.s32.totalorder %v1018_v59, 2  ;;  %v5908_v30 = vpop.permute.xlu1 %2393 }
  0xff   : > { %v1215_v45 = vxor.u32 2147483648, %v1214_v61  ;;  %v1399_v2 = vshrl.u32 %v1398_v20, 30 }
 0x100   : > { %vm2055_vm3 = vcmp.eq.s32.totalorder %v2053_v8, 0  ;;  %vm2058_vm7 = vcmp.eq.s32.totalorder %v2053_v8, 2  ;;  %vm2054_vm14 = vcmp.lt.s32.totalorder %v2053_v8, 2 }
 0x101   : > { %v1216_v47 = vsel %vm1133_vm6, %v1215_v45, %v1214_v61  ;;  %2607 = vrot.lane.b32.xlu1 %v5405_v39, %s4810_s28  ;;  %v1400_v1 = vshll.u32 %v1399_v2, 30  ;;  %v1423_v9 = vsub.s32 4, %v1399_v2  ;;  %v7339_v45 = vxor.u32 2147483648, %v5296_v60 }
 0x102   : > { %v1219_v7 = vsel %vm1132_vm15, %v5438_v32, %v1216_v47  ;;  %vm1429_vm15 = vweird.f32 %v5663_v56  ;;  %v5928_v8 = vpop.permute.xlu1 %2395 }
 0x103   : > { %4624 = vcosq.f32 %v1219_v7  ;;  %v1401_v18 = vsub.s32 %v1397_v6, %v1400_v1  ;;  %v1424_v55 = vsel %vm1339_vm2, %v1423_v9, %v1399_v2  ;;  %v7338_v6 = vxor.u32 2147483648, %v5301_v63 }
 0x104   : > { %4626 = vsinq.f32 %v1219_v7  ;;  %v1426_v53 = vsel %vm1338_vm4, 0, %v1424_v55  ;;  %v1025_v20 = vsel %vm1023_vm5, %v7339_v45, %v5301_v63  ;;  %v1224_v63 = vand.u32 3, %v5844_v29 }
 0x105   : > { %2611 = vrot.lane.b32.xlu1 %v5521_v37, %s4810_s28  ;;  %v1403_v12 = vsub.s32 0, %v1401_v18  ;;  %v2260_v43 = vadd.s32 3, %v1426_v53  ;;  %v1022_v11 = vsel %vm1020_vm9, %v5296_v60, %v7338_v6  ;;  %v1430_v13 = vand.u32 3, %v1426_v53 }
 0x106   : > { %v1026_v42 = vsel %vm1019_vm13, %v1022_v11, %v1025_v20  ;;  %vm2560_vm9 = vcmask 64512   ;;  %vm3884_vm5 = vcmask 519168   ;;  %vm3843_vm13 = vcmask 257024  }
 0x107   : > { %v4123_v41 = vmin.u32 %v1403_v12, %v1401_v18  ;;  %v2261_v61 = vand.u32 3, %v2260_v43  ;;  %v5902_v1 = vsel %vm1017_vm10, nan, %v1026_v42  ;;  %vm1226_vm10 = vcmp.eq.s32.totalorder %v1224_v63, 0 }
 0x108   : > { %7340 = vst [vmem:[#allocation13_spill] sm:$0xff] %v5902_v1 }
 0x109   : > { %2615 = vrot.lane.b32.xlu1 %v5650_v4, %s4810_s28  ;;  %v1405_v26 = vclz %v4123_v41  ;;  %vm2266_vm8 = vcmp.eq.s32.totalorder %v2261_v61, 2  ;;  %vm2263_vm11 = vcmp.eq.s32.totalorder %v2261_v61, 0  ;;  %vm2262_vm6 = vcmp.lt.s32.totalorder %v2261_v61, 2 }
 0x10b   : > { %v4124_v27 = vadd.s32 4294967294, %v1405_v26 }
 0x10d   : > { %2675 = vrot.lane.b32.xlu1 %v5379_v14, %s4810_s28  ;;  %vm4125_vm12 = vcmp.lt.s32.totalorder %v4124_v27, 0 }
 0x10e   : > { %v1408_v35 = vsel %vm4125_vm12, 0, %v4124_v27  ;;  %vm1229_vm12 = vcmp.eq.s32.totalorder %v1224_v63, 2 }
 0x10f   : > { %v1409_v25 = vsub.s32 32, %v1408_v35  ;;  %v1410_v24 = vshll.u32 %v1401_v18, %v1408_v35  ;;  %v1413_v44 = vsub.s32 4294967266, %v1408_v35 }
 0x110   : > { %v5854_v48 = vpop.eup %4624 }
 0x111   : > { %v5856_v33 = vpop.eup %4626  ;;  %v1230_v62 = vxor.u32 2147483648, %v5854_v48  ;;  %2679 = vrot.lane.b32.xlu1 %v5544_v54, %s4810_s28  ;;  %v1411_v50 = vshrl.u32 %v1393_v40, %v1409_v25  ;;  %v1414_v21 = vadd.s32 127, %v1413_v44 }
 0x112   : > { %v1227_v36 = vxor.u32 2147483648, %v5856_v33 }
 0x113   : > { %v2060_v0 = vsel %vm2058_vm7, %v1230_v62, %v5856_v33  ;;  %v1412_v15 = vor.u32 %v1411_v50, %v1410_v24  ;;  %v1415_v51 = vshll.u32 %v1414_v21, 23  ;;  %v1231_v26 = vsel %vm1229_vm12, %v1230_v62, %v5856_v33 }
 0x114   : > { %v2057_v34 = vsel %vm2055_vm3, %v5854_v48, %v1227_v36  ;;  %vm1225_vm3 = vcmp.lt.s32.totalorder %v1224_v63, 2  ;;  %v1228_v29 = vsel %vm1226_vm10, %v5854_v48, %v1227_v36  ;;  %vm1432_vm7 = vcmp.eq.s32.totalorder %v1430_v13, 0  ;;  %v5938_v62 = vpop.permute.xlu1 %2397 }
 0x115   : > { %v2061_v28 = vsel %vm2054_vm14, %v2057_v34, %v2060_v0  ;;  %2683 = vrot.lane.b32.xlu1 %v5711_v10, %s4810_s28  ;;  %v1416_v16 = vor.u32 4788187, %v1415_v51  ;;  %v1419_v3 = vcvt.s32.f32 %v1412_v15  ;;  %vm1435_vm14 = vcmp.eq.s32.totalorder %v1430_v13, 2 }
 0x116   : > { %v5873_v19 = vsel %vm1223_vm1, nan, %v2061_v28  ;;  %v1232_v27 = vsel %vm1225_vm3, %v1228_v29, %v1231_v26 }
 0x117   : > { %2399 = vrot.lane.b32.xlu0 %v5873_v19, %s4808_s16  ;;  %v1417_v22 = vand.u32 2147483647, %v1416_v16  ;;  %v5936_v48 = vsel %vm1223_vm1, nan, %v1232_v27  ;;  %vm565_vm1 = vcmask 130048  }
 0x118   : > { %7341 = vst [vmem:[#allocation14_spill] sm:$0xff] %v5936_v48 }
 0x119   : > { %2687 = vrot.lane.b32.xlu1 %v5727_v31, %s4810_s28  ;;  %v1420_v38 = vmul.f32 %v1419_v3, %v1417_v22 }
 0x11b   : > { %v1421_v52 = vxor.u32 2147483648, %v1420_v38 }
 0x11d   : > { %2707 = vrot.lane.b32.xlu1 %v5281_v46, %s4809_s27  ;;  %v1422_v49 = vsel %vm1339_vm2, %v1421_v52, %v1420_v38  ;;  %vm1431_vm2 = vcmp.lt.s32.totalorder %v1430_v13, 2 }
 0x11e   : > { %v1425_v57 = vsel %vm1338_vm4, %v5663_v56, %v1422_v49  ;;  %vm2551_vm4 = vcmask 31744  }
 0x11f   : > { %4628 = vcosq.f32 %v1425_v57 }
 0x120   : > { %4630 = vsinq.f32 %v1425_v57 }
 0x121   : > { %2711 = vrot.lane.b32.xlu1 %v5405_v39, %s4809_s27 }
 0x125   : > { %2715 = vrot.lane.b32.xlu1 %v5521_v37, %s4809_s27 }
 0x129   : > { %2719 = vrot.lane.b32.xlu1 %v5650_v4, %s4809_s27 }
 0x12c   : > { %v4629_v47 = vpop.eup %4628 }
 0x12d   : > { %3053 = vrot.lane.b32.xlu1 %v5379_v14, %s4811_s30  ;;  %v4631_v2 = vpop.eup %4630  ;;  %v1436_v5 = vxor.u32 2147483648, %v4629_v47  ;;  %v5952_v32 = vpop.permute.xlu1 %2401 }
 0x12e   : > { %v1433_v7 = vxor.u32 2147483648, %v4631_v2 }
 0x12f   : > { %v2268_v60 = vsel %vm2266_vm8, %v1436_v5, %v4631_v2  ;;  %v1437_v35 = vsel %vm1435_vm14, %v1436_v5, %v4631_v2 }
 0x130   : > { %v2265_v18 = vsel %vm2263_vm11, %v4629_v47, %v1433_v7  ;;  %v1434_v40 = vsel %vm1432_vm7, %v4629_v47, %v1433_v7 }
 0x131   : > { %3055 = vrot.lane.b32.xlu1 %v5902_v1, %s4811_s30  ;;  %v2269_v12 = vsel %vm2262_vm6, %v2265_v18, %v2268_v60  ;;  %v1438_v33 = vsel %vm1431_vm2, %v1434_v40, %v1437_v35 }
 0x132   : > { %v5912_v41 = vsel %vm1429_vm15, nan, %v2269_v12  ;;  %v5946_v25 = vsel %vm1429_vm15, nan, %v1438_v33 }
 0x133   : > { %2403 = vrot.lane.b32.xlu0 %v5912_v41, %s4808_s16  ;;  %7342 = vst [vmem:[#allocation15_spill] sm:$0xff] %v5946_v25 }
 0x135   : > { %3057 = vrot.lane.b32.xlu1 %v5544_v54, %s4811_s30 }
 0x137   : > { %2471 = vrot.lane.b32.xlu0 %v5830_v23, %s4808_s16 }
 0x139   : > { %3061 = vrot.lane.b32.xlu1 %v5711_v10, %s4811_s30 }
 0x13b   : > { %2475 = vrot.lane.b32.xlu0 %v5902_v1, %s4808_s16 }
 0x13d   : > { %3065 = vrot.lane.b32.xlu1 %v5727_v31, %s4811_s30 }
 0x13f   : > { %2479 = vrot.lane.b32.xlu0 %v5936_v48, %s4808_s16 }
 0x141   : > { %3085 = vrot.lane.b32.xlu1 %v5281_v46, %s4812_s8 }
 0x143   : > { %2483 = vrot.lane.b32.xlu0 %v5946_v25, %s4808_s16 }
 0x145   : > { %3089 = vrot.lane.b32.xlu1 %v5405_v39, %s4812_s8 }
 0x147   : > { %2569 = vrot.lane.b32.xlu0 %v5830_v23, %s4809_s27 }
 0x149   : > { %3093 = vrot.lane.b32.xlu1 %v5521_v37, %s4812_s8 }
 0x14b   : > { %v5958_v24 = vpop.permute.xlu1 %2405  ;;  %2573 = vrot.lane.b32.xlu0 %v5902_v1, %s4809_s27 }
 0x14d   : > { %3097 = vrot.lane.b32.xlu1 %v5650_v4, %s4812_s8 }
 0x14f   : > { %v5964_v56 = vpop.permute.xlu1 %2473  ;;  %2577 = vrot.lane.b32.xlu0 %v5936_v48, %s4809_s27 }
 0x150   : > { %7343 = vst [vmem:[#allocation16_spill] sm:$0xff] %v5964_v56 }
 0x151   : > { %3157 = vrot.lane.b32.xlu1 %v5379_v14, %s4812_s8 }
 0x153   : > { %v5970_v44 = vpop.permute.xlu1 %2477  ;;  %2581 = vrot.lane.b32.xlu0 %v5946_v25, %s4809_s27 }
 0x154   : > { %7344 = vst [vmem:[#allocation17_spill] sm:$0xff] %v5970_v44 }
 0x155   : > { %3161 = vrot.lane.b32.xlu1 %v5544_v54, %s4812_s8 }
 0x157   : > { %v5976_v36 = vpop.permute.xlu1 %2481  ;;  %2601 = vrot.lane.b32.xlu0 %v5800_v17, %s4810_s28 }
 0x158   : > { %7345 = vst [vmem:[#allocation18_spill] sm:$0xff] %v5976_v36 }
 0x159   : > { %3165 = vrot.lane.b32.xlu1 %v5711_v10, %s4812_s8 }
 0x15b   : > { %v5982_v0 = vpop.permute.xlu1 %2485  ;;  %2605 = vrot.lane.b32.xlu0 %v5327_v58, %s4810_s28 }
 0x15c   : > { %7346 = vst [vmem:[#allocation19_spill] sm:$0xff] %v5982_v0 }
 0x15d   : > { %3169 = vrot.lane.b32.xlu1 %v5727_v31, %s4812_s8 }
 0x15f   : > { %v5988_v50 = vpop.permute.xlu1 %2571  ;;  %2609 = vrot.lane.b32.xlu0 %v5873_v19, %s4810_s28 }
 0x160   : > { %7347 = vst [vmem:[#allocation20_spill] sm:$0xff] %v5988_v50 }
 0x161   : > { %3189 = vrot.lane.b32.xlu1 %v5281_v46, %s4811_s30 }
 0x163   : > { %v5994_v21 = vpop.permute.xlu1 %2575  ;;  %2613 = vrot.lane.b32.xlu0 %v5912_v41, %s4810_s28 }
 0x164   : > { %7348 = vst [vmem:[#allocation21_spill] sm:$0xff] %v5994_v21 }
 0x165   : > { %3193 = vrot.lane.b32.xlu1 %v5405_v39, %s4811_s30 }
 0x167   : > { %v6000_v34 = vpop.permute.xlu1 %2579  ;;  %2673 = vrot.lane.b32.xlu0 %v5830_v23, %s4810_s28 }
 0x168   : > { %7349 = vst [vmem:[#allocation22_spill] sm:$0xff] %v6000_v34  ;;  %v6078_v53 = vpop.permute.xlu0 %2391 }
 0x169   : > { %3197 = vrot.lane.b32.xlu1 %v5521_v37, %s4811_s30 }
 0x16b   : > { %v6006_v28 = vpop.permute.xlu1 %2583  ;;  %2677 = vrot.lane.b32.xlu0 %v5902_v1, %s4810_s28 }
 0x16c   : > { %7350 = vst [vmem:[#allocation23_spill] sm:$0xff] %v6006_v28 }
 0x16d   : > { %3201 = vrot.lane.b32.xlu1 %v5650_v4, %s4811_s30 }
 0x16f   : > { %v6012_v15 = vpop.permute.xlu1 %2603  ;;  %2681 = vrot.lane.b32.xlu0 %v5936_v48, %s4810_s28 }
 0x170   : > { %7351 = vst [vmem:[#allocation24_spill] sm:$0xff] %v6012_v15 }
 0x171   : > { %3403 = vrot.lane.b32.xlu1 %v5800_v17, %s4813_s11 }
 0x173   : > { %v6018_v51 = vpop.permute.xlu1 %2607  ;;  %2685 = vrot.lane.b32.xlu0 %v5946_v25, %s4810_s28 }
 0x174   : > { %7352 = vst [vmem:[#allocation25_spill] sm:$0xff] %v6018_v51 }
 0x175   : > { %3407 = vrot.lane.b32.xlu1 %v5327_v58, %s4813_s11 }
 0x177   : > { %v6024_v16 = vpop.permute.xlu1 %2611  ;;  %2705 = vrot.lane.b32.xlu0 %v5800_v17, %s4809_s27 }
 0x178   : > { %7353 = vst [vmem:[#allocation26_spill] sm:$0xff] %v6024_v16 }
 0x179   : > { %3411 = vrot.lane.b32.xlu1 %v5873_v19, %s4813_s11 }
 0x17b   : > { %v6030_v3 = vpop.permute.xlu1 %2615  ;;  %2709 = vrot.lane.b32.xlu0 %v5327_v58, %s4809_s27 }
 0x17c   : > { %7354 = vst [vmem:[#allocation27_spill] sm:$0xff] %v6030_v3 }
 0x17d   : > { %3415 = vrot.lane.b32.xlu1 %v5912_v41, %s4813_s11 }
 0x17f   : > { %v6036_v22 = vpop.permute.xlu1 %2675  ;;  %2713 = vrot.lane.b32.xlu0 %v5873_v19, %s4809_s27 }
 0x180   : > { %7355 = vst [vmem:[#allocation28_spill] sm:$0xff] %v6036_v22 }
 0x181   : > { %3507 = vrot.lane.b32.xlu1 %v5800_v17, %s4814_s12 }
 0x183   : > { %v6042_v38 = vpop.permute.xlu1 %2679  ;;  %2717 = vrot.lane.b32.xlu0 %v5912_v41, %s4809_s27  ;;  %s332_s27 = sand.u32 1, %s4783_s22  }
 0x184   : > { %7356 = vst [vmem:[#allocation29_spill] sm:$0xff] %v6042_v38  ;;  %s4084_s28 = sshll.u32 %s332_s27, 5 }
 0x185   : > { %3511 = vrot.lane.b32.xlu1 %v5327_v58, %s4814_s12 }
 0x187   : > { %v6048_v9 = vpop.permute.xlu1 %2683  ;;  %3051 = vrot.lane.b32.xlu0 %v5830_v23, %s4811_s30 }
 0x188   : > { %7357 = vst [vmem:[#allocation30_spill] sm:$0xff] %v6048_v9 }
 0x189   : > { %3515 = vrot.lane.b32.xlu1 %v5873_v19, %s4814_s12  ;;  %v6092_v6 = vpop.permute.xlu0 %2399 }
 0x18b   : > { %v6054_v52 = vpop.permute.xlu1 %2687  ;;  %3059 = vrot.lane.b32.xlu0 %v5936_v48, %s4811_s30 }
 0x18c   : > { %7358 = vst [vmem:[#allocation31_spill] sm:$0xff] %v6054_v52 }
 0x18d   : > { %3519 = vrot.lane.b32.xlu1 %v5912_v41, %s4814_s12 }
 0x18f   : > { %v6060_v49 = vpop.permute.xlu1 %2707  ;;  %3063 = vrot.lane.b32.xlu0 %v5946_v25, %s4811_s30 }
 0x190   : > { %7359 = vst [vmem:[#allocation32_spill] sm:$0xff] %v6060_v49 }
 0x191   : > { %3373 = vrot.lane.b32.xlu1 %v5379_v14, %s4814_s12 }
 0x193   : > { %v6066_v55 = vpop.permute.xlu1 %2711  ;;  %3083 = vrot.lane.b32.xlu0 %v5800_v17, %s4812_s8 }
 0x194   : > { %7360 = vst [vmem:[#allocation33_spill] sm:$0xff] %v6066_v55 }
 0x195   : > { %3377 = vrot.lane.b32.xlu1 %v5544_v54, %s4814_s12 }
 0x197   : > { %v6072_v57 = vpop.permute.xlu1 %2715  ;;  %3087 = vrot.lane.b32.xlu0 %v5327_v58, %s4812_s8  ;;  %v6086_v43 = vpop.f32.mrf.mxu0 }
 0x198   : > { %7361 = vst [vmem:[#allocation34_spill] sm:$0xff] %v6072_v57  ;;  %v6098_v11 = vmul.f32 %v6086_v43, %v6086_v43 }
 0x199   : > { %3381 = vrot.lane.b32.xlu1 %v5711_v10, %s4814_s12  ;;  %v6102_v20 = vpop.f32.mrf.mxu0 }
 0x19b   : > { %v6080_v59 = vpop.permute.xlu1 %2719  ;;  %3091 = vrot.lane.b32.xlu0 %v5873_v19, %s4812_s8  ;;  %v6112_v2 = vpop.f32.mrf.mxu0 }
 0x19c   : > { %7362 = vst [vmem:[#allocation35_spill] sm:$0xff] %v6080_v59  ;;  %v560_v63 = vmul.f32 %v6112_v2, %v6112_v2 }
 0x19d   : > { %3385 = vrot.lane.b32.xlu1 %v5727_v31, %s4814_s12 }
 0x19f   : > { %v6088_v61 = vpop.permute.xlu1 %3053  ;;  %3095 = vrot.lane.b32.xlu0 %v5912_v41, %s4812_s8 }
 0x1a0   : > { %7363 = vst [vmem:[#allocation36_spill] sm:$0xff] %v6088_v61 }
 0x1a1   : > { %3477 = vrot.lane.b32.xlu1 %v5379_v14, %s4813_s11 }
 0x1a3   : > { %v6100_v45 = vpop.permute.xlu1 %3055  ;;  %3155 = vrot.lane.b32.xlu0 %v5830_v23, %s4812_s8 }
 0x1a4   : > { %7364 = vst [vmem:[#allocation37_spill] sm:$0xff] %v6100_v45 }
 0x1a5   : > { %635 = vrot.lane.b32.xlu1 %v6098_v11, %s4815_s13  ;;  %v6108_v42 = vpop.permute.xlu0 %2403 }
 0x1a7   : > { %v6110_v47 = vpop.permute.xlu1 %3057  ;;  %3159 = vrot.lane.b32.xlu0 %v5902_v1, %s4812_s8 }
 0x1a8   : > { %7365 = vst [vmem:[#allocation38_spill] sm:$0xff] %v6110_v47  ;;  %v575_v47 = vsel %vm565_vm1, %v560_v63, 0.0 }
 0x1a9   : > { %2975 = vrot.lane.b32.xlu1 %v6098_v11, %s4816_s14  ;;  %v6118_v5 = vpop.f32.mrf.mxu1  ;;  %v6120_v7 = vpop.permute.xlu0 %2471 }
 0x1aa   : > { %7366 = vst [vmem:[#allocation39_spill] sm:$0xff] %v6120_v7 }
 0x1ab   : > { %v6122_v60 = vpop.permute.xlu1 %3061  ;;  %v6126_v18 = vpop.f32.mrf.mxu1  ;;  %3163 = vrot.lane.b32.xlu0 %v5936_v48, %s4812_s8 }
 0x1ac   : > { %7367 = vst [vmem:[#allocation40_spill] sm:$0xff] %v6122_v60 }
 0x1ad   : > { %637 = vrot.lane.b32.xlu1 %v560_v63, %s4815_s13  ;;  %v6131_v12 = vpop.f32.mrf.mxu1  ;;  %v6133_v13 = vpop.permute.xlu0 %2475 }
 0x1ae   : > { %7368 = vst [vmem:[#allocation41_spill] sm:$0xff] %v6133_v13  ;;  %v564_v26 = vmul.f32 %v6131_v12, %v6131_v12 }
 0x1af   : > { %v6135_v29 = vpop.permute.xlu1 %3065  ;;  %3167 = vrot.lane.b32.xlu0 %v5946_v25, %s4812_s8 }
 0x1b0   : > { %7369 = vst [vmem:[#allocation42_spill] sm:$0xff] %v6135_v29  ;;  %v587_v52 = vsel %vm565_vm1, %v564_v26, 0.0 }
 0x1b1   : > { %645 = vrot.lane.b32.xlu1 %v564_v26, %s4815_s13  ;;  %v6142_v27 = vpop.permute.xlu0 %2479 }
 0x1b2   : > { %7370 = vst [vmem:[#allocation43_spill] sm:$0xff] %v6142_v27 }
 0x1b3   : > { %v6144_v40 = vpop.permute.xlu1 %3085  ;;  %3187 = vrot.lane.b32.xlu0 %v5800_v17, %s4811_s30 }
 0x1b4   : > { %7371 = vst [vmem:[#allocation44_spill] sm:$0xff] %v6144_v40 }
 0x1b5   : > { %2896 = vrot.lane.b32.xlu1 %v560_v63, %s4817_s15  ;;  %v6149_v35 = vpop.permute.xlu0 %2483 }
 0x1b6   : > { %7372 = vst [vmem:[#allocation45_spill] sm:$0xff] %v6149_v35 }
 0x1b7   : > { %v6151_v33 = vpop.permute.xlu1 %3089  ;;  %3191 = vrot.lane.b32.xlu0 %v5327_v58, %s4811_s30 }
 0x1b8   : > { %7373 = vst [vmem:[#allocation46_spill] sm:$0xff] %v6151_v33 }
 0x1b9   : > { %2904 = vrot.lane.b32.xlu1 %v564_v26, %s4817_s15  ;;  %v6156_v7 = vpop.permute.xlu0 %2569 }
 0x1ba   : > { %7374 = vst [vmem:[#allocation47_spill] sm:$0xff] %v6156_v7 }
 0x1bb   : > { %v6158_v27 = vpop.permute.xlu1 %3093  ;;  %3195 = vrot.lane.b32.xlu0 %v5873_v19, %s4811_s30 }
 0x1bc   : > { %7375 = vst [vmem:[#allocation48_spill] sm:$0xff] %v6158_v27 }
 0x1bd   : > { %2977 = vrot.lane.b32.xlu1 %v560_v63, %s4816_s14  ;;  %v6163_v36 = vpop.permute.xlu0 %2573 }
 0x1be   : > { %7376 = vst [vmem:[#allocation49_spill] sm:$0xff] %v6163_v36  ;;  %v6261_v36 = vpop.f32.mrf.mxu1 }
 0x1bf   : > { %v6165_v56 = vpop.permute.xlu1 %3097  ;;  %3199 = vrot.lane.b32.xlu0 %v5912_v41, %s4811_s30  ;;  %s7109_s30 = scalar_lea.vmem [#allocation5], %s4084_s28  ;;  %s4819_s28 = smov [#allocation5]  }
 0x1c0   : > { %7377 = vst [vmem:[#allocation50_spill] sm:$0xff] %v6165_v56 }
 0x1c1   : > { %2985 = vrot.lane.b32.xlu1 %v564_v26, %s4816_s14  ;;  %v6170_v14 = vpop.permute.xlu0 %2577 }
 0x1c2   : > { %7378 = vst [vmem:[#allocation51_spill] sm:$0xff] %v6170_v14 }
 0x1c3   : > { %v6172_v35 = vpop.permute.xlu1 %3157  ;;  %3405 = vrot.lane.b32.xlu0 %v5281_v46, %s4813_s11 }
 0x1c4   : > { %7379 = vst [vmem:[#allocation52_spill] sm:$0xff] %v6172_v35 }
 0x1c5   : > { %v6176_v0 = vpop.permute.xlu0 %2581 }
 0x1c6   : > { %7380 = vst [vmem:[#allocation53_spill] sm:$0xff] %v6176_v0 }
 0x1c7   : > { %v6178_v13 = vpop.permute.xlu1 %3161  ;;  %3409 = vrot.lane.b32.xlu0 %v5405_v39, %s4813_s11 }
 0x1c8   : > { %7381 = vst [vmem:[#allocation54_spill] sm:$0xff] %v6178_v13 }
 0x1c9   : > { %v6182_v44 = vpop.permute.xlu0 %2601 }
 0x1cb   : > { %v6184_v60 = vpop.permute.xlu1 %3165  ;;  %3413 = vrot.lane.b32.xlu0 %v5521_v37, %s4813_s11 }
 0x1cc   : > { %7382 = vst [vmem:[#allocation55_spill] sm:$0xff] %v6184_v60 }
 0x1cd   : > { %v6188_v61 = vpop.permute.xlu0 %2605 }
 0x1cf   : > { %v6190_v35 = vpop.permute.xlu1 %3169  ;;  %3417 = vrot.lane.b32.xlu0 %v5650_v4, %s4813_s11 }
 0x1d0   : > { %7383 = vst [vmem:[#allocation56_spill] sm:$0xff] %v6190_v35 }
 0x1d1   : > { %v6194_v9 = vpop.permute.xlu0 %2609 }
 0x1d3   : > { %v6196_v22 = vpop.permute.xlu1 %3189  ;;  %3509 = vrot.lane.b32.xlu0 %v5281_v46, %s4814_s12 }
 0x1d4   : > { %7384 = vst [vmem:[#allocation57_spill] sm:$0xff] %v6196_v22 }
 0x1d5   : > { %v6200_v34 = vpop.permute.xlu0 %2613 }
 0x1d7   : > { %v6202_v60 = vpop.permute.xlu1 %3193  ;;  %3513 = vrot.lane.b32.xlu0 %v5405_v39, %s4814_s12 }
 0x1d8   : > { %7385 = vst [vmem:[#allocation58_spill] sm:$0xff] %v6202_v60 }
 0x1d9   : > { %v6206_v14 = vpop.permute.xlu0 %2673 }
 0x1da   : > { %7386 = vst [vmem:[#allocation59_spill] sm:$0xff] %v6206_v14 }
 0x1db   : > { %v6208_v7 = vpop.permute.xlu1 %3197  ;;  %3517 = vrot.lane.b32.xlu0 %v5521_v37, %s4814_s12 }
 0x1dc   : > { %7387 = vst [vmem:[#allocation60_spill] sm:$0xff] %v6208_v7 }
 0x1dd   : > { %v6212_v50 = vpop.permute.xlu0 %2677 }
 0x1de   : > { %7388 = vst [vmem:[#allocation61_spill] sm:$0xff] %v6212_v50  ;;  %v6248_v50 = vpop.f32.mrf.mxu0 }
 0x1df   : > { %v6214_v35 = vpop.permute.xlu1 %3201  ;;  %3521 = vrot.lane.b32.xlu0 %v5650_v4, %s4814_s12  ;;  %v558_v21 = vmul.f32 %v6248_v50, %v6248_v50 }
 0x1e0   : > { %7389 = vst [vmem:[#allocation62_spill] sm:$0xff] %v6214_v35 }
 0x1e1   : > { %v6218_v13 = vpop.permute.xlu0 %2681 }
 0x1e2   : > { %7390 = vst [vmem:[#allocation63_spill] sm:$0xff] %v6218_v13 }
 0x1e3   : > { %v6220_v29 = vpop.permute.xlu1 %3403  ;;  %3371 = vrot.lane.b32.xlu0 %v5830_v23, %s4814_s12 }
 0x1e4   : > { %7391 = vst [vmem:[#allocation64_spill] sm:$0xff] %v6220_v29 }
 0x1e5   : > { %576 = vadd.xlane.f32.xlu1 %v575_v47  ;;  %v6225_v14 = vpop.permute.xlu0 %2685 }
 0x1e6   : > { %7392 = vst [vmem:[#allocation65_spill] sm:$0xff] %v6225_v14 }
 0x1e7   : > { %v6227_v45 = vpop.permute.xlu1 %3407  ;;  %3375 = vrot.lane.b32.xlu0 %v5902_v1, %s4814_s12 }
 0x1e9   : > { %588 = vadd.xlane.f32.xlu1 %v587_v52  ;;  %v6232_v13 = vpop.permute.xlu0 %2705  ;;  %v563_v52 = vmul.f32 %v6118_v5, %v6118_v5 }
 0x1eb   : > { %v6234_v38 = vpop.permute.xlu1 %3411  ;;  %3379 = vrot.lane.b32.xlu0 %v5936_v48, %s4814_s12 }
 0x1ec   : > { %7393 = vst [vmem:[#allocation66_spill] sm:$0xff] %v6234_v38 }
 0x1ed   : > { %v6238_v63 = vpop.permute.xlu0 %2709 }
 0x1ef   : > { %v6240_v47 = vpop.permute.xlu1 %3415  ;;  %3383 = vrot.lane.b32.xlu0 %v5946_v25, %s4814_s12 }
 0x1f1   : > { %v6244_v14 = vpop.permute.xlu0 %2713 }
 0x1f2   : > { %7394 = vst [vmem:[#allocation67_spill] sm:$0xff] %v6244_v14 }
 0x1f3   : > { %v6246_v26 = vpop.permute.xlu1 %3507  ;;  %3475 = vrot.lane.b32.xlu0 %v5830_v23, %s4813_s11  ;;  %v562_v23 = vmul.f32 %v6261_v36, %v6261_v36 }
 0x1f4   : > { %7395 = vst [vmem:[#allocation68_spill] sm:$0xff] %v6246_v26 }
 0x1f5   : > { %v6254_v28 = vpop.permute.xlu0 %2717 }
 0x1f7   : > { %v6256_v0 = vpop.permute.xlu1 %3511  ;;  %643 = vrot.lane.b32.xlu0 %v563_v52, %s4815_s13 }
 0x1f9   : > { %v6264_v7 = vpop.permute.xlu0 %3051 }
 0x1fa   : > { %633 = vrot.lane.b32.xlu1 %v558_v21, %s4815_s13  ;;  %7396 = vst [vmem:[#allocation69_spill] sm:$0xff] %v6264_v7 }
 0x1fb   : > { %v6266_v22 = vpop.permute.xlu1 %3515  ;;  %2894 = vrot.lane.b32.xlu0 %v6098_v11, %s4817_s15 }
 0x1fc   : > { %7397 = vst [vmem:[#allocation70_spill] sm:$0xff] %v6266_v22 }
 0x1fd   : > { %v6273_v27 = vpop.permute.xlu0 %3059 }
 0x1fe   : > { %641 = vrot.lane.b32.xlu1 %v562_v23, %s4815_s13  ;;  %7398 = vst [vmem:[#allocation71_spill] sm:$0xff] %v6273_v27 }
 0x1ff   : > { %v6275_v40 = vpop.permute.xlu1 %3519  ;;  %2902 = vrot.lane.b32.xlu0 %v563_v52, %s4817_s15 }
 0x201   : > { %v6279_v57 = vpop.permute.xlu0 %3063 }
 0x202   : > { %2892 = vrot.lane.b32.xlu1 %v558_v21, %s4817_s15  ;;  %7399 = vst [vmem:[#allocation72_spill] sm:$0xff] %v6279_v57 }
 0x203   : > { %v6281_v7 = vpop.permute.xlu1 %3373  ;;  %2983 = vrot.lane.b32.xlu0 %v563_v52, %s4816_s14 }
 0x204   : > { %7400 = vst [vmem:[#allocation73_spill] sm:$0xff] %v6281_v7 }
 0x205   : > { %v6285_v49 = vpop.permute.xlu0 %3083 }
 0x206   : > { %2900 = vrot.lane.b32.xlu1 %v562_v23, %s4817_s15  ;;  %7401 = vst [vmem:[#allocation74_spill] sm:$0xff] %v6285_v49 }
 0x207   : > { %v6287_v16 = vpop.permute.xlu1 %3377 }
 0x208   : > { %7402 = vst [vmem:[#allocation75_spill] sm:$0xff] %v6287_v16 }
 0x209   : > { %v6290_v27 = vpop.permute.xlu0 %3087 }
 0x20a   : > { %2973 = vrot.lane.b32.xlu1 %v558_v21, %s4816_s14 }
 0x20b   : > { %v6292_v15 = vpop.permute.xlu1 %3381 }
 0x20c   : > { %7403 = vst [vmem:[#allocation76_spill] sm:$0xff] %v6292_v15 }
 0x20d   : > { %v6295_v35 = vpop.permute.xlu0 %3091 }
 0x20e   : > { %2981 = vrot.lane.b32.xlu1 %v562_v23, %s4816_s14  ;;  %7404 = vst [vmem:[#allocation77_spill] sm:$0xff] %v6295_v35 }
 0x20f   : > { %v6297_v57 = vpop.permute.xlu1 %3385 }
 0x210   : > { %7405 = vst [vmem:[#allocation78_spill] sm:$0xff] %v6297_v57  ;;  %v572_v57 = vsel %vm565_vm1, %v6098_v11, 0.0 }
 0x211   : > { %v6299_v7 = vpop.permute.xlu0 %3095 }
 0x213   : > { %v6301_v60 = vpop.permute.xlu1 %3477 }
 0x214   : > { %7406 = vst [vmem:[#allocation79_spill] sm:$0xff] %v6301_v60  ;;  %v584_v60 = vsel %vm565_vm1, %v563_v52, 0.0 }
 0x215   : > { %v6303_v56 = vpop.permute.xlu0 %3155 }
 0x216   : > { %7407 = vst [vmem:[#allocation80_spill] sm:$0xff] %v6303_v56 }
 0x217   : > { %v636_v33 = vpop.permute.xlu1 %635 }
 0x219   : > { %v6305_v16 = vpop.permute.xlu0 %3159 }
 0x21a   : > { %7408 = vst [vmem:[#allocation81_spill] sm:$0xff] %v6305_v16 }
 0x21b   : > { %v6307_v22 = vpop.permute.xlu1 %2975 }
 0x21d   : > { %v6309_v59 = vpop.permute.xlu0 %3163 }
 0x21e   : > { %7409 = vst [vmem:[#allocation82_spill] sm:$0xff] %v6309_v59  ;;  %v569_v59 = vsel %vm565_vm1, %v558_v21, 0.0 }
 0x21f   : > { %v6311_v15 = vpop.permute.xlu1 %637 }
 0x221   : > { %v6313_v55 = vpop.permute.xlu0 %3167 }
 0x222   : > { %7410 = vst [vmem:[#allocation83_spill] sm:$0xff] %v6313_v55  ;;  %573 = vadd.xlane.f32.xlu0 %v572_v57  ;;  %v581_v57 = vsel %vm565_vm1, %v562_v23, 0.0 }
 0x223   : > { %v646_v26 = vpop.permute.xlu1 %645 }
 0x225   : > { %v6317_v3 = vpop.permute.xlu0 %3187 }
 0x226   : > { %7411 = vst [vmem:[#allocation84_spill] sm:$0xff] %v6317_v3  ;;  %585 = vadd.xlane.f32.xlu0 %v584_v60  ;;  %v676_v60 = vsel %vm565_vm1, %v646_v26, 0.0 }
 0x227   : > { %v6322_v16 = vpop.permute.xlu1 %2896 }
 0x229   : > { %v6320_v56 = vpop.permute.xlu0 %3191 }
 0x22b   : > { %v2905_v51 = vpop.permute.xlu1 %2904 }
 0x22c   : > { %v2935_v21 = vsel %vm565_vm1, %v2905_v51, 0.0 }
 0x22d   : > { %v6324_v38 = vpop.permute.xlu0 %3195 }
 0x22e   : > { %7412 = vst [vmem:[#allocation85_spill] sm:$0xff] %v6324_v38  ;;  %v557_v38 = vmul.f32 %v6102_v20, %v6102_v20 }
 0x22f   : > { %v6332_v29 = vpop.permute.xlu1 %2977 }
 0x231   : > { %v6327_v55 = vpop.permute.xlu0 %3199 }
 0x232   : > { %570 = vadd.xlane.f32.xlu1 %v569_v59 }
 0x233   : > { %v2986_v59 = vpop.permute.xlu1 %2985 }
 0x235   : > { %v6330_v11 = vpop.permute.xlu0 %3405 }
 0x236   : > { %582 = vadd.xlane.f32.xlu1 %v581_v57  ;;  %7413 = vst [vmem:[#allocation86_spill] sm:$0xff] %v6330_v11  ;;  %v561_v57 = vmul.f32 %v6126_v18, %v6126_v18  ;;  %v3016_v11 = vsel %vm565_vm1, %v2986_v59, 0.0 }
 0x239   : > { %v6335_v52 = vpop.permute.xlu0 %3409 }
 0x23a   : > { %677 = vadd.xlane.f32.xlu1 %v676_v60  ;;  %7414 = vst [vmem:[#allocation87_spill] sm:$0xff] %v6335_v52 }
 0x23c   : > { %631 = vrot.lane.b32.xlu0 %v557_v38, %s4815_s13 }
 0x23d   : > { %v6341_v23 = vpop.permute.xlu0 %3413 }
 0x23e   : > { %2936 = vadd.xlane.f32.xlu1 %v2935_v21  ;;  %7415 = vst [vmem:[#allocation88_spill] sm:$0xff] %v6341_v23 }
 0x240   : > { %639 = vrot.lane.b32.xlu0 %v561_v57, %s4815_s13 }
 0x241   : > { %v6347_v26 = vpop.permute.xlu0 %3417 }
 0x242   : > { %3017 = vadd.xlane.f32.xlu1 %v3016_v11  ;;  %7416 = vst [vmem:[#allocation89_spill] sm:$0xff] %v6347_v26 }
 0x244   : > { %2890 = vrot.lane.b32.xlu0 %v557_v38, %s4817_s15 }
 0x245   : > { %v6350_v60 = vpop.permute.xlu0 %3509 }
 0x246   : > { %7417 = vst [vmem:[#allocation90_spill] sm:$0xff] %v6350_v60 }
 0x248   : > { %2898 = vrot.lane.b32.xlu0 %v561_v57, %s4817_s15 }
 0x249   : > { %v6353_v51 = vpop.permute.xlu0 %3513 }
 0x24a   : > { %7418 = vst [vmem:[#allocation91_spill] sm:$0xff] %v6353_v51  ;;  %v566_v51 = vsel %vm565_vm1, %v557_v38, 0.0 }
 0x24c   : > { %2971 = vrot.lane.b32.xlu0 %v557_v38, %s4816_s14 }
 0x24d   : > { %v6356_v21 = vpop.permute.xlu0 %3517 }
 0x24e   : > { %7419 = vst [vmem:[#allocation92_spill] sm:$0xff] %v6356_v21  ;;  %v578_v21 = vsel %vm565_vm1, %v561_v57, 0.0 }
 0x250   : > { %2979 = vrot.lane.b32.xlu0 %v561_v57, %s4816_s14 }
 0x251   : > { %v6359_v59 = vpop.permute.xlu0 %3521 }
 0x252   : > { %7420 = vst [vmem:[#allocation93_spill] sm:$0xff] %v6359_v59 }
 0x255   : > { %v6361_v23 = vpop.permute.xlu0 %3371 }
 0x256   : > { %7421 = vst [vmem:[#allocation94_spill] sm:$0xff] %v6361_v23 }
 0x259   : > { %v6363_v11 = vpop.permute.xlu0 %3375 }
 0x25a   : > { %7422 = vst [vmem:[#allocation95_spill] sm:$0xff] %v6363_v11  ;;  %v661_v11 = vsel %vm565_vm1, %v636_v33, 0.0 }
 0x25d   : > { %v6365_v26 = vpop.permute.xlu0 %3379 }
 0x25e   : > { %7423 = vst [vmem:[#allocation96_spill] sm:$0xff] %v6365_v26 }
 0x261   : > { %v6367_v52 = vpop.permute.xlu0 %3383 }
 0x262   : > { %7424 = vst [vmem:[#allocation97_spill] sm:$0xff] %v6367_v52 }
 0x265   : > { %v6369_v3 = vpop.permute.xlu0 %3475 }
 0x266   : > { %7425 = vst [vmem:[#allocation98_spill] sm:$0xff] %v6369_v3 }
 0x269   : > { %v644_v49 = vpop.permute.xlu0 %643 }
 0x26a   : > { %v673_v3 = vsel %vm565_vm1, %v644_v49, 0.0 }
 0x26d   : > { %v2895_v52 = vpop.permute.xlu0 %2894 }
 0x26e   : > { %v577_v60 = vpop.xlane.xlu1 %576 }
 0x26f   : > { %567 = vadd.xlane.f32.xlu0 %v566_v51  ;;  %v2920_v51 = vsel %vm565_vm1, %v2895_v52, 0.0 }
 0x272   : > { %v589_v35 = vpop.xlane.xlu1 %588 }
 0x273   : > { %579 = vadd.xlane.f32.xlu0 %v578_v21  ;;  %v2903_v21 = vpop.permute.xlu0 %2902 }
 0x276   : > { %v634_v59 = vpop.permute.xlu1 %633 }
 0x277   : > { %v658_v23 = vsel %vm565_vm1, %v634_v59, 0.0  ;;  %662 = vadd.xlane.f32.xlu0 %v661_v11  ;;  %v593_v11 = vadd.f32 1e-06, %v577_v60 }
 0x278   : > { %659 = vadd.xlane.f32.xlu1 %v658_v23  ;;  %v2932_v23 = vsel %vm565_vm1, %v2903_v21, 0.0 }
 0x279   : > { %4632 = vrsqrt.f32 %v593_v11 }
 0x27a   : > { %v642_v26 = vpop.permute.xlu1 %641 }
 0x27b   : > { %v670_v14 = vsel %vm565_vm1, %v642_v26, 0.0  ;;  %674 = vadd.xlane.f32.xlu0 %v673_v3  ;;  %v2984_v3 = vpop.permute.xlu0 %2983 }
 0x27c   : > { %671 = vadd.xlane.f32.xlu1 %v670_v14  ;;  %v3001_v14 = vsel %vm565_vm1, %v6307_v22, 0.0  ;;  %v6388_v22 = vstv %s556_s17 }
 0x27e   : > { %v2893_v38 = vpop.permute.xlu1 %2892 }
 0x27f   : > { %v2917_v57 = vsel %vm565_vm1, %v2893_v38, 0.0  ;;  %2921 = vadd.xlane.f32.xlu0 %v2920_v51  ;;  %v597_v51 = vadd.f32 1e-06, %v589_v35 }
 0x280   : > { %2918 = vadd.xlane.f32.xlu1 %v2917_v57  ;;  %v3013_v57 = vsel %vm565_vm1, %v2984_v3, 0.0 }
 0x281   : > { %4634 = vrsqrt.f32 %v597_v51 }
 0x282   : > { %v2901_v59 = vpop.permute.xlu1 %2900 }
 0x283   : > { %v2929_v33 = vsel %vm565_vm1, %v2901_v59, 0.0  ;;  %2933 = vadd.xlane.f32.xlu0 %v2932_v23 }
 0x284   : > { %2930 = vadd.xlane.f32.xlu1 %v2929_v33 }
 0x286   : > { %v2974_v26 = vpop.permute.xlu1 %2973  ;;  %v4633_v21 = vpop.eup %4632 }
 0x287   : > { %v2998_v49 = vsel %vm565_vm1, %v2974_v26, 0.0  ;;  %3002 = vadd.xlane.f32.xlu0 %v3001_v14  ;;  %v610_v59 = vmul.f32 %v4633_v21, %v6388_v22 }
 0x288   : > { %2999 = vadd.xlane.f32.xlu1 %v2998_v49 }
 0x289   : > { %v6394_v60 = vmul.f32 %v6112_v2, %v610_v59 }
 0x28a   : > { %v2982_v52 = vpop.permute.xlu1 %2981 }
 0x28b   : > { %v3010_v38 = vsel %vm565_vm1, %v2982_v52, 0.0  ;;  %3014 = vadd.xlane.f32.xlu0 %v3013_v57  ;;  %7426 = vst [vmem:[#allocation99_spill] sm:$0xff] %v6394_v60  ;;  %v2418_v26 = vmul.f32 %v5938_v62, %v6394_v60  ;;  %v2506_v3 = vmul.f32 %v5405_v39, %v6394_v60 }
 0x28c   : > { %3011 = vadd.xlane.f32.xlu1 %v3010_v38 }
 0x28e   : > { %v4635_v33 = vpop.eup %4634 }
 0x28f   : > { %v614_v23 = vmul.f32 %v4635_v33, %v6388_v22 }
 0x291   : > { %v6400_v35 = vmul.f32 %v6131_v12, %v614_v23 }
 0x293   : > { %7427 = vst [vmem:[#allocation100_spill] sm:$0xff] %v6400_v35  ;;  %v2422_v49 = vmul.f32 %v5958_v24, %v6400_v35  ;;  %v2510_v11 = vmul.f32 %v5650_v4, %v6400_v35 }
 0x29d   : > { %3481 = vrot.lane.b32.xlu1 %v5544_v54, %s4813_s11 }
 0x2a1   : > { %3485 = vrot.lane.b32.xlu1 %v5711_v10, %s4813_s11 }
 0x2a5   : > { %3489 = vrot.lane.b32.xlu1 %v5727_v31, %s4813_s11 }
 0x2a9   : > { %2437 = vrot.lane.b32.xlu1 %v2418_v26, %s4818_s19 }
 0x2ab   : > { %v574_v14 = vpop.xlane.xlu0 %573 }
 0x2ad   : > { %2445 = vrot.lane.b32.xlu1 %v2422_v49, %s4818_s19 }
 0x2af   : > { %v586_v52 = vpop.xlane.xlu0 %585 }
 0x2b1   : > { %2525 = vrot.lane.b32.xlu1 %v2506_v3, %s4808_s16 }
 0x2b3   : > { %v632_v38 = vpop.permute.xlu0 %631 }
 0x2b4   : > { %v655_v62 = vsel %vm565_vm1, %v632_v38, 0.0 }
 0x2b5   : > { %2533 = vrot.lane.b32.xlu1 %v2510_v11, %s4808_s16  ;;  %656 = vadd.xlane.f32.xlu0 %v655_v62 }
 0x2b7   : > { %v640_v57 = vpop.permute.xlu0 %639 }
 0x2b8   : > { %v667_v24 = vsel %vm565_vm1, %v640_v57, 0.0 }
 0x2b9   : > { %668 = vadd.xlane.f32.xlu0 %v667_v24  ;;  %v664_v24 = vsel %vm565_vm1, %v6311_v15, 0.0 }
 0x2bb   : > { %v571_v51 = vpop.xlane.xlu1 %570  ;;  %v2891_v59 = vpop.permute.xlu0 %2890 }
 0x2bc   : > { %v591_v21 = vadd.f32 1e-06, %v571_v51  ;;  %v2914_v39 = vsel %vm565_vm1, %v2891_v59, 0.0 }
 0x2bd   : > { %2915 = vadd.xlane.f32.xlu0 %v2914_v39 }
 0x2be   : > { %4636 = vrsqrt.f32 %v591_v21 }
 0x2bf   : > { %v583_v33 = vpop.xlane.xlu1 %582  ;;  %v2899_v4 = vpop.permute.xlu0 %2898 }
 0x2c0   : > { %v595_v23 = vadd.f32 1e-06, %v583_v33  ;;  %v2926_v26 = vsel %vm565_vm1, %v2899_v4, 0.0  ;;  %v2923_v33 = vsel %vm565_vm1, %v6322_v16, 0.0  ;;  %v3004_v4 = vsel %vm565_vm1, %v6332_v29, 0.0 }
 0x2c1   : > { %2927 = vadd.xlane.f32.xlu0 %v2926_v26  ;;  %v592_v26 = vadd.f32 1e-06, %v574_v14 }
 0x2c2   : > { %4638 = vrsqrt.f32 %v595_v23 }
 0x2c3   : > { %v2972_v49 = vpop.permute.xlu0 %2971  ;;  %4640 = vrsqrt.f32 %v592_v26 }
 0x2c4   : > { %v2995_v3 = vsel %vm565_vm1, %v2972_v49, 0.0  ;;  %v596_v49 = vadd.f32 1e-06, %v586_v52 }
 0x2c5   : > { %2996 = vadd.xlane.f32.xlu0 %v2995_v3 }
 0x2c6   : > { %4642 = vrsqrt.f32 %v596_v49 }
 0x2c7   : > { %v2980_v11 = vpop.permute.xlu0 %2979 }
 0x2c8   : > { %v3007_v38 = vsel %vm565_vm1, %v2980_v11, 0.0 }
 0x2c9   : > { %3008 = vadd.xlane.f32.xlu0 %v3007_v38 }
 0x2cb   : > { %v4637_v62 = vpop.eup %4636 }
 0x2cc   : > { %v608_v57 = vmul.f32 %v4637_v62, %v6388_v22 }
 0x2cd   : > { %665 = vadd.xlane.f32.xlu0 %v664_v24 }
 0x2ce   : > { %v6424_v51 = vmul.f32 %v608_v57, %v6248_v50 }
 0x2cf   : > { %v4639_v21 = vpop.eup %4638 }
 0x2d0   : > { %7428 = vst [vmem:[#allocation101_spill] sm:$0xff] %v6424_v51  ;;  %v2416_v59 = vmul.f32 %v5908_v30, %v6424_v51  ;;  %v612_v39 = vmul.f32 %v4639_v21, %v6388_v22  ;;  %v2504_v30 = vmul.f32 %v5281_v46, %v6424_v51 }
 0x2d1   : > { %2924 = vadd.xlane.f32.xlu0 %v2923_v33 }
 0x2d2   : > { %2433 = vrot.lane.b32.xlu1 %v2416_v59, %s4818_s19  ;;  %v6433_v23 = vmul.f32 %v612_v39, %v6261_v36 }
 0x2d4   : > { %7429 = vst [vmem:[#allocation102_spill] sm:$0xff] %v6433_v23  ;;  %v2420_v15 = vmul.f32 %v5952_v32, %v6433_v23  ;;  %v2508_v16 = vmul.f32 %v5521_v37, %v6433_v23  ;;  %v4641_v32 = vpop.eup %4640 }
 0x2d5   : > { %3005 = vadd.xlane.f32.xlu0 %v3004_v4  ;;  %v609_v29 = vmul.f32 %v4641_v32, %v6388_v22  ;;  %v4643_v3 = vpop.eup %4642 }
 0x2d6   : > { %2441 = vrot.lane.b32.xlu1 %v2420_v15, %s4818_s19  ;;  %v613_v37 = vmul.f32 %v4643_v3, %v6388_v22 }
 0x2d7   : > { %v6452_v46 = vmul.f32 %v6086_v43, %v609_v29 }
 0x2d8   : > { %v6458_v14 = vmul.f32 %v6118_v5, %v613_v37 }
 0x2d9   : > { %7430 = vst [vmem:[#allocation103_spill] sm:$0xff] %v6452_v46  ;;  %v2417_v52 = vmul.f32 %v5928_v8, %v6452_v46  ;;  %v2505_v21 = vmul.f32 %v5327_v58, %v6452_v46  ;;  %v7488_v46 = vld [vmem:[#allocation23_spill] sm:$0xff] }
 0x2da   : > { %2521 = vrot.lane.b32.xlu1 %v2504_v30, %s4808_s16  ;;  %7431 = vst [vmem:[#allocation104_spill] sm:$0xff] %v6458_v14  ;;  %v2421_v62 = vmul.f32 %v6108_v42, %v6458_v14  ;;  %v2509_v39 = vmul.f32 %v5912_v41, %v6458_v14 }
 0x2de   : > { %2529 = vrot.lane.b32.xlu1 %v2508_v16, %s4808_s16 }
 0x2eb   : > { %3479 = vrot.lane.b32.xlu0 %v5902_v1, %s4813_s11 }
 0x2ef   : > { %3483 = vrot.lane.b32.xlu0 %v5936_v48, %s4813_s11 }
 0x2f3   : > { %3487 = vrot.lane.b32.xlu0 %v5946_v25, %s4813_s11  ;;  %v7486_v25 = vld [vmem:[#allocation21_spill] sm:$0xff] }
 0x2f7   : > { %2435 = vrot.lane.b32.xlu0 %v2417_v52, %s4818_s19 }
 0x2f8   : > { %v568_v11 = vpop.xlane.xlu0 %567 }
 0x2f9   : > { %v590_v38 = vadd.f32 1e-06, %v568_v11 }
 0x2fb   : > { %4644 = vrsqrt.f32 %v590_v38  ;;  %2443 = vrot.lane.b32.xlu0 %v2421_v62, %s4818_s19 }
 0x2fc   : > { %v580_v57 = vpop.xlane.xlu0 %579 }
 0x2fd   : > { %v594_v24 = vadd.f32 1e-06, %v580_v57 }
 0x2ff   : > { %4646 = vrsqrt.f32 %v594_v24  ;;  %2523 = vrot.lane.b32.xlu0 %v2505_v21, %s4808_s16 }
 0x300   : > { %v663_v59 = vpop.xlane.xlu0 %662 }
 0x301   : > { %v681_v8 = vadd.f32 1e-06, %v663_v59  ;;  %v6502_v59 = vpop.xlane.xlu1 %677 }
 0x303   : > { %2531 = vrot.lane.b32.xlu0 %v2509_v39, %s4808_s16  ;;  %4648 = vrsqrt.f32 %v681_v8 }
 0x304   : > { %v675_v33 = vpop.xlane.xlu0 %674 }
 0x305   : > { %v685_v42 = vadd.f32 1e-06, %v675_v33 }
 0x307   : > { %4650 = vrsqrt.f32 %v685_v42 }
 0x308   : > { %v4645_v15 = vpop.eup %4644  ;;  %v2922_v26 = vpop.xlane.xlu0 %2921 }
 0x309   : > { %v607_v4 = vmul.f32 %v4645_v15, %v6388_v22  ;;  %v2940_v32 = vadd.f32 1e-06, %v2922_v26 }
 0x30b   : > { %v6474_v30 = vmul.f32 %v607_v4, %v6102_v20  ;;  %4652 = vrsqrt.f32 %v2940_v32  ;;  %v6511_v4 = vpop.xlane.xlu1 %2936 }
 0x30c   : > { %v4647_v58 = vpop.eup %4646  ;;  %v2934_v37 = vpop.xlane.xlu0 %2933 }
 0x30d   : > { %7432 = vst [vmem:[#allocation105_spill] sm:$0xff] %v6474_v30  ;;  %v611_v16 = vmul.f32 %v4647_v58, %v6388_v22  ;;  %v2415_v49 = vmul.f32 %v6078_v53, %v6474_v30  ;;  %v2944_v11 = vadd.f32 1e-06, %v2934_v37  ;;  %v2503_v53 = vmul.f32 %v5800_v17, %v6474_v30 }
 0x30f   : > { %v6480_v41 = vmul.f32 %v611_v16, %v6126_v18  ;;  %2431 = vrot.lane.b32.xlu0 %v2415_v49, %s4818_s19  ;;  %4654 = vrsqrt.f32 %v2944_v11  ;;  %v6522_v32 = vpop.xlane.xlu1 %3017 }
 0x310   : > { %v4649_v3 = vpop.eup %4648  ;;  %v3003_v24 = vpop.xlane.xlu0 %3002 }
 0x311   : > { %7433 = vst [vmem:[#allocation106_spill] sm:$0xff] %v6480_v41  ;;  %v2419_v29 = vmul.f32 %v6092_v6, %v6480_v41  ;;  %v697_v52 = vmul.f32 %v4649_v3, %v6388_v22  ;;  %v2507_v6 = vmul.f32 %v5873_v19, %v6480_v41  ;;  %v3021_v8 = vadd.f32 1e-06, %v3003_v24 }
 0x312   : > { %v6507_v19 = vstv %s4162_s20 }
 0x313   : > { %2439 = vrot.lane.b32.xlu0 %v2419_v29, %s4818_s19  ;;  %v6491_v62 = vmul.f32 %v6086_v43, %v697_v52  ;;  %4656 = vrsqrt.f32 %v3021_v8  ;;  %v6531_v3 = vpop.xlane.xlu1 %659 }
 0x314   : > { %v4651_v38 = vpop.eup %4650  ;;  %v3015_v42 = vpop.xlane.xlu0 %3014 }
 0x315   : > { %v701_v57 = vmul.f32 %v4651_v38, %v6388_v22  ;;  %v2627_v17 = vmul.f32 %v6188_v61, %v6491_v62  ;;  %v3025_v61 = vadd.f32 1e-06, %v3015_v42  ;;  %v2731_v58 = vmul.f32 %v6238_v63, %v6491_v62 }
 0x317   : > { %2519 = vrot.lane.b32.xlu0 %v2503_v53, %s4808_s16  ;;  %v6498_v21 = vmul.f32 %v6118_v5, %v701_v57  ;;  %4658 = vrsqrt.f32 %v3025_v61  ;;  %v6539_v53 = vpop.xlane.xlu1 %671 }
 0x318   : > { %v4653_v33 = vpop.eup %4652 }
 0x319   : > { %v2631_v39 = vmul.f32 %v6200_v34, %v6498_v21  ;;  %v2957_v15 = vmul.f32 %v4653_v33, %v6507_v19  ;;  %v2735_v49 = vmul.f32 %v6254_v28, %v6498_v21 }
 0x31b   : > { %2527 = vrot.lane.b32.xlu0 %v2507_v6, %s4808_s16  ;;  %v6517_v34 = vmul.f32 %v6086_v43, %v2957_v15  ;;  %v6549_v6 = vpop.xlane.xlu1 %2918 }
 0x31c   : > { %v4655_v26 = vpop.eup %4654 }
 0x31d   : > { %v2961_v16 = vmul.f32 %v4655_v26, %v6507_v19  ;;  %v3109_v63 = vmul.f32 %v6290_v27, %v6517_v34  ;;  %v3213_v11 = vmul.f32 %v6320_v56, %v6517_v34 }
 0x31f   : > { %2645 = vrot.lane.b32.xlu0 %v2627_v17, %s4818_s19  ;;  %v6526_v29 = vmul.f32 %v6118_v5, %v2961_v16  ;;  %v2931_v33 = vpop.xlane.xlu1 %2930 }
 0x320   : > { %v4657_v52 = vpop.eup %4656  ;;  %v2943_v15 = vadd.f32 1e-06, %v2931_v33 }
 0x321   : > { %v3113_v37 = vmul.f32 %v6299_v7, %v6526_v29  ;;  %v3037_v28 = vmul.f32 %v4657_v52, %v6507_v19  ;;  %v3217_v7 = vmul.f32 %v6327_v55, %v6526_v29 }
 0x323   : > { %2653 = vrot.lane.b32.xlu0 %v2631_v39, %s4818_s19  ;;  %v6543_v27 = vmul.f32 %v6086_v43, %v3037_v28  ;;  %v686_v28 = vadd.f32 1e-06, %v6502_v59 }
 0x324   : > { %v4659_v38 = vpop.eup %4658 }
 0x325   : > { %v3041_v57 = vmul.f32 %v4659_v38, %v6507_v19  ;;  %v3429_v56 = vmul.f32 %v6227_v45, %v6543_v27  ;;  %v3533_v61 = vmul.f32 %v6256_v0, %v6543_v27 }
 0x327   : > { %2749 = vrot.lane.b32.xlu0 %v2731_v58, %s4808_s16  ;;  %v6552_v24 = vmul.f32 %v6118_v5, %v3041_v57 }
 0x329   : > { %v3433_v39 = vmul.f32 %v6240_v47, %v6552_v24  ;;  %v3537_v26 = vmul.f32 %v6275_v40, %v6552_v24 }
 0x32b   : > { %2757 = vrot.lane.b32.xlu0 %v2735_v49, %s4808_s16 }
 0x32f   : > { %3127 = vrot.lane.b32.xlu0 %v3109_v63, %s4818_s19 }
 0x333   : > { %3135 = vrot.lane.b32.xlu0 %v3113_v37, %s4818_s19 }
 0x337   : > { %3231 = vrot.lane.b32.xlu0 %v3213_v11, %s4808_s16 }
 0x33b   : > { %3239 = vrot.lane.b32.xlu0 %v3217_v7, %s4808_s16 }
 0x33e   : > { %v657_v17 = vpop.xlane.xlu0 %656 }
 0x33f   : > { %v679_v8 = vadd.f32 1e-06, %v657_v17  ;;  %3447 = vrot.lane.b32.xlu0 %v3429_v56, %s4818_s19 }
 0x341   : > { %4660 = vrsqrt.f32 %v679_v8 }
 0x342   : > { %v669_v55 = vpop.xlane.xlu0 %668 }
 0x343   : > { %v683_v42 = vadd.f32 1e-06, %v669_v55  ;;  %3455 = vrot.lane.b32.xlu0 %v3433_v39, %s4818_s19 }
 0x345   : > { %4662 = vrsqrt.f32 %v683_v42 }
 0x346   : > { %v2916_v58 = vpop.xlane.xlu0 %2915  ;;  %4664 = vrsqrt.f32 %v2943_v15 }
 0x347   : > { %v2938_v45 = vadd.f32 1e-06, %v2916_v58  ;;  %3551 = vrot.lane.b32.xlu0 %v3533_v61, %s4808_s16 }
 0x349   : > { %4666 = vrsqrt.f32 %v2938_v45 }
 0x34a   : > { %v2928_v16 = vpop.xlane.xlu0 %2927 }
 0x34b   : > { %v2942_v47 = vadd.f32 1e-06, %v2928_v16  ;;  %3559 = vrot.lane.b32.xlu0 %v3537_v26, %s4808_s16  ;;  %v7434_v26 = vld [vmem:[#allocation67_spill] sm:$0xff] }
 0x34d   : > { %4668 = vrsqrt.f32 %v2942_v47 }
 0x34e   : > { %v4661_v49 = vpop.eup %4660  ;;  %v2997_v63 = vpop.xlane.xlu0 %2996  ;;  %4670 = vrsqrt.f32 %v686_v28 }
 0x34f   : > { %v695_v37 = vmul.f32 %v4661_v49, %v6388_v22  ;;  %v3019_v56 = vadd.f32 1e-06, %v2997_v63  ;;  %v7435_v49 = vld [vmem:[#allocation74_spill] sm:$0xff] }
 0x351   : > { %v6568_v0 = vmul.f32 %v695_v37, %v6102_v20 }
 0x352   : > { %v4663_v52 = vpop.eup %4662  ;;  %v3009_v11 = vpop.xlane.xlu0 %3008 }
 0x353   : > { %v699_v38 = vmul.f32 %v4663_v52, %v6388_v22  ;;  %v2625_v40 = vmul.f32 %v6182_v44, %v6568_v0  ;;  %v4665_v57 = vpop.eup %4664  ;;  %v3023_v15 = vadd.f32 1e-06, %v3009_v11  ;;  %v2729_v61 = vmul.f32 %v6232_v13, %v6568_v0 }
 0x354   : > { %v2960_v33 = vmul.f32 %v4665_v57, %v6507_v19  ;;  %v680_v11 = vadd.f32 1e-06, %v6531_v3  ;;  %v684_v3 = vadd.f32 1e-06, %v6539_v53 }
 0x355   : > { %v6575_v7 = vmul.f32 %v699_v38, %v6126_v18  ;;  %2641 = vrot.lane.b32.xlu0 %v2625_v40, %s4818_s19 }
 0x356   : > { %v666_v17 = vpop.xlane.xlu0 %665  ;;  %v4667_v59 = vpop.eup %4666  ;;  %v6587_v58 = vmul.f32 %v2960_v33, %v6261_v36 }
 0x357   : > { %v682_v8 = vadd.f32 1e-06, %v666_v17  ;;  %v2629_v39 = vmul.f32 %v6194_v9, %v6575_v7  ;;  %v2955_v55 = vmul.f32 %v4667_v59, %v6507_v19  ;;  %v2733_v16 = vmul.f32 %v7434_v26, %v6575_v7  ;;  %v3000_v33 = vpop.xlane.xlu1 %2999 }
 0x359   : > { %4672 = vrsqrt.f32 %v682_v8  ;;  %2649 = vrot.lane.b32.xlu0 %v2629_v39, %s4818_s19  ;;  %v6594_v45 = vmul.f32 %v2955_v55, %v6102_v20  ;;  %v2945_v8 = vadd.f32 1e-06, %v6511_v4  ;;  %v7437_v55 = vld [vmem:[#allocation84_spill] sm:$0xff] }
 0x35a   : > { %v4669_v44 = vpop.eup %4668  ;;  %4674 = vrsqrt.f32 %v3019_v56  ;;  %v2925_v37 = vpop.xlane.xlu0 %2924  ;;  %v7436_v56 = vld [vmem:[#allocation77_spill] sm:$0xff] }
 0x35b   : > { %v2959_v42 = vmul.f32 %v4669_v44, %v6507_v19  ;;  %4676 = vrsqrt.f32 %v3023_v15  ;;  %v4671_v13 = vpop.eup %4670  ;;  %v3107_v63 = vmul.f32 %v7435_v49, %v6594_v45  ;;  %v2941_v57 = vadd.f32 1e-06, %v2925_v37 }
 0x35c   : > { %v702_v28 = vmul.f32 %v4671_v13, %v6388_v22  ;;  %4678 = vrsqrt.f32 %v680_v11  ;;  %v7439_v11 = vld [vmem:[#allocation64_spill] sm:$0xff] }
 0x35d   : > { %2745 = vrot.lane.b32.xlu0 %v2729_v61, %s4808_s16  ;;  %v6591_v9 = vmul.f32 %v2959_v42, %v6126_v18  ;;  %4680 = vrsqrt.f32 %v2941_v57  ;;  %v3211_v42 = vmul.f32 %v7437_v55, %v6594_v45  ;;  %v3020_v61 = vadd.f32 1e-06, %v3000_v33 }
 0x35e   : > { %v6615_v59 = vmul.f32 %v6131_v12, %v702_v28  ;;  %4682 = vrsqrt.f32 %v2945_v8  ;;  %v3006_v37 = vpop.xlane.xlu0 %3005 }
 0x35f   : > { %v3111_v17 = vmul.f32 %v7436_v56, %v6591_v9  ;;  %4684 = vrsqrt.f32 %v684_v3  ;;  %v2939_v56 = vadd.f32 1e-06, %v6549_v6  ;;  %v3022_v8 = vadd.f32 1e-06, %v3006_v37  ;;  %v7441_v3 = vld [vmem:[#allocation66_spill] sm:$0xff] }
 0x360   : > { %v4347_v49 = vpack.i.bf16 %v6615_v59, %v6498_v21  ;;  %4686 = vrsqrt.f32 %v3020_v61  ;;  %v3026_v61 = vadd.f32 1e-06, %v6522_v32  ;;  %v7445_v32 = vld [vmem:[#allocation35_spill] sm:$0xff]  ;;  %v2600_v31 = vmul.f32 %v7488_v46, %v6615_v59  ;;  %v7491_v46 = vld [vmem:[#allocation65_spill] sm:$0xff] }
 0x361   : > { %2753 = vrot.lane.b32.xlu0 %v2733_v16, %s4808_s16  ;;  %v7438_v16 = vld [vmem:[#allocation85_spill] sm:$0xff] }
 0x362   : > { %v3215_v13 = vmul.f32 %v7438_v16, %v6591_v9 }
 0x365   : > { %3123 = vrot.lane.b32.xlu0 %v3107_v63, %s4818_s19  ;;  %v3012_v63 = vpop.xlane.xlu1 %3011 }
 0x366   : > { %v4673_v52 = vpop.eup %4672 }
 0x367   : > { %v4675_v38 = vpop.eup %4674  ;;  %v698_v40 = vmul.f32 %v4673_v52, %v6388_v22  ;;  %v3024_v52 = vadd.f32 1e-06, %v3012_v63  ;;  %v7444_v63 = vld [vmem:[#allocation33_spill] sm:$0xff] }
 0x368   : > { %v3035_v44 = vmul.f32 %v4675_v38, %v6507_v19  ;;  %v4677_v15 = vpop.eup %4676 }
 0x369   : > { %v6611_v39 = vmul.f32 %v6112_v2, %v698_v40  ;;  %3131 = vrot.lane.b32.xlu0 %v3111_v17, %s4818_s19  ;;  %v3039_v26 = vmul.f32 %v4677_v15, %v6507_v19  ;;  %v7440_v40 = vld [vmem:[#allocation25_spill] sm:$0xff]  ;;  %v4679_v17 = vpop.eup %4678  ;;  %4688 = vrsqrt.f32 %v3024_v52 }
 0x36a   : > { %v6626_v53 = vmul.f32 %v3035_v44, %v6102_v20  ;;  %v7442_v44 = vld [vmem:[#allocation27_spill] sm:$0xff]  ;;  %v696_v6 = vmul.f32 %v4679_v17, %v6388_v22  ;;  %4690 = vrsqrt.f32 %v2939_v56 }
 0x36b   : > { %v4342_v4 = vpack.i.bf16 %v6611_v39, %v6491_v62  ;;  %v6636_v28 = vmul.f32 %v3039_v26, %v6126_v18  ;;  %v2628_v57 = vmul.f32 %v7440_v40, %v6611_v39  ;;  %v2632_v55 = vmul.f32 %v7442_v44, %v6615_v59 }
 0x36c   : > { %v3427_v38 = vmul.f32 %v7439_v11, %v6626_v53  ;;  %4692 = vrsqrt.f32 %v3022_v8  ;;  %v2732_v37 = vmul.f32 %v7444_v63, %v6611_v39  ;;  %v2736_v11 = vmul.f32 %v7445_v32, %v6615_v59  ;;  %v7446_v8 = vld [vmem:[#allocation70_spill] sm:$0xff] }
 0x36d   : > { %3227 = vrot.lane.b32.xlu0 %v3211_v42, %s4808_s16  ;;  %4343 = vrot.lane.b32.xlu1 %v4342_v4, %s4815_s13  ;;  %v3431_v33 = vmul.f32 %v7441_v3, %v6636_v28  ;;  %v4681_v42 = vpop.eup %4680  ;;  %v6649_v4 = vpop.permute.xlu0 %3479  ;;  %4694 = vrsqrt.f32 %v3026_v61  ;;  %v6666_v40 = vmul.f32 %v696_v6, %v6248_v50  ;;  %v3535_v3 = vmul.f32 %v7446_v8, %v6636_v28  ;;  %v7448_v63 = vld [vmem:[#allocation50_spill] sm:$0xff] }
 0x36e   : > { %v4683_v15 = vpop.eup %4682  ;;  %v2958_v16 = vmul.f32 %v4681_v42, %v6507_v19  ;;  %v7447_v42 = vld [vmem:[#allocation46_spill] sm:$0xff] }
 0x36f   : > { %v4685_v26 = vpop.eup %4684  ;;  %v2962_v52 = vmul.f32 %v4683_v15, %v6507_v19 }
 0x370   : > { %v6670_v56 = vmul.f32 %v6112_v2, %v2958_v16 }
 0x371   : > { %3235 = vrot.lane.b32.xlu0 %v3215_v13, %s4808_s16  ;;  %4348 = vrot.lane.b32.xlu1 %v4347_v49, %s4815_s13  ;;  %v7443_v13 = vld [vmem:[#allocation68_spill] sm:$0xff]  ;;  %v6672_v17 = vpop.permute.xlu0 %3483 }
 0x372   : > { %v3531_v49 = vmul.f32 %v7443_v13, %v6626_v53  ;;  %v3110_v15 = vmul.f32 %v7447_v42, %v6670_v56 }
 0x375   : > { %3443 = vrot.lane.b32.xlu0 %v3427_v38, %s4818_s19  ;;  %2647 = vrot.lane.b32.xlu1 %v2628_v57, %s4818_s19  ;;  %v4687_v38 = vpop.eup %4686  ;;  %v700_v57 = vmul.f32 %v4685_v26, %v6388_v22  ;;  %v6689_v6 = vpop.permute.xlu0 %3487 }
 0x376   : > { %v3036_v22 = vmul.f32 %v4687_v38, %v6507_v19  ;;  %v4689_v61 = vpop.eup %4688 }
 0x377   : > { %v6682_v44 = vmul.f32 %v700_v57, %v6261_v36  ;;  %v4691_v26 = vpop.eup %4690  ;;  %v3040_v13 = vmul.f32 %v4689_v61, %v6507_v19 }
 0x378   : > { %v6694_v16 = vmul.f32 %v3036_v22, %v6248_v50  ;;  %v2956_v32 = vmul.f32 %v4691_v26, %v6507_v19  ;;  %v7450_v22 = vld [vmem:[#allocation58_spill] sm:$0xff] }
 0x379   : > { %3451 = vrot.lane.b32.xlu0 %v3431_v33, %s4818_s19  ;;  %2655 = vrot.lane.b32.xlu1 %v2632_v55, %s4818_s19  ;;  %v6679_v33 = vmul.f32 %v6131_v12, %v2962_v52  ;;  %v4352_v55 = vpack.i.bf16 %v6666_v40, %v6568_v0  ;;  %v4693_v52 = vpop.eup %4692  ;;  %v6706_v57 = vmul.f32 %v3040_v13, %v6261_v36  ;;  %v6708_v8 = vpop.permute.xlu0 %2435  ;;  %v7451_v13 = vld [vmem:[#allocation62_spill] sm:$0xff] }
 0x37a   : > { %v3038_v38 = vmul.f32 %v4693_v52, %v6507_v19  ;;  %7449 = vst [vmem:[#allocation67_spill] sm:$0xff] %v6708_v8  ;;  %v7453_v52 = vld [vmem:[#allocation87_spill] sm:$0xff] }
 0x37b   : > { %v4372_v26 = vpack.i.bf16 %v6706_v57, %v6636_v28 }
 0x37c   : > { %v6721_v61 = vmul.f32 %v6112_v2, %v3038_v38  ;;  %v7455_v38 = vld [vmem:[#allocation89_spill] sm:$0xff] }
 0x37d   : > { %3547 = vrot.lane.b32.xlu0 %v3531_v49, %s4808_s16  ;;  %2751 = vrot.lane.b32.xlu1 %v2732_v37, %s4808_s16  ;;  %v4357_v49 = vpack.i.bf16 %v6682_v44, %v6575_v7  ;;  %v3114_v37 = vmul.f32 %v7448_v63, %v6679_v33  ;;  %v6727_v63 = vpop.permute.xlu0 %2443 }
 0x37e   : > { %7452 = vst [vmem:[#allocation74_spill] sm:$0xff] %v6727_v63 }
 0x381   : > { %3555 = vrot.lane.b32.xlu0 %v3535_v3, %s4808_s16  ;;  %2759 = vrot.lane.b32.xlu1 %v2736_v11, %s4808_s16  ;;  %v4695_v11 = vpop.eup %4694  ;;  %v4362_v3 = vpack.i.bf16 %v6694_v16, %v6626_v53 }
 0x382   : > { %v3042_v42 = vmul.f32 %v4695_v11, %v6507_v19  ;;  %v6740_v11 = vpop.permute.xlu0 %2523 }
 0x383   : > { %7454 = vst [vmem:[#allocation77_spill] sm:$0xff] %v6740_v11 }
 0x384   : > { %v6732_v19 = vmul.f32 %v6131_v12, %v3042_v42 }
 0x385   : > { %4353 = vrot.lane.b32.xlu0 %v4352_v55, %s4815_s13  ;;  %3129 = vrot.lane.b32.xlu1 %v3110_v15, %s4818_s19  ;;  %v3214_v55 = vmul.f32 %v7450_v22, %v6670_v56  ;;  %v6718_v15 = vmul.f32 %v2956_v32, %v6248_v50  ;;  %v3430_v32 = vmul.f32 %v7453_v52, %v6721_v61  ;;  %v7456_v22 = vld [vmem:[#allocation91_spill] sm:$0xff]  ;;  %v7460_v52 = vld [vmem:[#allocation24_spill] sm:$0xff] }
 0x386   : > { %v6747_v42 = vpop.permute.xlu0 %2531 }
 0x387   : > { %7457 = vst [vmem:[#allocation84_spill] sm:$0xff] %v6747_v42 }
 0x389   : > { %4358 = vrot.lane.b32.xlu0 %v4357_v49, %s4815_s13  ;;  %3137 = vrot.lane.b32.xlu1 %v3114_v37, %s4818_s19  ;;  %v3218_v49 = vmul.f32 %v7451_v13, %v6679_v33  ;;  %v4382_v37 = vpack.i.bf16 %v6718_v15, %v6594_v45 }
 0x38d   : > { %4363 = vrot.lane.b32.xlu0 %v4362_v3, %s4816_s14  ;;  %3233 = vrot.lane.b32.xlu1 %v3214_v55, %s4808_s16  ;;  %v3434_v3 = vmul.f32 %v7455_v38, %v6732_v19  ;;  %v3534_v55 = vmul.f32 %v7456_v22, %v6721_v61  ;;  %v7462_v22 = vld [vmem:[#allocation26_spill] sm:$0xff] }
 0x391   : > { %4373 = vrot.lane.b32.xlu0 %v4372_v26, %s4816_s14  ;;  %3241 = vrot.lane.b32.xlu1 %v3218_v49, %s4808_s16  ;;  %v7458_v26 = vld [vmem:[#allocation93_spill] sm:$0xff]  ;;  %v6752_v49 = vpop.permute.xlu1 %3481 }
 0x392   : > { %v3538_v13 = vmul.f32 %v7458_v26, %v6732_v19  ;;  %v7463_v26 = vld [vmem:[#allocation32_spill] sm:$0xff] }
 0x393   : > { %v2730_v47 = vmul.f32 %v7463_v26, %v6666_v40  ;;  %v7469_v26 = vld [vmem:[#allocation48_spill] sm:$0xff] }
 0x394   : > { %v3112_v41 = vmul.f32 %v7469_v26, %v6587_v58 }
 0x395   : > { %4383 = vrot.lane.b32.xlu0 %v4382_v37, %s4817_s15  ;;  %3449 = vrot.lane.b32.xlu1 %v3430_v32, %s4818_s19  ;;  %v6754_v37 = vpop.permute.xlu0 %2431  ;;  %v2626_v32 = vmul.f32 %v7460_v52, %v6666_v40  ;;  %v6760_v38 = vpop.permute.xlu1 %3485  ;;  %v7465_v52 = vld [vmem:[#allocation34_spill] sm:$0xff] }
 0x396   : > { %7459 = vst [vmem:[#allocation85_spill] sm:$0xff] %v6754_v37 }
 0x399   : > { %3457 = vrot.lane.b32.xlu1 %v3434_v3, %s4818_s19  ;;  %v6762_v3 = vpop.permute.xlu0 %2439  ;;  %v6769_v37 = vpop.permute.xlu1 %3489 }
 0x39a   : > { %7461 = vst [vmem:[#allocation64_spill] sm:$0xff] %v6762_v3 }
 0x39d   : > { %3553 = vrot.lane.b32.xlu1 %v3534_v55, %s4808_s16  ;;  %v2630_v55 = vmul.f32 %v7462_v22, %v6682_v44  ;;  %v6777_v3 = vpop.permute.xlu1 %2437  ;;  %v7468_v22 = vld [vmem:[#allocation44_spill] sm:$0xff] }
 0x39e   : > { %7466 = vst [vmem:[#allocation66_spill] sm:$0xff] %v6777_v3 }
 0x3a1   : > { %3561 = vrot.lane.b32.xlu1 %v3538_v13, %s4808_s16  ;;  %v6771_v13 = vpop.permute.xlu0 %2519 }
 0x3a2   : > { %7464 = vst [vmem:[#allocation25_spill] sm:$0xff] %v6771_v13  ;;  %v6786_v13 = vpop.permute.xlu1 %2445 }
 0x3a3   : > { %7470 = vst [vmem:[#allocation68_spill] sm:$0xff] %v6786_v13 }
 0x3a5   : > { %2643 = vrot.lane.b32.xlu1 %v2626_v32, %s4818_s19  ;;  %v2734_v32 = vmul.f32 %v7465_v52, %v6682_v44  ;;  %v6779_v48 = vpop.permute.xlu0 %2527  ;;  %v7471_v52 = vld [vmem:[#allocation57_spill] sm:$0xff] }
 0x3a6   : > { %7467 = vst [vmem:[#allocation27_spill] sm:$0xff] %v6779_v48  ;;  %v6792_v30 = vpop.permute.xlu1 %2525 }
 0x3a7   : > { %7472 = vst [vmem:[#allocation33_spill] sm:$0xff] %v6792_v30  ;;  %v7487_v30 = vld [vmem:[#allocation53_spill] sm:$0xff] }
 0x3a8   : > { %v2599_v1 = vmul.f32 %v7487_v30, %v6498_v21 }
 0x3a9   : > { %2651 = vrot.lane.b32.xlu1 %v2630_v55, %s4818_s19  ;;  %v3108_v55 = vmul.f32 %v7468_v22, %v6718_v15  ;;  %v7473_v22 = vld [vmem:[#allocation60_spill] sm:$0xff] }
 0x3aa   : > { %v3216_v10 = vmul.f32 %v7473_v22, %v6587_v58  ;;  %v6799_v23 = vpop.permute.xlu1 %2533  ;;  %v7478_v22 = vld [vmem:[#allocation90_spill] sm:$0xff] }
 0x3ab   : > { %7475 = vst [vmem:[#allocation35_spill] sm:$0xff] %v6799_v23  ;;  %v3532_v63 = vmul.f32 %v7478_v22, %v6694_v16  ;;  %v4377_v22 = vpack.i.bf16 %v6732_v19, %v6552_v24 }
 0x3ad   : > { %2747 = vrot.lane.b32.xlu1 %v2730_v47, %s4808_s16  ;;  %v2646_v47 = vpop.permute.xlu0 %2645 }
 0x3b1   : > { %2755 = vrot.lane.b32.xlu1 %v2734_v32, %s4808_s16  ;;  %v3212_v32 = vmul.f32 %v7471_v52, %v6718_v15  ;;  %v2654_v48 = vpop.permute.xlu0 %2653 }
 0x3b2   : > { %v2671_v54 = vsub.f32 %v2599_v1, %v2654_v48 }
 0x3b5   : > { %3125 = vrot.lane.b32.xlu1 %v3108_v55, %s4818_s19  ;;  %v7474_v55 = vld [vmem:[#allocation86_spill] sm:$0xff]  ;;  %v2750_v51 = vpop.permute.xlu0 %2749 }
 0x3b6   : > { %v3428_v26 = vmul.f32 %v7474_v55, %v6694_v16  ;;  %v7480_v55 = vld [vmem:[#allocation92_spill] sm:$0xff] }
 0x3b7   : > { %v3536_v42 = vmul.f32 %v7480_v55, %v6706_v57  ;;  %v4387_v55 = vpack.i.bf16 %v6670_v56, %v6517_v34 }
 0x3b9   : > { %3133 = vrot.lane.b32.xlu1 %v3112_v41, %s4818_s19  ;;  %v7476_v41 = vld [vmem:[#allocation88_spill] sm:$0xff]  ;;  %v2758_v13 = vpop.permute.xlu0 %2757 }
 0x3ba   : > { %v3432_v52 = vmul.f32 %v7476_v41, %v6706_v57 }
 0x3bd   : > { %3229 = vrot.lane.b32.xlu1 %v3212_v32, %s4808_s16  ;;  %v6804_v32 = vpop.permute.xlu1 %2433  ;;  %v3128_v23 = vpop.permute.xlu0 %3127 }
 0x3be   : > { %7477 = vst [vmem:[#allocation70_spill] sm:$0xff] %v6804_v32 }
 0x3c1   : > { %3237 = vrot.lane.b32.xlu1 %v3216_v10, %s4808_s16  ;;  %v6810_v10 = vpop.permute.xlu1 %2441 }
 0x3c2   : > { %7479 = vst [vmem:[#allocation46_spill] sm:$0xff] %v6810_v10 }
 0x3c5   : > { %3445 = vrot.lane.b32.xlu1 %v3428_v26, %s4818_s19  ;;  %v4367_v26 = vpack.i.bf16 %v6721_v61, %v6543_v27  ;;  %v6817_v41 = vpop.permute.xlu1 %2521 }
 0x3c6   : > { %7481 = vst [vmem:[#allocation50_spill] sm:$0xff] %v6817_v41 }
 0x3c9   : > { %3453 = vrot.lane.b32.xlu1 %v3432_v52, %s4818_s19  ;;  %v3136_v52 = vpop.permute.xlu0 %3135  ;;  %s7222_s19 = scalar_lea.sflag [#allocation3], %s332_s27 }
 0x3cd   : > { %3549 = vrot.lane.b32.xlu1 %v3532_v63, %s4808_s16  ;;  %v6823_v63 = vpop.permute.xlu1 %2529  ;;  %v3232_v10 = vpop.permute.xlu0 %3231 }
 0x3ce   : > { %7482 = vst [vmem:[#allocation58_spill] sm:$0xff] %v6823_v63 }
 0x3d1   : > { %3557 = vrot.lane.b32.xlu1 %v3536_v42, %s4808_s16  ;;  %v6830_v32 = vpop.permute.xlu0 %3239 }
 0x3d5   : > { %4368 = vrot.lane.b32.xlu1 %v4367_v26, %s4816_s14  ;;  %v7485_v26 = vld [vmem:[#allocation49_spill] sm:$0xff]  ;;  %v3448_v11 = vpop.permute.xlu0 %3447 }
 0x3d6   : > { %v2595_v8 = vmul.f32 %v7485_v26, %v6491_v62  ;;  %v7489_v26 = vld [vmem:[#allocation61_spill] sm:$0xff] }
 0x3d8   : > { %v2667_v63 = vsub.f32 %v2595_v8, %v2646_v47  ;;  %v7490_v8 = vld [vmem:[#allocation29_spill] sm:$0xff] }
 0x3d9   : > { %4378 = vrot.lane.b32.xlu1 %v4377_v22, %s4816_s14  ;;  %v2596_v22 = vmul.f32 %v7486_v25, %v6611_v39  ;;  %v3456_v47 = vpop.permute.xlu0 %3455 }
 0x3dd   : > { %4388 = vrot.lane.b32.xlu1 %v4387_v55, %s4817_s15 }
 0x3df   : > { %v6828_v42 = vpop.permute.xlu1 %4343 }
 0x3e0   : > { %7483 = vst [vmem:[#allocation62_spill] sm:$0xff] %v6828_v42 }
 0x3e3   : > { %v6832_v41 = vpop.permute.xlu1 %4348 }
 0x3e4   : > { %7484 = vst [vmem:[#allocation87_spill] sm:$0xff] %v6832_v41  ;;  %v2699_v41 = vmul.f32 %v7489_v26, %v6491_v62 }
 0x3e6   : > { %v2771_v42 = vadd.f32 %v2750_v51, %v2699_v41  ;;  %v7494_v41 = vld [vmem:[#allocation38_spill] sm:$0xff] }
 0x3e7   : > { %v2648_v14 = vpop.permute.xlu1 %2647 }
 0x3e8   : > { %v2668_v3 = vsub.f32 %v2596_v22, %v2648_v14  ;;  %v2700_v14 = vmul.f32 %v7490_v8, %v6611_v39  ;;  %v7496_v8 = vld [vmem:[#allocation42_spill] sm:$0xff] }
 0x3ea   : > { %v4392_v55 = vpack.i.bf16 %v2668_v3, %v2667_v63  ;;  %v2703_v3 = vmul.f32 %v7491_v46, %v6498_v21 }
 0x3eb   : > { %v2656_v35 = vpop.permute.xlu1 %2655 }
 0x3ec   : > { %v2672_v60 = vsub.f32 %v2600_v31, %v2656_v35  ;;  %4393 = vrot.lane.b32.xlu1 %v4392_v55, %s4815_s13  ;;  %v7492_v31 = vld [vmem:[#allocation31_spill] sm:$0xff]  ;;  %v2775_v63 = vadd.f32 %v2758_v13, %v2703_v3  ;;  %v3078_v55 = vmul.f32 %v7494_v41, %v6670_v56 }
 0x3ed   : > { %v2704_v48 = vmul.f32 %v7492_v31, %v6615_v59  ;;  %v7495_v59 = vld [vmem:[#allocation72_spill] sm:$0xff] }
 0x3ee   : > { %v4397_v25 = vpack.i.bf16 %v2672_v60, %v2671_v54  ;;  %v3552_v54 = vpop.permute.xlu0 %3551  ;;  %v7493_v60 = vld [vmem:[#allocation37_spill] sm:$0xff] }
 0x3ef   : > { %v2752_v22 = vpop.permute.xlu1 %2751  ;;  %v3077_v39 = vmul.f32 %v7493_v60, %v6517_v34 }
 0x3f0   : > { %v2772_v30 = vadd.f32 %v2752_v22, %v2700_v14  ;;  %4398 = vrot.lane.b32.xlu1 %v4397_v25, %s4815_s13  ;;  %v3082_v14 = vmul.f32 %v7496_v8, %v6679_v33  ;;  %v7502_v8 = vld [vmem:[#allocation78_spill] sm:$0xff] }
 0x3f1   : > { %v3149_v25 = vsub.f32 %v3077_v39, %v3128_v23 }
 0x3f2   : > { %v4402_v1 = vpack.i.bf16 %v2772_v30, %v2771_v42  ;;  %v3081_v42 = vmul.f32 %v7495_v59, %v6526_v29  ;;  %v3560_v22 = vpop.permute.xlu0 %3559 }
 0x3f3   : > { %v2760_v35 = vpop.permute.xlu1 %2759 }
 0x3f4   : > { %v2776_v62 = vadd.f32 %v2760_v35, %v2704_v48  ;;  %4403 = vrot.lane.b32.xlu1 %v4402_v1, %s4815_s13  ;;  %v3153_v46 = vsub.f32 %v3081_v42, %v3136_v52  ;;  %v7497_v1 = vld [vmem:[#allocation81_spill] sm:$0xff]  ;;  %v7498_v48 = vld [vmem:[#allocation54_spill] sm:$0xff] }
 0x3f5   : > { %v3181_v31 = vmul.f32 %v7497_v1, %v6517_v34  ;;  %v3182_v35 = vmul.f32 %v7498_v48, %v6670_v56  ;;  %v7500_v34 = vld [vmem:[#allocation75_spill] sm:$0xff]  ;;  %v7501_v42 = vld [vmem:[#allocation97_spill] sm:$0xff] }
 0x3f6   : > { %v4407_v51 = vpack.i.bf16 %v2776_v62, %v2775_v63  ;;  %v2642_v63 = vpop.permute.xlu0 %2641 }
 0x3f7   : > { %v3130_v26 = vpop.permute.xlu1 %3129  ;;  %v3253_v60 = vadd.f32 %v3232_v10, %v3181_v31  ;;  %v3401_v10 = vmul.f32 %v7501_v42, %v6552_v24  ;;  %v3501_v31 = vmul.f32 %v6649_v4, %v6543_v27 }
 0x3f8   : > { %v3150_v21 = vsub.f32 %v3078_v55, %v3130_v26  ;;  %4408 = vrot.lane.b32.xlu1 %v4407_v51, %s4815_s13  ;;  %v7499_v55 = vld [vmem:[#allocation95_spill] sm:$0xff] }
 0x3f9   : > { %v3397_v26 = vmul.f32 %v7499_v55, %v6543_v27  ;;  %v7503_v27 = vld [vmem:[#allocation56_spill] sm:$0xff] }
 0x3fa   : > { %v4412_v13 = vpack.i.bf16 %v3150_v21, %v3149_v25  ;;  %v2650_v52 = vpop.permute.xlu0 %2649  ;;  %v3398_v25 = vmul.f32 %v7500_v34, %v6721_v61  ;;  %v3186_v4 = vmul.f32 %v7503_v27, %v6679_v33  ;;  %v7505_v34 = vld [vmem:[#allocation83_spill] sm:$0xff] }
 0x3fb   : > { %v3138_v30 = vpop.permute.xlu1 %3137  ;;  %v3469_v59 = vsub.f32 %v3397_v26, %v3448_v11  ;;  %v3502_v11 = vmul.f32 %v6752_v49, %v6721_v61  ;;  %v7504_v49 = vld [vmem:[#allocation20_spill] sm:$0xff] }
 0x3fc   : > { %v3154_v3 = vsub.f32 %v3082_v14, %v3138_v30  ;;  %4413 = vrot.lane.b32.xlu1 %v4412_v13, %s4817_s15  ;;  %v3402_v14 = vmul.f32 %v7502_v8, %v6732_v19 }
 0x3fe   : > { %v4417_v23 = vpack.i.bf16 %v3154_v3, %v3153_v46  ;;  %v2746_v30 = vpop.permute.xlu0 %2745  ;;  %v3473_v3 = vsub.f32 %v3401_v10, %v3456_v47  ;;  %v3506_v47 = vmul.f32 %v6769_v37, %v6732_v19  ;;  %v7507_v10 = vld [vmem:[#allocation51_spill] sm:$0xff] }
 0x3ff   : > { %v3234_v62 = vpop.permute.xlu1 %3233 }
 0x400   : > { %v3254_v39 = vadd.f32 %v3234_v62, %v3182_v35  ;;  %4418 = vrot.lane.b32.xlu1 %v4417_v23, %s4817_s15  ;;  %v3573_v35 = vadd.f32 %v3552_v54, %v3501_v31  ;;  %v2594_v54 = vmul.f32 %v7504_v49, %v6666_v40 }
 0x402   : > { %v4422_v51 = vpack.i.bf16 %v3254_v39, %v3253_v60  ;;  %v2754_v60 = vpop.permute.xlu0 %2753  ;;  %v3505_v39 = vmul.f32 %v6689_v6, %v6552_v24  ;;  %v7506_v24 = vld [vmem:[#allocation47_spill] sm:$0xff] }
 0x403   : > { %v3242_v41 = vpop.permute.xlu1 %3241  ;;  %v2593_v6 = vmul.f32 %v7506_v24, %v6568_v0  ;;  %v7515_v24 = vld [vmem:[#allocation71_spill] sm:$0xff] }
 0x404   : > { %4423 = vrot.lane.b32.xlu1 %v4422_v51, %s4817_s15  ;;  %v3577_v26 = vadd.f32 %v3560_v22, %v3505_v39 }
 0x406   : > { %v3124_v37 = vpop.permute.xlu0 %3123 }
 0x407   : > { %v3450_v21 = vpop.permute.xlu1 %3449 }
 0x408   : > { %v3470_v56 = vsub.f32 %v3398_v25, %v3450_v21  ;;  %v3185_v25 = vmul.f32 %v7505_v34, %v6526_v29  ;;  %v3258_v21 = vadd.f32 %v3242_v41, %v3186_v4 }
 0x40a   : > { %v4427_v13 = vpack.i.bf16 %v3470_v56, %v3469_v59  ;;  %v3257_v22 = vadd.f32 %v6830_v32, %v3185_v25  ;;  %v2665_v56 = vsub.f32 %v2593_v6, %v2642_v63  ;;  %v3132_v32 = vpop.permute.xlu0 %3131  ;;  %v7509_v63 = vld [vmem:[#allocation59_spill] sm:$0xff]  ;;  %v3079_v6 = vmul.f32 %v7515_v24, %v6591_v9 }
 0x40b   : > { %v3458_v46 = vpop.permute.xlu1 %3457  ;;  %v3503_v24 = vmul.f32 %v6672_v17, %v6636_v28 }
 0x40c   : > { %v3474_v1 = vsub.f32 %v3402_v14, %v3458_v46  ;;  %4428 = vrot.lane.b32.xlu1 %v4427_v13, %s4816_s14  ;;  %v2597_v13 = vmul.f32 %v7507_v10, %v6575_v7  ;;  %v4447_v8 = vpack.i.bf16 %v3258_v21, %v3257_v22  ;;  %v7508_v46 = vld [vmem:[#allocation22_spill] sm:$0xff]  ;;  %v7518_v10 = vld [vmem:[#allocation52_spill] sm:$0xff] }
 0x40e   : > { %v4432_v23 = vpack.i.bf16 %v3474_v1, %v3473_v3  ;;  %v2598_v3 = vmul.f32 %v7508_v46, %v6682_v44  ;;  %v2669_v31 = vsub.f32 %v2597_v13, %v2650_v52  ;;  %v7511_v52 = vld [vmem:[#allocation63_spill] sm:$0xff]  ;;  %v3228_v4 = vpop.permute.xlu0 %3227  ;;  %v3180_v13 = vmul.f32 %v7518_v10, %v6718_v15 }
 0x40f   : > { %v3554_v48 = vpop.permute.xlu1 %3553 }
 0x410   : > { %v3574_v62 = vadd.f32 %v3554_v48, %v3502_v11  ;;  %4433 = vrot.lane.b32.xlu1 %v4432_v23, %s4816_s14  ;;  %v2697_v11 = vmul.f32 %v7509_v63, %v6568_v0  ;;  %v7510_v48 = vld [vmem:[#allocation28_spill] sm:$0xff]  ;;  %v7512_v0 = vld [vmem:[#allocation30_spill] sm:$0xff] }
 0x411   : > { %v2702_v27 = vmul.f32 %v7512_v0, %v6682_v44  ;;  %v4537_v44 = vpack.i.bf16 %v6131_v12, %v6118_v5  ;;  %v7517_v5 = vld [vmem:[#allocation80_spill] sm:$0xff] }
 0x412   : > { %v4437_v51 = vpack.i.bf16 %v3574_v62, %v3573_v35  ;;  %v2698_v35 = vmul.f32 %v7510_v48, %v6666_v40  ;;  %v4517_v62 = vpack.i.bf16 %v6679_v33, %v6526_v29  ;;  %v4527_v40 = vpack.i.bf16 %v6112_v2, %v6086_v43 }
 0x413   : > { %v3562_v55 = vpop.permute.xlu1 %3561  ;;  %v3179_v12 = vmul.f32 %v7517_v5, %v6594_v45 }
 0x414   : > { %v3578_v61 = vadd.f32 %v3562_v55, %v3506_v47  ;;  %4438 = vrot.lane.b32.xlu1 %v4437_v51, %s4816_s14  ;;  %v2769_v47 = vadd.f32 %v2746_v30, %v2697_v11  ;;  %v2701_v55 = vmul.f32 %v7511_v52, %v6575_v7  ;;  %v7513_v30 = vld [vmem:[#allocation69_spill] sm:$0xff]  ;;  %v7514_v7 = vld [vmem:[#allocation36_spill] sm:$0xff] }
 0x415   : > { %v3075_v49 = vmul.f32 %v7513_v30, %v6594_v45  ;;  %v3076_v34 = vmul.f32 %v7514_v7, %v6718_v15  ;;  %v3251_v46 = vadd.f32 %v3228_v4, %v3179_v12  ;;  %v7521_v15 = vld [vmem:[#allocation94_spill] sm:$0xff] }
 0x416   : > { %v4442_v19 = vpack.i.bf16 %v3578_v61, %v3577_v26  ;;  %v2773_v29 = vadd.f32 %v2754_v60, %v2701_v55  ;;  %v3236_v60 = vpop.permute.xlu0 %3235 }
 0x417   : > { %v2644_v59 = vpop.permute.xlu1 %2643  ;;  %v3147_v43 = vsub.f32 %v3075_v49, %v3124_v37  ;;  %v7525_v49 = vld [vmem:[#allocation98_spill] sm:$0xff] }
 0x418   : > { %v2666_v42 = vsub.f32 %v2594_v54, %v2644_v59  ;;  %4443 = vrot.lane.b32.xlu1 %v4442_v19, %s4816_s14  ;;  %v7516_v19 = vld [vmem:[#allocation40_spill] sm:$0xff] }
 0x419   : > { %v3080_v59 = vmul.f32 %v7516_v19, %v6587_v58 }
 0x41a   : > { %v4452_v14 = vpack.i.bf16 %v2666_v42, %v2665_v56  ;;  %v3151_v56 = vsub.f32 %v3079_v6, %v3132_v32  ;;  %v7520_v32 = vld [vmem:[#allocation55_spill] sm:$0xff]  ;;  %v3504_v6 = vmul.f32 %v6760_v38, %v6706_v57 }
 0x41b   : > { %v2652_v1 = vpop.permute.xlu1 %2651  ;;  %v3184_v63 = vmul.f32 %v7520_v32, %v6587_v58  ;;  %v7529_v32 = vld [vmem:[#allocation87_spill] sm:$0xff] }
 0x41c   : > { %v2670_v41 = vsub.f32 %v2598_v3, %v2652_v1  ;;  %4448 = vrot.lane.b32.xlu1 %v4447_v8, %s4817_s15  ;;  %4453 = vrot.lane.b32.xlu0 %v4452_v14, %s4815_s13  ;;  %v3444_v8 = vpop.permute.xlu0 %3443  ;;  %v7519_v1 = vld [vmem:[#allocation82_spill] sm:$0xff] }
 0x41e   : > { %v4457_v23 = vpack.i.bf16 %v2670_v41, %v2669_v31  ;;  %v3183_v31 = vmul.f32 %v7519_v1, %v6591_v9 }
 0x41f   : > { %v2748_v39 = vpop.permute.xlu1 %2747 }
 0x420   : > { %v2770_v51 = vadd.f32 %v2748_v39, %v2698_v35  ;;  %4518 = vrot.lane.b32.xlu1 %v4517_v62, %s4817_s15  ;;  %4458 = vrot.lane.b32.xlu0 %v4457_v23, %s4815_s13  ;;  %v3255_v23 = vadd.f32 %v3236_v60, %v3183_v31  ;;  %v3452_v48 = vpop.permute.xlu0 %3451  ;;  %v3395_v35 = vmul.f32 %v7521_v15, %v6626_v53  ;;  %v7522_v39 = vld [vmem:[#allocation73_spill] sm:$0xff] }
 0x422   : > { %v4462_v26 = vpack.i.bf16 %v2770_v51, %v2769_v47  ;;  %v3396_v47 = vmul.f32 %v7522_v39, %v6694_v16  ;;  %v3467_v52 = vsub.f32 %v3395_v35, %v3444_v8 }
 0x423   : > { %v2756_v61 = vpop.permute.xlu1 %2755 }
 0x424   : > { %v2774_v33 = vadd.f32 %v2756_v61, %v2702_v27  ;;  %4528 = vrot.lane.b32.xlu1 %v4527_v40, %s4815_s13  ;;  %4463 = vrot.lane.b32.xlu0 %v4462_v26, %s4815_s13  ;;  %v7523_v26 = vld [vmem:[#allocation96_spill] sm:$0xff]  ;;  %v3548_v61 = vpop.permute.xlu0 %3547 }
 0x425   : > { %v3399_v0 = vmul.f32 %v7523_v26, %v6636_v28  ;;  %v7524_v40 = vld [vmem:[#allocation76_spill] sm:$0xff]  ;;  %v4522_v28 = vpack.i.bf16 %v6248_v50, %v6102_v20  ;;  %v7528_v50 = vld [vmem:[#allocation62_spill] sm:$0xff] }
 0x426   : > { %v4467_v54 = vpack.i.bf16 %v2774_v33, %v2773_v29  ;;  %v3400_v4 = vmul.f32 %v7524_v40, %v6706_v57  ;;  %v4532_v57 = vpack.i.bf16 %v6261_v36, %v6126_v18  ;;  %v4346_v20 = vunpack.i.h.bf16 %v7528_v50 }
 0x427   : > { %v3126_v25 = vpop.permute.xlu1 %3125  ;;  %v3471_v33 = vsub.f32 %v3399_v0, %v3452_v48 }
 0x428   : > { %v3148_v2 = vsub.f32 %v3076_v34, %v3126_v25  ;;  %4538 = vrot.lane.b32.xlu1 %v4537_v44, %s4815_s13  ;;  %4468 = vrot.lane.b32.xlu0 %v4467_v54, %s4815_s13  ;;  %v3499_v54 = vmul.f32 %v7525_v49, %v6626_v53  ;;  %v7526_v34 = vld [vmem:[#allocation79_spill] sm:$0xff]  ;;  %v3556_v60 = vpop.permute.xlu0 %3555 }
 0x429   : > { %v3500_v44 = vmul.f32 %v7526_v34, %v6694_v16 }
 0x42a   : > { %v4472_v21 = vpack.i.bf16 %v3148_v2, %v3147_v43  ;;  %v3571_v43 = vadd.f32 %v3548_v61, %v3499_v54 }
 0x42b   : > { %v3134_v22 = vpop.permute.xlu1 %3133 }
 0x42c   : > { %v3152_v42 = vsub.f32 %v3080_v59, %v3134_v22  ;;  %4473 = vrot.lane.b32.xlu0 %v4472_v21, %s4817_s15  ;;  %v3575_v59 = vadd.f32 %v3556_v60, %v3503_v24 }
 0x42e   : > { %v4477_v37 = vpack.i.bf16 %v3152_v42, %v3151_v56  ;;  %v7527_v56 = vpack.i.bf16 %v6587_v58, %v6591_v9 }
 0x42f   : > { %v3230_v14 = vpop.permute.xlu1 %3229 }
 0x430   : > { %v3252_v3 = vadd.f32 %v3230_v14, %v3180_v13  ;;  %4478 = vrot.lane.b32.xlu0 %v4477_v37, %s4817_s15  ;;  %v4345_v13 = vunpack.i.l.bf16 %v7528_v50 }
 0x432   : > { %v4482_v41 = vpack.i.bf16 %v3252_v3, %v3251_v46 }
 0x433   : > { %v3238_v11 = vpop.permute.xlu1 %3237 }
 0x434   : > { %v3256_v45 = vadd.f32 %v3238_v11, %v3184_v63  ;;  %4483 = vrot.lane.b32.xlu0 %v4482_v41, %s4817_s15  ;;  %v4351_v63 = vunpack.i.h.bf16 %v7529_v32  ;;  %v4350_v11 = vunpack.i.l.bf16 %v7529_v32 }
 0x436   : > { %v4507_v62 = vpack.i.bf16 %v3256_v45, %v3255_v23 }
 0x437   : > { %v3446_v51 = vpop.permute.xlu1 %3445 }
 0x438   : > { %v3468_v55 = vsub.f32 %v3396_v47, %v3446_v51 }
 0x43a   : > { %v4487_v27 = vpack.i.bf16 %v3468_v55, %v3467_v52 }
 0x43b   : > { %v3454_v29 = vpop.permute.xlu1 %3453 }
 0x43c   : > { %v3472_v30 = vsub.f32 %v3400_v4, %v3454_v29  ;;  %4488 = vrot.lane.b32.xlu0 %v4487_v27, %s4816_s14 }
 0x43e   : > { %v4492_v7 = vpack.i.bf16 %v3472_v30, %v3471_v33 }
 0x43f   : > { %v3550_v25 = vpop.permute.xlu1 %3549 }
 0x440   : > { %v3572_v2 = vadd.f32 %v3550_v25, %v3500_v44  ;;  %4493 = vrot.lane.b32.xlu0 %v4492_v7, %s4816_s14 }
 0x442   : > { %v4497_v21 = vpack.i.bf16 %v3572_v2, %v3571_v43 }
 0x443   : > { %v3558_v19 = vpop.permute.xlu1 %3557 }
 0x444   : > { %v3576_v53 = vadd.f32 %v3558_v19, %v3504_v6  ;;  %4498 = vrot.lane.b32.xlu0 %v4497_v21, %s4816_s14 }
 0x446   : > { %v4502_v22 = vpack.i.bf16 %v3576_v53, %v3575_v59 }
 0x447   : > { %v4369_v16 = vpop.permute.xlu1 %4368 }
 0x448   : > { %4503 = vrot.lane.b32.xlu0 %v4502_v22, %s4816_s14  ;;  %v4371_v33 = vunpack.i.h.bf16 %v4369_v16  ;;  %v4370_v30 = vunpack.i.l.bf16 %v4369_v16  ;;  %s3922_s14 = sshll.u32 %s7109_s30, 4  ;;  %s7206_s14 = int_to_ptr.vmem [resolvable:$true] %s3922_s14 }
 0x449   : > { %s4719_s20 = scalar_lea.vmem %s7206_s14, 512 }
 0x44a   : > { %p4720_p10 = scmp.ne.s32.totalorder %s7206_s14, %s4719_s20 }
 0x44b   : > { %v6970_v17 = vpop.permute.xlu1 %4378 }
 0x44c   : > { %4508 = vrot.lane.b32.xlu0 %v4507_v62, %s4817_s15  ;;  %v6998_v62 = vpop.permute.xlu0 %4353  ;;  %v4381_v59 = vunpack.i.h.bf16 %v6970_v17  ;;  %v4380_v53 = vunpack.i.l.bf16 %v6970_v17  ;;  %p4721_p11 = pnand %p4720_p10, %p4896_p4 }
 0x44e   : > { %p4722_p13 = pneg %p4721_p11 }
 0x44f   : > { %v6976_v38 = vpop.permute.xlu1 %4388 }
 0x450   : > { %4513 = vrot.lane.b32.xlu0 %v7527_v56, %s4817_s15  ;;  %v7000_v47 = vpop.permute.xlu0 %4358  ;;  %v4391_v17 = vunpack.i.h.bf16 %v6976_v38 }
 0x454   : > { %4523 = vrot.lane.b32.xlu0 %v4522_v28, %s4815_s13  ;;  %v7002_v52 = vpop.permute.xlu0 %4363 }
 0x458   : > { %4533 = vrot.lane.b32.xlu0 %v4532_v57, %s4815_s13  ;;  %v7004_v0 = vpop.permute.xlu0 %4373  ;;  %s4203_s13 = sshll.u32 %s4791_s24, 9 }
 0x459   : > { %s7204_s17 = scalar_lea.hbm %s7288_s6, %s4203_s13 }
 0x45c   : > { %v7008_v34 = vpop.permute.xlu0 %4383 }
 0x45e   : > { %v4394_v42 = vpop.permute.xlu1 %4393 }
 0x45f   : > { %v4396_v37 = vunpack.i.h.bf16 %v4394_v42  ;;  %v4395_v58 = vunpack.i.l.bf16 %v4394_v42 }
 0x462   : > { %v4399_v5 = vpop.permute.xlu1 %4398 }
 0x463   : > { %v4401_v3 = vunpack.i.h.bf16 %v4399_v5  ;;  %v4400_v1 = vunpack.i.l.bf16 %v4399_v5 }
 0x466   : > { %v4404_v12 = vpop.permute.xlu1 %4403 }
 0x467   : > { %v4406_v9 = vunpack.i.h.bf16 %v4404_v12  ;;  %v4405_v10 = vunpack.i.l.bf16 %v4404_v12 }
 0x469   : > { %v2876_v8 = vsel %vm2551_vm4, %v4396_v37, %v4406_v9  ;;  %v2875_v36 = vsel %vm2551_vm4, %v4395_v58, %v4405_v10  ;;  %v4390_v9 = vunpack.i.l.bf16 %v6976_v38 }
 0x46a   : > { %v4409_v18 = vpop.permute.xlu1 %4408  ;;  %v6983_v14 = vsel %vm2560_vm9, %v2875_v36, %v4345_v13  ;;  %v6986_v46 = vsel %vm2560_vm9, %v2876_v8, %v4346_v20 }
 0x46b   : > { %v4411_v31 = vunpack.i.h.bf16 %v4409_v18  ;;  %v4410_v41 = vunpack.i.l.bf16 %v4409_v18 }
 0x46d   : > { %v2880_v23 = vsel %vm2551_vm4, %v4401_v3, %v4411_v31  ;;  %v2879_v45 = vsel %vm2551_vm4, %v4400_v1, %v4410_v41 }
 0x46e   : > { %v4414_v48 = vpop.permute.xlu1 %4413  ;;  %v6993_v15 = vsel %vm2560_vm9, %v2879_v45, %v4350_v11  ;;  %v6996_v35 = vsel %vm2560_vm9, %v2880_v23, %v4351_v63 }
 0x46f   : > { %v4416_v22 = vunpack.i.h.bf16 %v4414_v48  ;;  %v4415_v16 = vunpack.i.l.bf16 %v4414_v48 }
 0x472   : > { %v4419_v39 = vpop.permute.xlu1 %4418 }
 0x473   : > { %v4421_v36 = vunpack.i.h.bf16 %v4419_v39  ;;  %v4420_v18 = vunpack.i.l.bf16 %v4419_v39 }
 0x476   : > { %v4424_v51 = vpop.permute.xlu1 %4423 }
 0x477   : > { %v4426_v49 = vunpack.i.h.bf16 %v4424_v51  ;;  %v4425_v44 = vunpack.i.l.bf16 %v4424_v51 }
 0x479   : > { %v3358_v57 = vsel %vm2551_vm4, %v4416_v22, %v4426_v49  ;;  %v3357_v42 = vsel %vm2551_vm4, %v4415_v16, %v4425_v44 }
 0x47a   : > { %v3365_v13 = vsel %vm2560_vm9, %v3357_v42, %v4390_v9  ;;  %v3366_v8 = vsel %vm2560_vm9, %v3358_v57, %v4391_v17  ;;  %v4366_v57 = vunpack.i.h.bf16 %v7002_v52  ;;  %v4365_v42 = vunpack.i.l.bf16 %v7002_v52 }
 0x47b   : > { %v4552_v38 = vpack.i.bf16 %v3366_v8, %v3365_v13  ;;  %v4376_v52 = vunpack.i.h.bf16 %v7004_v0 }
 0x47e   : > { %v4429_v55 = vpop.permute.xlu1 %4428 }
 0x47f   : > { %v4431_v40 = vunpack.i.h.bf16 %v4429_v55  ;;  %v4430_v4 = vunpack.i.l.bf16 %v4429_v55 }
 0x482   : > { %v4434_v26 = vpop.permute.xlu1 %4433 }
 0x483   : > { %v4436_v25 = vunpack.i.h.bf16 %v4434_v26  ;;  %v4435_v24 = vunpack.i.l.bf16 %v4434_v26 }
 0x486   : > { %v4439_v27 = vpop.permute.xlu1 %4438 }
 0x487   : > { %v4441_v61 = vunpack.i.h.bf16 %v4439_v27  ;;  %v4440_v29 = vunpack.i.l.bf16 %v4439_v27  ;;  %v4356_v27 = vunpack.i.h.bf16 %v6998_v62 }
 0x489   : > { %v3678_v54 = vsel %vm2551_vm4, %v4431_v40, %v4441_v61  ;;  %v3677_v7 = vsel %vm2551_vm4, %v4430_v4, %v4440_v29  ;;  %v4355_v40 = vunpack.i.l.bf16 %v6998_v62  ;;  %v4360_v62 = vunpack.i.l.bf16 %v7000_v47 }
 0x48a   : > { %v4444_v43 = vpop.permute.xlu1 %4443  ;;  %v3685_v2 = vsel %vm2560_vm9, %v3677_v7, %v4370_v30  ;;  %v3686_v60 = vsel %vm2560_vm9, %v3678_v54, %v4371_v33 }
 0x48b   : > { %v4446_v6 = vunpack.i.h.bf16 %v4444_v43  ;;  %v4445_v21 = vunpack.i.l.bf16 %v4444_v43  ;;  %v4542_v19 = vpack.i.bf16 %v3686_v60, %v3685_v2 }
 0x48d   : > { %v3682_v56 = vsel %vm2551_vm4, %v4436_v25, %v4446_v6  ;;  %v3681_v28 = vsel %vm2551_vm4, %v4435_v24, %v4445_v21  ;;  %4543 = vrot.lane.b32.xlu1 %v4542_v19, %s4812_s8  ;;  %v4361_v25 = vunpack.i.h.bf16 %v7000_v47 }
 0x48e   : > { %v4449_v5 = vpop.permute.xlu1 %4448  ;;  %v4454_v12 = vpop.permute.xlu0 %4453  ;;  %v3689_v37 = vsel %vm2560_vm9, %v3681_v28, %v4380_v53  ;;  %v3690_v58 = vsel %vm2560_vm9, %v3682_v56, %v4381_v59 }
 0x48f   : > { %v4451_v10 = vunpack.i.h.bf16 %v4449_v5  ;;  %v4450_v50 = vunpack.i.l.bf16 %v4449_v5  ;;  %v4547_v20 = vpack.i.bf16 %v3690_v58, %v3689_v37  ;;  %v4456_v39 = vunpack.i.h.bf16 %v4454_v12 }
 0x490   : > { %v4455_v51 = vunpack.i.l.bf16 %v4454_v12 }
 0x491   : > { %4548 = vrot.lane.b32.xlu1 %v4547_v20, %s4812_s8  ;;  %v3362_v32 = vsel %vm2551_vm4, %v4421_v36, %v4451_v10  ;;  %v3361_v63 = vsel %vm2551_vm4, %v4420_v18, %v4450_v50 }
 0x492   : > { %v4519_v3 = vpop.permute.xlu1 %4518  ;;  %v4459_v1 = vpop.permute.xlu0 %4458 }
 0x493   : > { %v4521_v31 = vunpack.i.h.bf16 %v4519_v3  ;;  %v4520_v41 = vunpack.i.l.bf16 %v4519_v3  ;;  %v4461_v49 = vunpack.i.h.bf16 %v4459_v1  ;;  %v4460_v54 = vunpack.i.l.bf16 %v4459_v1 }
 0x494   : > { %v4375_v1 = vunpack.i.l.bf16 %v7004_v0 }
 0x495   : > { %v3369_v11 = vsel %vm2560_vm9, %v3361_v63, %v4520_v41  ;;  %v3370_v23 = vsel %vm2560_vm9, %v3362_v32, %v4521_v31  ;;  %4553 = vrot.lane.b32.xlu1 %v4552_v38, %s4812_s8  ;;  %v4386_v38 = vunpack.i.h.bf16 %v7008_v34 }
 0x496   : > { %v4577_v45 = vpack.i.bf16 %v3370_v23, %v3369_v11  ;;  %v4464_v48 = vpop.permute.xlu0 %4463  ;;  %v4385_v11 = vunpack.i.l.bf16 %v7008_v34 }
 0x497   : > { %v4466_v55 = vunpack.i.h.bf16 %v4464_v48  ;;  %v4465_v26 = vunpack.i.l.bf16 %v4464_v48 }
 0x499   : > { %v2873_v4 = vsel %vm2551_vm4, %v4455_v51, %v4465_v26  ;;  %v2874_v61 = vsel %vm2551_vm4, %v4456_v39, %v4466_v55  ;;  %4578 = vrot.lane.b32.xlu1 %v4577_v45, %s4812_s8 }
 0x49a   : > { %v4469_v29 = vpop.permute.xlu0 %4468  ;;  %v7037_v33 = vsel %vm2560_vm9, %v2873_v4, %v4355_v40  ;;  %v7040_v30 = vsel %vm2560_vm9, %v2874_v61, %v4356_v27 }
 0x49b   : > { %v4471_v7 = vunpack.i.h.bf16 %v4469_v29  ;;  %v4470_v44 = vunpack.i.l.bf16 %v4469_v29 }
 0x49d   : > { %v2877_v43 = vsel %vm2551_vm4, %v4460_v54, %v4470_v44  ;;  %v2878_v2 = vsel %vm2551_vm4, %v4461_v49, %v4471_v7 }
 0x49e   : > { %v4474_v60 = vpop.permute.xlu0 %4473  ;;  %v7047_v24 = vsel %vm2560_vm9, %v2877_v43, %v4360_v62  ;;  %v7050_v6 = vsel %vm2560_vm9, %v2878_v2, %v4361_v25  ;;  %v4529_v62 = vpop.permute.xlu1 %4528  ;;  %v7530_v2 = vld [vmem:[#allocation99_spill] sm:$0xff] }
 0x49f   : > { %v4476_v5 = vunpack.i.h.bf16 %v4474_v60  ;;  %v4475_v9 = vunpack.i.l.bf16 %v4474_v60  ;;  %v7531_v60 = vld [vmem:[#allocation9_spill] sm:$0xff] }
 0x4a2   : > { %v4479_v21 = vpop.permute.xlu0 %4478  ;;  %v4539_v43 = vpop.permute.xlu1 %4538 }
 0x4a3   : > { %v4481_v27 = vunpack.i.h.bf16 %v4479_v21  ;;  %v4480_v40 = vunpack.i.l.bf16 %v4479_v21  ;;  %v2378_v21 = vmul.f32 %v7531_v60, %v7530_v2 }
 0x4a6   : > { %v4484_v19 = vpop.permute.xlu0 %4483 }
 0x4a7   : > { %v4486_v12 = vunpack.i.h.bf16 %v4484_v19  ;;  %v4485_v37 = vunpack.i.l.bf16 %v4484_v19 }
 0x4a9   : > { %v3355_v31 = vsel %vm2551_vm4, %v4475_v9, %v4485_v37  ;;  %v3356_v41 = vsel %vm2551_vm4, %v4476_v5, %v4486_v12  ;;  %v7537_v12 = vld [vmem:[#allocation19_spill] sm:$0xff]  ;;  %v7538_v9 = vld [vmem:[#allocation13_spill] sm:$0xff] }
 0x4aa   : > { %v3363_v55 = vsel %vm2560_vm9, %v3355_v31, %v4385_v11  ;;  %v3364_v26 = vsel %vm2560_vm9, %v3356_v41, %v4386_v38  ;;  %v7542_v41 = vld [vmem:[#allocation104_spill] sm:$0xff] }
 0x4ab   : > { %v4567_v29 = vpack.i.bf16 %v3364_v26, %v3363_v55  ;;  %v7546_v55 = vld [vmem:[#allocation35_spill] sm:$0xff] }
 0x4ae   : > { %v4489_v59 = vpop.permute.xlu0 %4488 }
 0x4af   : > { %v4491_v16 = vunpack.i.h.bf16 %v4489_v59  ;;  %v4490_v56 = vunpack.i.l.bf16 %v4489_v59  ;;  %v7532_v59 = vld [vmem:[#allocation100_spill] sm:$0xff] }
 0x4b0   : > { %v2502_v37 = vmul.f32 %v7537_v12, %v7532_v59 }
 0x4b2   : > { %v4494_v53 = vpop.permute.xlu0 %4493  ;;  %v2550_v26 = vadd.f32 %v7546_v55, %v2502_v37  ;;  %v7561_v55 = vld [vmem:[#allocation50_spill] sm:$0xff] }
 0x4b3   : > { %v4496_v10 = vunpack.i.h.bf16 %v4494_v53  ;;  %v4495_v8 = vunpack.i.l.bf16 %v4494_v53  ;;  %v7533_v53 = vld [vmem:[#allocation11_spill] sm:$0xff] }
 0x4b6   : > { %v4499_v22 = vpop.permute.xlu0 %4498 }
 0x4b7   : > { %v4501_v28 = vunpack.i.h.bf16 %v4499_v22  ;;  %v4500_v47 = vunpack.i.l.bf16 %v4499_v22  ;;  %v2382_v22 = vmul.f32 %v7533_v53, %v7532_v59 }
 0x4b9   : > { %v3675_v58 = vsel %vm2551_vm4, %v4490_v56, %v4500_v47  ;;  %v3676_v17 = vsel %vm2551_vm4, %v4491_v16, %v4501_v28  ;;  %v7534_v16 = vld [vmem:[#allocation17_spill] sm:$0xff] }
 0x4ba   : > { %v4504_v50 = vpop.permute.xlu0 %4503  ;;  %v3683_v20 = vsel %vm2560_vm9, %v3675_v58, %v4365_v42  ;;  %v3684_v13 = vsel %vm2560_vm9, %v3676_v17, %v4366_v57  ;;  %v2498_v56 = vmul.f32 %v7534_v16, %v7530_v2  ;;  %v7535_v57 = vld [vmem:[#allocation103_spill] sm:$0xff]  ;;  %v7536_v42 = vld [vmem:[#allocation41_spill] sm:$0xff]  ;;  %v4531_v58 = vunpack.i.h.bf16 %v4529_v62 }
 0x4bb   : > { %v4506_v36 = vunpack.i.h.bf16 %v4504_v50  ;;  %v4505_v18 = vunpack.i.l.bf16 %v4504_v50  ;;  %v4557_v3 = vpack.i.bf16 %v3684_v13, %v3683_v20  ;;  %v2497_v5 = vmul.f32 %v7536_v42, %v7535_v57  ;;  %v7539_v50 = vld [vmem:[#allocation33_spill] sm:$0xff] }
 0x4bc   : > { %v4530_v17 = vunpack.i.l.bf16 %v4529_v62  ;;  %v2546_v20 = vadd.f32 %v7539_v50, %v2498_v56 }
 0x4bd   : > { %v3679_v32 = vsel %vm2551_vm4, %v4495_v8, %v4505_v18  ;;  %v3680_v63 = vsel %vm2551_vm4, %v4496_v10, %v4506_v36  ;;  %4558 = vrot.lane.b32.xlu0 %v4557_v3, %s4812_s8  ;;  %v2377_v10 = vmul.f32 %v7538_v9, %v7535_v57  ;;  %v7540_v36 = vld [vmem:[#allocation77_spill] sm:$0xff] }
 0x4be   : > { %v4509_v23 = vpop.permute.xlu0 %4508  ;;  %v3687_v45 = vsel %vm2560_vm9, %v3679_v32, %v4375_v1  ;;  %v3688_v48 = vsel %vm2560_vm9, %v3680_v63, %v4376_v52  ;;  %v2545_v18 = vadd.f32 %v7540_v36, %v2497_v5  ;;  %v7541_v1 = vld [vmem:[#allocation66_spill] sm:$0xff]  ;;  %v7543_v32 = vld [vmem:[#allocation15_spill] sm:$0xff]  ;;  %v7551_v36 = vld [vmem:[#allocation8_spill] sm:$0xff] }
 0x4bf   : > { %v4562_v0 = vpack.i.bf16 %v3688_v48, %v3687_v45  ;;  %v4511_v39 = vunpack.i.h.bf16 %v4509_v23  ;;  %v4510_v51 = vunpack.i.l.bf16 %v4509_v23  ;;  %v2458_v31 = vsub.f32 %v2378_v21, %v7541_v1  ;;  %v7544_v45 = vld [vmem:[#allocation67_spill] sm:$0xff]  ;;  %v7545_v48 = vld [vmem:[#allocation45_spill] sm:$0xff] }
 0x4c0   : > { %v2381_v63 = vmul.f32 %v7543_v32, %v7542_v41 }
 0x4c1   : > { %4563 = vrot.lane.b32.xlu0 %v4562_v0, %s4812_s8  ;;  %v3359_v49 = vsel %vm2551_vm4, %v4480_v40, %v4510_v51  ;;  %v3360_v54 = vsel %vm2551_vm4, %v4481_v27, %v4511_v39  ;;  %v2555_v51 = vsel %vm2551_vm4, %v2458_v31, %v2546_v20  ;;  %v4541_v27 = vunpack.i.h.bf16 %v4539_v43 }
 0x4c2   : > { %v4514_v4 = vpop.permute.xlu0 %4513  ;;  %v4540_v40 = vunpack.i.l.bf16 %v4539_v43  ;;  %v2564_v56 = vsel %vm2560_vm9, %v2555_v51, %v7530_v2 }
 0x4c3   : > { %v4516_v61 = vunpack.i.h.bf16 %v4514_v4  ;;  %v4515_v34 = vunpack.i.l.bf16 %v4514_v4 }
 0x4c5   : > { %v3367_v7 = vsel %vm2560_vm9, %v3359_v49, %v4515_v34  ;;  %v3368_v44 = vsel %vm2560_vm9, %v3360_v54, %v4516_v61  ;;  %4568 = vrot.lane.b32.xlu0 %v4567_v29, %s4812_s8  ;;  %v7547_v61 = vld [vmem:[#allocation84_spill] sm:$0xff]  ;;  %v7548_v54 = vld [vmem:[#allocation74_spill] sm:$0xff] }
 0x4c6   : > { %v4572_v25 = vpack.i.bf16 %v3368_v44, %v3367_v7  ;;  %v2461_v7 = vsub.f32 %v2381_v63, %v7548_v54  ;;  %v7549_v44 = vld [vmem:[#allocation68_spill] sm:$0xff]  ;;  %v4524_v20 = vpop.permute.xlu0 %4523 }
 0x4c9   : > { %4573 = vrot.lane.b32.xlu0 %v4572_v25, %s4812_s8  ;;  %v2462_v25 = vsub.f32 %v2382_v22, %v7549_v44  ;;  %s4186_s8 = sshll.u32 %s4934_s18, 5 }
 0x4ca   : > { %s7139_s12 = scalar_lea.vmem %s7287_s5, %s4186_s8  ;;  %s4723_s8 = sshll.u32 %s4819_s28, 4  ;;  %s4724_s8 = int_to_ptr.vmem [resolvable:$false] %s4723_s8 }
 0x4cb   : > { %s4725_s18 = scalar_lea.vmem %s4724_s8, 1024  ;;  %p4726_p0 = scmp.lt.s32.totalorder %s7206_s14, %s4724_s8 }
 0x4cc   : > { %p4727_p1 = scmp.lt.s32.totalorder %s4725_s18, %s4719_s20 }
 0x4ce   : > { %p4728_p2 = por %p4727_p1, %p4726_p0 }
 0x4d0   : > { %p4729_p3 = pnand %p4728_p2, %p4722_p13 }
 0x4ff   : > { %v4544_v19 = vpop.permute.xlu1 %4543 }
 0x500   : > { %v4546_v28 = vunpack.i.h.bf16 %v4544_v19  ;;  %v4545_v47 = vunpack.i.l.bf16 %v4544_v19 }
 0x502   : > { %v3798_v13 = vsel %vm565_vm1, %v6986_v46, %v4546_v28  ;;  %v3797_v8 = vsel %vm565_vm1, %v6983_v14, %v4545_v47  ;;  %v2457_v46 = vsub.f32 %v2377_v10, %v7544_v45  ;;  %v2501_v14 = vmul.f32 %v7545_v48, %v7542_v41  ;;  %v7558_v45 = vld [vmem:[#allocation39_spill] sm:$0xff] }
 0x503   : > { %v3805_v3 = vsel %vm387_vm0, %v3797_v8, %v4530_v17  ;;  %v3806_v52 = vsel %vm387_vm0, %v3798_v13, %v4531_v58  ;;  %v4549_v23 = vpop.permute.xlu1 %4548  ;;  %v4534_v13 = vpop.permute.xlu0 %4533  ;;  %v7550_v8 = vld [vmem:[#allocation101_spill] sm:$0xff] }
 0x504   : > { %v4197_v38 = vpack.c.bf16 %v3805_v3, %v3805_v3  ;;  %v4198_v11 = vpack.c.bf16 %v3806_v52, %v3806_v52  ;;  %v4551_v0 = vunpack.i.h.bf16 %v4549_v23  ;;  %v4550_v39 = vunpack.i.l.bf16 %v4549_v23  ;;  %v7552_v3 = vld [vmem:[#allocation102_spill] sm:$0xff] }
 0x505   : > { %v2554_v4 = vsel %vm2551_vm4, %v2457_v46, %v2545_v18  ;;  %v2549_v34 = vadd.f32 %v7547_v61, %v2501_v14  ;;  %v2376_v18 = vmul.f32 %v7551_v36, %v7550_v8  ;;  %v7553_v52 = vld [vmem:[#allocation10_spill] sm:$0xff] }
 0x506   : > { %3887 = vst.msk [vmem:[%s7109_s30 + $0x8] sm:$0xf] %vm3884_vm5, %v4197_v38  ;;  %3888 = vst.msk [vmem:[%s7109_s30 + $0xc] sm:$0xf] %vm3884_vm5, %v4198_v11  ;;  %v3802_v29 = vsel %vm565_vm1, %v6996_v35, %v4551_v0  ;;  %v3801_v49 = vsel %vm565_vm1, %v6993_v15, %v4550_v39  ;;  %v2559_v35 = vsel %vm2551_vm4, %v2462_v25, %v2550_v26  ;;  %v7556_v38 = vld [vmem:[#allocation105_spill] sm:$0xff]  ;;  %v7557_v11 = vld [vmem:[#allocation12_spill] sm:$0xff] }
 0x507   : > { %v3810_v62 = vsel %vm387_vm0, %v3802_v29, %v4541_v27  ;;  %v3809_v43 = vsel %vm387_vm0, %v3801_v49, %v4540_v40  ;;  %v4554_v60 = vpop.permute.xlu1 %4553  ;;  %v2563_v15 = vsel %vm2560_vm9, %v2554_v4, %v7535_v57  ;;  %v2558_v22 = vsel %vm2551_vm4, %v2461_v7, %v2549_v34  ;;  %v7559_v0 = vld [vmem:[#allocation106_spill] sm:$0xff]  ;;  %v7562_v4 = vld [vmem:[#allocation25_spill] sm:$0xff]  ;;  %v7563_v34 = vld [vmem:[#allocation43_spill] sm:$0xff] }
 0x508   : > { %v4202_v21 = vpack.c.bf16 %v3810_v62, %v3810_v62  ;;  %v4201_v19 = vpack.c.bf16 %v3809_v43, %v3809_v43  ;;  %v4556_v53 = vunpack.i.h.bf16 %v4554_v60  ;;  %v4555_v16 = vunpack.i.l.bf16 %v4554_v60  ;;  %v7560_v39 = vld [vmem:[#allocation14_spill] sm:$0xff]  ;;  %v7564_v7 = vld [vmem:[#allocation85_spill] sm:$0xff] }
 0x509   : > { %v2567_v37 = vsel %vm2560_vm9, %v2558_v22, %v7542_v41  ;;  %v2568_v58 = vsel %vm2560_vm9, %v2559_v35, %v7532_v59  ;;  %v2380_v1 = vmul.f32 %v7553_v52, %v7552_v3  ;;  %v7554_v59 = vld [vmem:[#allocation16_spill] sm:$0xff]  ;;  %v7555_v41 = vld [vmem:[#allocation18_spill] sm:$0xff]  ;;  %v2375_v23 = vmul.f32 %v7557_v11, %v7556_v38 }
 0x50a   : > { %3891 = vst.msk [vmem:[%s7109_s30 + $0x18] sm:$0xf] %vm3884_vm5, %v4201_v19  ;;  %3892 = vst.msk [vmem:[%s7109_s30 + $0x1c] sm:$0xf] %vm3884_vm5, %v4202_v21  ;;  %v3726_v28 = vsel %vm565_vm1, %v2564_v56, %v4556_v53  ;;  %v3725_v2 = vsel %vm565_vm1, %v2563_v15, %v4555_v16  ;;  %v2496_v31 = vmul.f32 %v7554_v59, %v7550_v8  ;;  %v4526_v27 = vunpack.i.h.bf16 %v4524_v20  ;;  %v7565_v25 = vld [vmem:[#allocation70_spill] sm:$0xff] }
 0x50b   : > { %v4190_v47 = vpack.c.bf16 %v3726_v28, %v3726_v28  ;;  %v4189_v57 = vpack.c.bf16 %v3725_v2, %v3725_v2  ;;  %v4579_v42 = vpop.permute.xlu1 %4578  ;;  %v2500_v32 = vmul.f32 %v7555_v41, %v7552_v3  ;;  %v2495_v46 = vmul.f32 %v7558_v45, %v7556_v38  ;;  %v7566_v15 = vld [vmem:[#allocation58_spill] sm:$0xff]  ;;  %v7567_v2 = vld [vmem:[#allocation27_spill] sm:$0xff] }
 0x50c   : > { %v4581_v5 = vunpack.i.h.bf16 %v4579_v42  ;;  %v4580_v12 = vunpack.i.l.bf16 %v4579_v42  ;;  %v2379_v51 = vmul.f32 %v7560_v39, %v7559_v0  ;;  %v2544_v26 = vadd.f32 %v7561_v55, %v2496_v31 }
 0x50d   : > { %3847 = vst.msk [vmem:[%s7139_s12 + $0xc] sm:$0xf] %vm3843_vm13, %v4190_v47  ;;  %3846 = vst.msk [vmem:[%s7139_s12 + $0x8] sm:$0xf] %vm3843_vm13, %v4189_v57  ;;  %v4525_v40 = vunpack.i.l.bf16 %v4524_v20  ;;  %v2543_v61 = vadd.f32 %v7562_v4, %v2495_v46  ;;  %v2499_v29 = vmul.f32 %v7563_v34, %v7559_v0  ;;  %v2455_v44 = vsub.f32 %v2375_v23, %v7564_v7 }
 0x50e   : > { %v3730_v17 = vsel %vm565_vm1, %v2568_v58, %v4581_v5  ;;  %v3729_v9 = vsel %vm565_vm1, %v2567_v37, %v4580_v12  ;;  %v2456_v62 = vsub.f32 %v2376_v18, %v7565_v25  ;;  %v4536_v56 = vunpack.i.h.bf16 %v4534_v13  ;;  %v7568_v5 = vld [vmem:[#allocation64_spill] sm:$0xff]  ;;  %v7569_v37 = vld [vmem:[#allocation46_spill] sm:$0xff] }
 0x50f   : > { %v4194_v10 = vpack.c.bf16 %v3730_v17, %v3730_v17  ;;  %v4193_v50 = vpack.c.bf16 %v3729_v9, %v3729_v9  ;;  %v4535_v22 = vunpack.i.l.bf16 %v4534_v13  ;;  %v2552_v28 = vsel %vm2551_vm4, %v2455_v44, %v2543_v61 }
 0x510   : > { %v2547_v47 = vadd.f32 %v7567_v2, %v2499_v29  ;;  %v2459_v12 = vsub.f32 %v2379_v51, %v7568_v5  ;;  %v2460_v58 = vsub.f32 %v2380_v1, %v7569_v37  ;;  %v2561_v13 = vsel %vm2560_vm9, %v2552_v28, %v7556_v38 }
 0x511   : > { %3851 = vst.msk [vmem:[%s7139_s12 + $0x1c] sm:$0xf] %vm3843_vm13, %v4194_v10  ;;  %3850 = vst.msk [vmem:[%s7139_s12 + $0x18] sm:$0xf] %vm3843_vm13, %v4193_v50 }
 0x512   : > { %v2556_v18 = vsel %vm2551_vm4, %v2459_v12, %v2547_v47 }
 0x52f   : > { %v4559_v63 = vpop.permute.xlu0 %4558 }
 0x530   : > { %v4561_v48 = vunpack.i.h.bf16 %v4559_v63  ;;  %v4560_v14 = vunpack.i.l.bf16 %v4559_v63 }
 0x532   : > { %v3795_v49 = vsel %vm565_vm1, %v7037_v33, %v4560_v14  ;;  %v3796_v54 = vsel %vm565_vm1, %v7040_v30, %v4561_v48  ;;  %v2553_v33 = vsel %vm2551_vm4, %v2456_v62, %v2544_v26  ;;  %v2548_v30 = vadd.f32 %v7566_v15, %v2500_v32 }
 0x533   : > { %v3803_v43 = vsel %vm387_vm0, %v3795_v49, %v4525_v40  ;;  %v3804_v60 = vsel %vm387_vm0, %v3796_v54, %v4526_v27  ;;  %v4564_v21 = vpop.permute.xlu0 %4563  ;;  %v2562_v36 = vsel %vm2560_vm9, %v2553_v33, %v7550_v8 }
 0x534   : > { %v4195_v19 = vpack.c.bf16 %v3803_v43, %v3803_v43  ;;  %v4196_v53 = vpack.c.bf16 %v3804_v60, %v3804_v60  ;;  %v4566_v16 = vunpack.i.h.bf16 %v4564_v21  ;;  %v4565_v35 = vunpack.i.l.bf16 %v4564_v21 }
 0x535   : > { %v2557_v52 = vsel %vm2551_vm4, %v2460_v58, %v2548_v30 }
 0x536   : > { %3885 = vst.msk [vmem:[%s7109_s30] sm:$0xf] %vm3884_vm5, %v4195_v19  ;;  %3886 = vst.msk [vmem:[%s7109_s30 + $0x4] sm:$0xf] %vm3884_vm5, %v4196_v53  ;;  %v3799_v57 = vsel %vm565_vm1, %v7047_v24, %v4565_v35  ;;  %v3800_v42 = vsel %vm565_vm1, %v7050_v6, %v4566_v16 }
 0x537   : > { %v3807_v17 = vsel %vm387_vm0, %v3799_v57, %v4535_v22  ;;  %v3808_v9 = vsel %vm387_vm0, %v3800_v42, %v4536_v56  ;;  %v4569_v10 = vpop.permute.xlu0 %4568 }
 0x538   : > { %v4199_v24 = vpack.c.bf16 %v3807_v17, %v3807_v17  ;;  %v4200_v50 = vpack.c.bf16 %v3808_v9, %v3808_v9  ;;  %v4571_v6 = vunpack.i.h.bf16 %v4569_v10  ;;  %v4570_v20 = vunpack.i.l.bf16 %v4569_v10 }
 0x53a   : > { %3889 = vst.msk [vmem:[%s7109_s30 + $0x10] sm:$0xf] %vm3884_vm5, %v4199_v24  ;;  %3890 = vst.msk [vmem:[%s7109_s30 + $0x14] sm:$0xf] %vm3884_vm5, %v4200_v50  ;;  %v3724_v1 = vsel %vm565_vm1, %v2562_v36, %v4571_v6  ;;  %v3723_v59 = vsel %vm565_vm1, %v2561_v13, %v4570_v20 }
 0x53b   : > { %v4188_v31 = vpack.c.bf16 %v3724_v1, %v3724_v1  ;;  %v4187_v41 = vpack.c.bf16 %v3723_v59, %v3723_v59  ;;  %v4574_v32 = vpop.permute.xlu0 %4573 }
 0x53c   : > { %4732 = shalt.err (!%p4729_p3)
}
 0x53d   : > { %s4733_s27 = scalar_lea.hbm %s7204_s17, 512  ;;  %s4737_s13 = scalar_lea.hbm %s7288_s6, 1024 }
 0x53e   : > { %p4734_p5 = scmp.ne.s32.totalorder %s7204_s17, %s4733_s27  ;;  %p4738_p9 = scmp.lt.s32.totalorder %s7204_s17, %s7288_s6 }
 0x53f   : > { %p4739_p12 = scmp.lt.s32.totalorder %s4737_s13, %s4733_s27 }
 0x540   : > { %p4735_p6 = pnand %p4734_p5, %p4896_p4 }
 0x541   : > { %p4740_p10 = por %p4739_p12, %p4738_p9 }
 0x542   : > { %p4736_p7 = pneg %p4735_p6 }
 0x544   : > { %p4741_p11 = pnand %p4740_p10, %p4736_p7 }
 0x546   : > { %4744 = shalt.err (!%p4741_p11)
}
 0x547   : > { %s4820_s20 = smov 64   ;;  %v4576_v8 = vunpack.i.h.bf16 %v4574_v32  ;;  %v4575_v63 = vunpack.i.l.bf16 %v4574_v32  ;;  %3845 = vst.msk [vmem:[%s7139_s12 + $0x4] sm:$0xf] %vm3843_vm13, %v4188_v31  ;;  %3844 = vst.msk [vmem:[%s7139_s12] sm:$0xf] %vm3843_vm13, %v4187_v41  ;;  %v2565_v38 = vsel %vm2560_vm9, %v2556_v18, %v7559_v0  ;;  %v2566_v11 = vsel %vm2560_vm9, %v2557_v52, %v7552_v3 }
 0x548   : > { %4262 = dma.vmem_to_hbm [thread:$0]  (%p4896_p4), %s7206_s14, 512, %s7204_s17, %s7222_s19, %s4820_s20, %s4820_s20, %s4808_s16  }
 0x549   : > { %v3728_v23 = vsel %vm565_vm1, %v2566_v11, %v4576_v8  ;;  %v3727_v45 = vsel %vm565_vm1, %v2565_v38, %v4575_v63 }
 0x54a   : > { %v4192_v46 = vpack.c.bf16 %v3728_v23, %v3728_v23  ;;  %v4191_v48 = vpack.c.bf16 %v3727_v45, %v3727_v45 }
 0x54c   : > { %3849 = vst.msk [vmem:[%s7139_s12 + $0x14] sm:$0xf] %vm3843_vm13, %v4192_v46  ;;  %3848 = vst.msk [vmem:[%s7139_s12 + $0x10] sm:$0xf] %vm3843_vm13, %v4191_v48 }
 0x54d PF: > { %p4274_p4 = scmp.ge.s32.totalorder %s4799_s26, 2  ;;  %s3949_s7 = sand.u32 1, %s4779_s21  }
 0x54e   : > { %s3950_s16 = scalar_lea.sflag [#allocation3], %s3949_s7 }
 0x54f   : > { %p4269_p13 = pnand %p4274_p4, %p4903_p8 }
 0x551   : > { %p4270_p0 = pneg %p4269_p13 }
 0x553   : > { %4774 = dma.done.wait (%p4270_p0), %s3950_s16, 512  }
 0x554   : > { %4776 = vsyncadd (%p4270_p0), %s3950_s16, 4294966784  ;;  %s21_s26 = sadd.s32 1, %s4799_s26   ;;  %s7570_s21 = smov %s4783_s22 }
 0x555   : > { %p18_p1 = scmp.ge.s32.totalorder %s21_s26, 4   ;;  %s7571_s22 = smov %s4787_s23 }
 0x556   : > { %s7572_s23 = smov %s4909_s10  ;;  %s7573_s24 = smov %s4795_s25 }
 0x557   : > { %s7574_s25 = smov %s7576_s29  ;;  %20 = sbr.rel (!%p18_p1) target bundleno = 5 (0x5), region = 98 }
 0x55c   :  { %3955 = vsyncpa [#allocation3], 1 }
 0x55d   :  { %3957 = vsyncpa [#allocation3 + $0x1], 1 }
 0x55e   :  { %3958 = vsyncpa [#allocation4], 1 }
 0x55f   :  { %3960 = vsyncpa [#allocation4 + $0x1], 1 }

</bundles_post_ra>
